<compile_context>
chip_gen: v5e
topology: v5e:2x2
jax: 0.10.0
libtpu: 0.0.40
codegen_flags: <defaults>
</compile_context>

<pallas_src>
import math

import jax
import jax.numpy as jnp
from jax import lax
from jax.experimental import pallas as pl
from jax.experimental.pallas import tpu as pltpu

LANE = 128        # TPU lane width
SUBLANE = 8       # f32 sublane count
OUT_PAD = 128     # lane-dense logits width (real logits live in lanes 0:2)


def _round_up(n, m):
    return ((n + m - 1) // m) * m


# ----------------------------------------------------------------------------
# math helpers used inside the kernel
# ----------------------------------------------------------------------------
def _layernorm(x, gamma, beta, eps):
    mean = jnp.mean(x, axis=-1, keepdims=True)
    var = jnp.mean((x - mean) ** 2, axis=-1, keepdims=True)   # unbiased=False
    return gamma * (x - mean) / jnp.sqrt(var + eps) + beta


def _gelu(x):
    # F.gelu default (erf based)
    return 0.5 * x * (1.0 + lax.erf(x * (1.0 / math.sqrt(2.0))))


# ----------------------------------------------------------------------------
# host-side weight packing: collapse all parameters into 2 contiguous slabs
# ----------------------------------------------------------------------------
def pack_weights(params, s_len):
    emb = params['embedding']
    vocab, d = emb.shape
    L = params['num_layers']
    lp = params['layers']

    # ---- slab M: every weight matrix with D rows, lane-concatenated --------
    mat_entries = []
    for l in range(L):
        mat_entries += [
            (f'wqkv{l}', lp['wqkv'][l]),        # (d, 3d)
            (f'wo{l}',   lp['wo'][l]),          # (d, d)
            (f'w1{l}',   lp['w1'][l]),          # (d, 4d)
            (f'w2t{l}',  lp['w2'][l].T),        # (d, 4d)  stored transposed
        ]
    mat_entries += [('fc1_w', params['fc1_w']),  # (d, d)
                    ('fc2_w', params['fc2_w'])]  # (d, d//2)
    mat_cols, col = {}, 0
    for name, a in mat_entries:
        mat_cols[name] = (col, int(a.shape[1]))
        col = _round_up(col + int(a.shape[1]), LANE)   # 128-aligned columns
    mat = jnp.zeros((d, _round_up(col, LANE)), jnp.float32)
    for name, a in mat_entries:
        c0, w = mat_cols[name]
        mat = mat.at[:, c0:c0 + w].set(a.astype(jnp.float32))

    # ---- slab V: embedding, pos-encoding, fc3 (lane padded) + all 1-row ----
    # ---- gammas/betas/biases, stacked along sublanes (8-aligned rows) ------
    fc3_w = jnp.zeros((d // 2, OUT_PAD), jnp.float32).at[:, :2].set(
        params['fc3_w'].astype(jnp.float32))
    fc3_b = jnp.zeros((1, OUT_PAD), jnp.float32).at[:, :2].set(
        params['fc3_b'].astype(jnp.float32))
    vec_entries = [('emb', emb),
                   ('pos', params['pos_encoding'][:s_len]),
                   ('fc3_w', fc3_w)]
    for l in range(L):
        vec_entries += [(f'ln1_g{l}', lp['ln1_g'][l]), (f'ln1_b{l}', lp['ln1_b'][l]),
                        (f'bqkv{l}',  lp['bqkv'][l]),  (f'bo{l}',    lp['bo'][l]),
                        (f'ln2_g{l}', lp['ln2_g'][l]), (f'ln2_b{l}', lp['ln2_b'][l]),
                        (f'b1{l}',    lp['b1'][l]),    (f'b2{l}',    lp['b2'][l])]
    vec_entries += [('norm_g', params['norm_g']), ('norm_b', params['norm_b']),
                    ('fc1_b', params['fc1_b']), ('fc2_b', params['fc2_b']),
                    ('fc3_b', fc3_b)]
    vec_width = max(LANE, _round_up(4 * d, LANE))
    vec_rows, row = {}, 0
    for name, a in vec_entries:
        assert int(a.shape[1]) <= vec_width
        vec_rows[name] = (row, int(a.shape[0]), int(a.shape[1]))
        row = _round_up(row + int(a.shape[0]), SUBLANE)     # 8-aligned rows
    vec = jnp.zeros((_round_up(row, SUBLANE), vec_width), jnp.float32)
    for name, a in vec_entries:
        r0, nr, nc = vec_rows[name]
        vec = vec.at[r0:r0 + nr, :nc].set(a.astype(jnp.float32))

    return mat, mat_cols, vec, vec_rows


def _batch_block_default(b):
    """Batch rows stacked per grid step.

    v7x has 2 TensorCores per chip -> split an even batch across the two cores
    (grid of 2 'parallel' steps).  Single-TC chips (v5e/v6e) stack the whole
    batch so the entire forward is one grid step.
    """
    try:
        kind = jax.devices()[0].device_kind.lower()
    except Exception:
        return b
    if ('v7' in kind or '7x' in kind) and b % 2 == 0:
        return b // 2
    return b


# ----------------------------------------------------------------------------
# fused forward: one pallas_call, one grid step per TB stacked sequences
# ----------------------------------------------------------------------------
def sann_forward(subtrees, params, batch_block=None):
    b, s, n = subtrees.shape
    emb = params['embedding']
    vocab, d = emb.shape
    num_heads = params['num_heads']
    num_layers = params['num_layers']
    hd = d // num_heads
    scale = 1.0 / math.sqrt(hd)

    tb = batch_block if batch_block is not None else _batch_block_default(b)
    assert b % tb == 0
    nb = b // tb          # grid steps
    bs = tb * s           # stacked rows per grid step

    mat, mat_cols, vec, vec_rows = pack_weights(params, s)
    idx = subtrees.astype(jnp.int32).reshape(nb, bs, n)

    f32 = jnp.float32

    def kernel(idx_ref, mat_ref, vec_ref, out_ref):
        def m_(name):                         # (d, w) matrix from slab M
            c0, w = mat_cols[name]
            return mat_ref[:, c0:c0 + w]

        def v_(name):                         # (rows, w) block from slab V
            r0, nr, nc = vec_rows[name]
            return vec_ref[r0:r0 + nr, 0:nc]

        ids = idx_ref[0]                                      # (bs, n) int32

        # -- embedding lookup (one-hot counts @ table) + mean over nodes -----
        iota_v = lax.broadcasted_iota(jnp.int32, (bs, vocab), 1)
        counts = jnp.zeros((bs, vocab), f32)
        for j in range(n):                                    # static, n = 6
            counts = counts + (ids[:, j:j + 1] == iota_v).astype(f32)
        x = jnp.dot(counts, v_('emb'), preferred_element_type=f32) * (1.0 / n)

        # -- positional encoding (same (s, d) rows for every stacked seq) ----
        pos = v_('pos')                                       # (s, d)
        x = x + (pos if tb == 1 else jnp.concatenate([pos] * tb, axis=0))

        # -- additive attention bias: key padding + block-diagonal batch -----
        node_sum = jnp.sum(ids.astype(f32), axis=1, keepdims=True)      # (bs,1)
        pad_col = (node_sum == 0.0).astype(f32)                         # (bs,1)
        # Route the (bs,1) column onto the key/lane axis with a rank-1 matmul
        # (always lowers; equivalent XLU transpose would also work).
        key_pad = lax.dot_general(jnp.ones((bs, 1), f32), pad_col,
                                  (((1,), (1,)), ((), ())),
                                  preferred_element_type=f32)           # (bs,bs)
        ri = lax.broadcasted_iota(jnp.int32, (bs, bs), 0)
        ci = lax.broadcasted_iota(jnp.int32, (bs, bs), 1)
        same_seq = jnp.zeros((bs, bs), jnp.bool_)
        for t in range(tb):                                   # static, tb <= b
            lo, hi = t * s, (t + 1) * s
            same_seq = jnp.logical_or(
                same_seq, (ri >= lo) & (ri < hi) & (ci >= lo) & (ci < hi))
        mask_bias = jnp.where(same_seq & (key_pad == 0.0), 0.0, -1e9)

        # -- pre-norm transformer encoder layers (statically unrolled) -------
        for l in range(num_layers):
            h = _layernorm(x, v_(f'ln1_g{l}'), v_(f'ln1_b{l}'), 1e-5)
            qkv = (jnp.dot(h, m_(f'wqkv{l}'), preferred_element_type=f32)
                   + v_(f'bqkv{l}'))
            q, k, v = qkv[:, 0:d], qkv[:, d:2 * d], qkv[:, 2 * d:3 * d]

            ctx = []
            for hh in range(num_heads):                       # static, H = 4
                lo = hh * hd
                qh = q[:, lo:lo + hd]
                kh = k[:, lo:lo + hd]
                vh = v[:, lo:lo + hd]
                sc = lax.dot_general(qh, kh, (((1,), (1,)), ((), ())),
                                     preferred_element_type=f32) * scale
                sc = sc + mask_bias
                mmax = jnp.max(sc, axis=-1, keepdims=True)
                e = jnp.exp(sc - mmax)
                probs = e / jnp.sum(e, axis=-1, keepdims=True)   # exact softmax
                ctx.append(jnp.dot(probs, vh, preferred_element_type=f32))
            ctx = jnp.concatenate(ctx, axis=-1)               # (bs, d)
            # one output projection for all heads (concat folded into matmul)
            attn = (jnp.dot(ctx, m_(f'wo{l}'), preferred_element_type=f32)
                    + v_(f'bo{l}'))
            x = x + attn                                      # dropout1 = id (eval)

            h2 = _layernorm(x, v_(f'ln2_g{l}'), v_(f'ln2_b{l}'), 1e-5)
            ff = jnp.maximum(
                jnp.dot(h2, m_(f'w1{l}'), preferred_element_type=f32)
                + v_(f'b1{l}'), 0.0)
            ff = (lax.dot_general(ff, m_(f'w2t{l}'), (((1,), (1,)), ((), ())),
                                  preferred_element_type=f32)
                  + v_(f'b2{l}'))
            x = x + ff                                        # dropout2 = id (eval)

        # -- final LayerNorm(1e-12), per-sequence mean pool, MLP head --------
        xn = _layernorm(x, v_('norm_g'), v_('norm_b'), 1e-12)
        pr = lax.broadcasted_iota(jnp.int32, (tb, bs), 0)
        pc = lax.broadcasted_iota(jnp.int32, (tb, bs), 1)
        pool = jnp.where((pc >= pr * s) & (pc < (pr + 1) * s), 1.0 / s, 0.0)
        pooled = jnp.dot(pool, xn, preferred_element_type=f32)          # (tb, d)

        h1 = _gelu(jnp.dot(pooled, m_('fc1_w'), preferred_element_type=f32)
                   + v_('fc1_b')) + pooled                    # residual, dropout=id
        h2o = _gelu(jnp.dot(h1, m_('fc2_w'), preferred_element_type=f32)
                    + v_('fc2_b'))
        out_ref[0] = (jnp.dot(h2o, v_('fc3_w'), preferred_element_type=f32)
                      + v_('fc3_b'))                          # (tb, 128) lane-dense

    # advisory cost hint (tiny, but lets XLA schedule the call tightly)
    flops_layer = (2 * b * s * d * 3 * d            # fused QKV projection
                   + 2 * 2 * b * s * bs * d         # per-head QK^T and P@V
                   + 2 * b * s * d * d              # attention output projection
                   + 2 * 2 * b * s * d * 4 * d)     # feed-forward
    flops = (2 * b * s * vocab * d + num_layers * flops_layer
             + 2 * b * bs * d + 2 * b * d * d + 2 * b * d * (d // 2)
             + 2 * b * (d // 2) * OUT_PAD)
    transcendentals = num_layers * num_heads * b * s * bs + 2 * b * d
    bytes_accessed = 4 * (int(idx.size) + int(mat.size) + int(vec.size)
                          + nb * tb * OUT_PAD)

    out = pl.pallas_call(
        kernel,
        grid=(nb,),
        in_specs=[
            pl.BlockSpec((1, bs, n), lambda i: (i, 0, 0)),     # token ids
            pl.BlockSpec(mat.shape, lambda i: (0, 0)),         # matrix slab
            pl.BlockSpec(vec.shape, lambda i: (0, 0)),         # row-vector slab
        ],
        out_specs=pl.BlockSpec((1, tb, OUT_PAD), lambda i: (i, 0, 0)),
        out_shape=jax.ShapeDtypeStruct((nb, tb, OUT_PAD), jnp.float32),
        compiler_params=pltpu.CompilerParams(
            dimension_semantics=("parallel",)),                # v7x: 1 step / core
        cost_estimate=pl.CostEstimate(flops=int(flops),
                                      transcendentals=int(transcendentals),
                                      bytes_accessed=int(bytes_accessed)),
    )(idx, mat, vec)
    return out.reshape(b, OUT_PAD)[:, :2]


# ----------------------------------------------------------------------------
# deterministic synthetic parameters
# ----------------------------------------------------------------------------
def create_pos_encoding(max_len, d_model):
    pos = jnp.arange(max_len, dtype=jnp.float32)[:, None]
    div_term = jnp.exp(jnp.arange(0, d_model, 2, dtype=jnp.float32)
                       * (-math.log(10000.0) / d_model))
    pe = jnp.zeros((max_len, d_model), jnp.float32)
    pe = pe.at[:, 0::2].set(jnp.sin(pos * div_term))
    pe = pe.at[:, 1::2].set(jnp.cos(pos * div_term))
    return pe                                                  # (max_len, D)


def init_params(key, vocab, d, num_heads, num_layers):
    keys = iter(jax.random.split(key, 32))

    def nrm(shape, std):
        return (std * jax.random.normal(next(keys), shape)).astype(jnp.float32)

    f = 4 * d
    L = num_layers
    layers = {
        'ln1_g': jnp.ones((L, 1, d), jnp.float32),
        'ln1_b': jnp.zeros((L, 1, d), jnp.float32),
        # fused QKV projection: [Wq | Wk | Wv] along the output dim
        'wqkv': nrm((L, d, 3 * d), 0.05),
        'bqkv': nrm((L, 1, 3 * d), 0.02),
        'wo': nrm((L, d, d), 0.05),
        'bo': nrm((L, 1, d), 0.02),
        'ln2_g': jnp.ones((L, 1, d), jnp.float32),
        'ln2_b': jnp.zeros((L, 1, d), jnp.float32),
        'w1': nrm((L, d, f), 0.05),
        'b1': nrm((L, 1, f), 0.02),
        'w2': nrm((L, f, d), 0.05),
        'b2': nrm((L, 1, d), 0.02),
    }
    return {
        'embedding': nrm((vocab, d), d ** (-0.5)),
        'pos_encoding': create_pos_encoding(200, d),
        'num_heads': num_heads,
        'num_layers': num_layers,
        'layers': layers,
        'norm_g': jnp.ones((1, d), jnp.float32),
        'norm_b': jnp.zeros((1, d), jnp.float32),
        'fc1_w': nrm((d, d), 0.05), 'fc1_b': nrm((1, d), 0.02),
        'fc2_w': nrm((d, d // 2), 0.05), 'fc2_b': nrm((1, d // 2), 0.02),
        'fc3_w': nrm((d // 2, 2), 0.05), 'fc3_b': nrm((1, 2), 0.02),
    }


if __name__ == "__main__":
    VOCAB, D, HEADS, LAYERS = 32, 32, 4, 2
    B, S, N = 2, 8, 6

    key = jax.random.PRNGKey(0)
    pkey, dkey = jax.random.split(key)
    params = init_params(pkey, VOCAB, D, HEADS, LAYERS)

    subtrees = jax.random.randint(dkey, (B, S, N), minval=0, maxval=VOCAB,
                                  dtype=jnp.int32)
    # make one subtree fully padded to exercise the key-padding mask
    subtrees = subtrees.at[1, -1, :].set(0)

    logits = jax.block_until_ready(sann_forward(subtrees, params))
    assert logits.shape == (B, 2) and logits.dtype == jnp.float32
    assert bool(jnp.all(jnp.isfinite(logits)))

    # consistency check: batch stacked in one grid step vs. split across steps
    tb_used = _batch_block_default(B)
    alt_tb = 1 if tb_used != 1 else B
    logits_alt = jax.block_until_ready(
        sann_forward(subtrees, params, batch_block=alt_tb))
    assert bool(jnp.allclose(logits, logits_alt, atol=1e-4, rtol=1e-4))

    print("KERNEL_OK")
</pallas_src>

<mosaic_0001>
module attributes {stable_mosaic.version = 11 : i64} {
  func.func @kernel(%arg0: i32, %arg1: memref<1x16x6xi32, #tpu.memory_space<vmem>>, %arg2: memref<32x1280xf32, #tpu.memory_space<vmem>>, %arg3: memref<224x128xf32, #tpu.memory_space<vmem>>, %arg4: memref<1x2x128xf32, #tpu.memory_space<vmem>>) attributes {dimension_semantics = [#tpu.dimension_semantics<parallel>], iteration_bounds = array<i64: 1>, scalar_prefetch = 0 : i64, scratch_operands = 0 : i64, tpu.core_type = #tpu.core_type<tc>, window_params = [{transform_indices = @transform_0, window_bounds = array<i64: 1, 16, 6>}, {pipeline_mode = #tpu.pipeline_mode<synchronous>, transform_indices = @transform_1, window_bounds = array<i64: 32, 1280>}, {pipeline_mode = #tpu.pipeline_mode<synchronous>, transform_indices = @transform_2, window_bounds = array<i64: 224, 128>}, {transform_indices = @transform_3, window_bounds = array<i64: 1, 2, 128>}]} {
    %c0 = arith.constant 0 : index
    %c0_0 = arith.constant 0 : index
    %c0_1 = arith.constant 0 : index
    %0 = vector.load %arg1[%c0, %c0_0, %c0_1] : memref<1x16x6xi32, #tpu.memory_space<vmem>>, vector<1x16x6xi32>
    %1 = vector.shape_cast %0 : vector<1x16x6xi32> to vector<16x6xi32>
    %2 = tpu.iota {dimensions = array<i32: 1>} : vector<16x32xi32>
    %cst = arith.constant 0.000000e+00 : f32
    %3 = vector.broadcast %cst : f32 to vector<16x32xf32>
    %4 = vector.extract_strided_slice %1 {offsets = [0, 0], sizes = [16, 1], strides = [1, 1]} : vector<16x6xi32> to vector<16x1xi32>
    %5 = vector.broadcast %4 : vector<16x1xi32> to vector<16x32xi32>
    %6 = arith.cmpi eq, %5, %2 : vector<16x32xi32>
    %7 = arith.extui %6 : vector<16x32xi1> to vector<16x32xi32>
    %8 = arith.sitofp %7 : vector<16x32xi32> to vector<16x32xf32>
    %9 = arith.addf %3, %8 : vector<16x32xf32>
    %10 = vector.extract_strided_slice %1 {offsets = [0, 1], sizes = [16, 1], strides = [1, 1]} : vector<16x6xi32> to vector<16x1xi32>
    %11 = vector.broadcast %10 : vector<16x1xi32> to vector<16x32xi32>
    %12 = arith.cmpi eq, %11, %2 : vector<16x32xi32>
    %13 = arith.extui %12 : vector<16x32xi1> to vector<16x32xi32>
    %14 = arith.sitofp %13 : vector<16x32xi32> to vector<16x32xf32>
    %15 = arith.addf %9, %14 : vector<16x32xf32>
    %16 = vector.extract_strided_slice %1 {offsets = [0, 2], sizes = [16, 1], strides = [1, 1]} : vector<16x6xi32> to vector<16x1xi32>
    %17 = vector.broadcast %16 : vector<16x1xi32> to vector<16x32xi32>
    %18 = arith.cmpi eq, %17, %2 : vector<16x32xi32>
    %19 = arith.extui %18 : vector<16x32xi1> to vector<16x32xi32>
    %20 = arith.sitofp %19 : vector<16x32xi32> to vector<16x32xf32>
    %21 = arith.addf %15, %20 : vector<16x32xf32>
    %22 = vector.extract_strided_slice %1 {offsets = [0, 3], sizes = [16, 1], strides = [1, 1]} : vector<16x6xi32> to vector<16x1xi32>
    %23 = vector.broadcast %22 : vector<16x1xi32> to vector<16x32xi32>
    %24 = arith.cmpi eq, %23, %2 : vector<16x32xi32>
    %25 = arith.extui %24 : vector<16x32xi1> to vector<16x32xi32>
    %26 = arith.sitofp %25 : vector<16x32xi32> to vector<16x32xf32>
    %27 = arith.addf %21, %26 : vector<16x32xf32>
    %28 = vector.extract_strided_slice %1 {offsets = [0, 4], sizes = [16, 1], strides = [1, 1]} : vector<16x6xi32> to vector<16x1xi32>
    %29 = vector.broadcast %28 : vector<16x1xi32> to vector<16x32xi32>
    %30 = arith.cmpi eq, %29, %2 : vector<16x32xi32>
    %31 = arith.extui %30 : vector<16x32xi1> to vector<16x32xi32>
    %32 = arith.sitofp %31 : vector<16x32xi32> to vector<16x32xf32>
    %33 = arith.addf %27, %32 : vector<16x32xf32>
    %34 = vector.extract_strided_slice %1 {offsets = [0, 5], sizes = [16, 1], strides = [1, 1]} : vector<16x6xi32> to vector<16x1xi32>
    %35 = vector.broadcast %34 : vector<16x1xi32> to vector<16x32xi32>
    %36 = arith.cmpi eq, %35, %2 : vector<16x32xi32>
    %37 = arith.extui %36 : vector<16x32xi1> to vector<16x32xi32>
    %38 = arith.sitofp %37 : vector<16x32xi32> to vector<16x32xf32>
    %39 = arith.addf %33, %38 : vector<16x32xf32>
    %c0_2 = arith.constant 0 : index
    %c0_3 = arith.constant 0 : index
    %40 = vector.load %arg3[%c0_2, %c0_3] : memref<224x128xf32, #tpu.memory_space<vmem>>, vector<32x32xf32>
    %cst_4 = arith.constant dense<0.000000e+00> : vector<16x32xf32>
    %41 = tpu.matmul %39, %40, %cst_4 {dimension_numbers = #tpu.dot_dimension_numbers<[1], [0], [0], [1], [0, 0, 1, 1], [], []>} : vector<16x32xf32>, vector<32x32xf32>, vector<16x32xf32> -> vector<16x32xf32>
    %cst_5 = arith.constant 0.166666672 : f32
    %42 = vector.broadcast %cst_5 : f32 to vector<16x32xf32>
    %43 = arith.mulf %41, %42 : vector<16x32xf32>
    %c32 = arith.constant 32 : index
    %c0_6 = arith.constant 0 : index
    %44 = vector.load %arg3[%c32, %c0_6] : memref<224x128xf32, #tpu.memory_space<vmem>>, vector<8x32xf32>
    %45 = tpu.concatenate %44, %44 in 0 : vector<8x32xf32>, vector<8x32xf32> -> vector<16x32xf32>
    %46 = arith.addf %43, %45 : vector<16x32xf32>
    %47 = arith.sitofp %1 : vector<16x6xi32> to vector<16x6xf32>
    %cst_7 = arith.constant dense<0.000000e+00> : vector<16xf32>
    %48 = vector.multi_reduction <add>, %47, %cst_7 [1] : vector<16x6xf32> to vector<16xf32>
    %49 = vector.shape_cast %48 : vector<16xf32> to vector<16x1xf32>
    %cst_8 = arith.constant 0.000000e+00 : f32
    %50 = vector.broadcast %cst_8 : f32 to vector<16x1xf32>
    %51 = arith.cmpf oeq, %49, %50 : vector<16x1xf32>
    %52 = arith.extui %51 : vector<16x1xi1> to vector<16x1xi32>
    %53 = arith.sitofp %52 : vector<16x1xi32> to vector<16x1xf32>
    %cst_9 = arith.constant 1.000000e+00 : f32
    %54 = vector.broadcast %cst_9 : f32 to vector<16x1xf32>
    %cst_10 = arith.constant dense<0.000000e+00> : vector<16x16xf32>
    %55 = tpu.matmul %54, %53, %cst_10 {dimension_numbers = #tpu.dot_dimension_numbers<[1], [1], [0], [0], [0, 0, 1, 0], [], []>} : vector<16x1xf32>, vector<16x1xf32>, vector<16x16xf32> -> vector<16x16xf32>
    %56 = tpu.iota {dimensions = array<i32: 0>} : vector<16x16xi32>
    %57 = tpu.iota {dimensions = array<i32: 1>} : vector<16x16xi32>
    %false = arith.constant false
    %58 = vector.broadcast %false : i1 to vector<16x16xi1>
    %c0_i32 = arith.constant 0 : i32
    %59 = vector.broadcast %c0_i32 : i32 to vector<16x16xi32>
    %60 = arith.cmpi sge, %56, %59 : vector<16x16xi32>
    %c8_i32 = arith.constant 8 : i32
    %61 = vector.broadcast %c8_i32 : i32 to vector<16x16xi32>
    %62 = arith.cmpi slt, %56, %61 : vector<16x16xi32>
    %63 = arith.andi %60, %62 : vector<16x16xi1>
    %c0_i32_11 = arith.constant 0 : i32
    %64 = vector.broadcast %c0_i32_11 : i32 to vector<16x16xi32>
    %65 = arith.cmpi sge, %57, %64 : vector<16x16xi32>
    %66 = arith.andi %63, %65 : vector<16x16xi1>
    %c8_i32_12 = arith.constant 8 : i32
    %67 = vector.broadcast %c8_i32_12 : i32 to vector<16x16xi32>
    %68 = arith.cmpi slt, %57, %67 : vector<16x16xi32>
    %69 = arith.andi %66, %68 : vector<16x16xi1>
    %70 = arith.ori %58, %69 : vector<16x16xi1>
    %c8_i32_13 = arith.constant 8 : i32
    %71 = vector.broadcast %c8_i32_13 : i32 to vector<16x16xi32>
    %72 = arith.cmpi sge, %56, %71 : vector<16x16xi32>
    %c16_i32 = arith.constant 16 : i32
    %73 = vector.broadcast %c16_i32 : i32 to vector<16x16xi32>
    %74 = arith.cmpi slt, %56, %73 : vector<16x16xi32>
    %75 = arith.andi %72, %74 : vector<16x16xi1>
    %c8_i32_14 = arith.constant 8 : i32
    %76 = vector.broadcast %c8_i32_14 : i32 to vector<16x16xi32>
    %77 = arith.cmpi sge, %57, %76 : vector<16x16xi32>
    %78 = arith.andi %75, %77 : vector<16x16xi1>
    %c16_i32_15 = arith.constant 16 : i32
    %79 = vector.broadcast %c16_i32_15 : i32 to vector<16x16xi32>
    %80 = arith.cmpi slt, %57, %79 : vector<16x16xi32>
    %81 = arith.andi %78, %80 : vector<16x16xi1>
    %82 = arith.ori %70, %81 : vector<16x16xi1>
    %cst_16 = arith.constant 0.000000e+00 : f32
    %83 = vector.broadcast %cst_16 : f32 to vector<16x16xf32>
    %84 = arith.cmpf oeq, %55, %83 : vector<16x16xf32>
    %85 = arith.andi %82, %84 : vector<16x16xi1>
    %cst_17 = arith.constant 0.000000e+00 : f32
    %cst_18 = arith.constant -1.000000e+09 : f32
    %86 = vector.broadcast %cst_17 : f32 to vector<16x16xf32>
    %87 = vector.broadcast %cst_18 : f32 to vector<16x16xf32>
    %88 = arith.select %85, %86, %87 : vector<16x16xi1>, vector<16x16xf32>
    %c56 = arith.constant 56 : index
    %c0_19 = arith.constant 0 : index
    %89 = vector.load %arg3[%c56, %c0_19] : memref<224x128xf32, #tpu.memory_space<vmem>>, vector<1x32xf32>
    %c64 = arith.constant 64 : index
    %c0_20 = arith.constant 0 : index
    %90 = vector.load %arg3[%c64, %c0_20] : memref<224x128xf32, #tpu.memory_space<vmem>>, vector<1x32xf32>
    %cst_21 = arith.constant dense<0.000000e+00> : vector<16xf32>
    %91 = vector.multi_reduction <add>, %46, %cst_21 [1] : vector<16x32xf32> to vector<16xf32>
    %92 = vector.shape_cast %91 : vector<16xf32> to vector<16x1xf32>
    %cst_22 = arith.constant 3.200000e+01 : f32
    %93 = vector.broadcast %cst_22 : f32 to vector<16x1xf32>
    %94 = arith.divf %92, %93 : vector<16x1xf32>
    %95 = vector.broadcast %94 : vector<16x1xf32> to vector<16x32xf32>
    %96 = arith.subf %46, %95 : vector<16x32xf32>
    %97 = arith.mulf %96, %96 : vector<16x32xf32>
    %cst_23 = arith.constant dense<0.000000e+00> : vector<16xf32>
    %98 = vector.multi_reduction <add>, %97, %cst_23 [1] : vector<16x32xf32> to vector<16xf32>
    %99 = vector.shape_cast %98 : vector<16xf32> to vector<16x1xf32>
    %cst_24 = arith.constant 3.200000e+01 : f32
    %100 = vector.broadcast %cst_24 : f32 to vector<16x1xf32>
    %101 = arith.divf %99, %100 : vector<16x1xf32>
    %102 = vector.broadcast %94 : vector<16x1xf32> to vector<16x32xf32>
    %103 = arith.subf %46, %102 : vector<16x32xf32>
    %104 = vector.broadcast %89 : vector<1x32xf32> to vector<16x32xf32>
    %105 = arith.mulf %104, %103 : vector<16x32xf32>
    %cst_25 = arith.constant 9.99999974E-6 : f32
    %106 = vector.broadcast %cst_25 : f32 to vector<16x1xf32>
    %107 = arith.addf %101, %106 : vector<16x1xf32>
    %108 = math.sqrt %107 : vector<16x1xf32>
    %109 = vector.broadcast %108 : vector<16x1xf32> to vector<16x32xf32>
    %110 = arith.divf %105, %109 : vector<16x32xf32>
    %111 = vector.broadcast %90 : vector<1x32xf32> to vector<16x32xf32>
    %112 = arith.addf %110, %111 : vector<16x32xf32>
    %c0_26 = arith.constant 0 : index
    %c0_27 = arith.constant 0 : index
    %113 = vector.load %arg2[%c0_26, %c0_27] : memref<32x1280xf32, #tpu.memory_space<vmem>>, vector<32x96xf32>
    %cst_28 = arith.constant dense<0.000000e+00> : vector<16x96xf32>
    %114 = tpu.matmul %112, %113, %cst_28 {dimension_numbers = #tpu.dot_dimension_numbers<[1], [0], [0], [1], [0, 0, 1, 1], [], []>} : vector<16x32xf32>, vector<32x96xf32>, vector<16x96xf32> -> vector<16x96xf32>
    %c72 = arith.constant 72 : index
    %c0_29 = arith.constant 0 : index
    %115 = vector.load %arg3[%c72, %c0_29] : memref<224x128xf32, #tpu.memory_space<vmem>>, vector<1x96xf32>
    %116 = vector.broadcast %115 : vector<1x96xf32> to vector<16x96xf32>
    %117 = arith.addf %114, %116 : vector<16x96xf32>
    %118 = vector.extract_strided_slice %117 {offsets = [0, 0], sizes = [16, 32], strides = [1, 1]} : vector<16x96xf32> to vector<16x32xf32>
    %119 = vector.extract_strided_slice %117 {offsets = [0, 32], sizes = [16, 32], strides = [1, 1]} : vector<16x96xf32> to vector<16x32xf32>
    %120 = vector.extract_strided_slice %117 {offsets = [0, 64], sizes = [16, 32], strides = [1, 1]} : vector<16x96xf32> to vector<16x32xf32>
    %121 = vector.extract_strided_slice %118 {offsets = [0, 0], sizes = [16, 8], strides = [1, 1]} : vector<16x32xf32> to vector<16x8xf32>
    %122 = vector.extract_strided_slice %119 {offsets = [0, 0], sizes = [16, 8], strides = [1, 1]} : vector<16x32xf32> to vector<16x8xf32>
    %123 = vector.extract_strided_slice %120 {offsets = [0, 0], sizes = [16, 8], strides = [1, 1]} : vector<16x32xf32> to vector<16x8xf32>
    %cst_30 = arith.constant dense<0.000000e+00> : vector<16x16xf32>
    %124 = tpu.matmul %121, %122, %cst_30 {dimension_numbers = #tpu.dot_dimension_numbers<[1], [1], [0], [0], [0, 0, 1, 0], [], []>} : vector<16x8xf32>, vector<16x8xf32>, vector<16x16xf32> -> vector<16x16xf32>
    %cst_31 = arith.constant 0.353553385 : f32
    %125 = vector.broadcast %cst_31 : f32 to vector<16x16xf32>
    %126 = arith.mulf %124, %125 : vector<16x16xf32>
    %127 = arith.addf %126, %88 : vector<16x16xf32>
    %cst_32 = arith.constant dense<0xFF800000> : vector<16xf32>
    %128 = vector.multi_reduction <maximumf>, %127, %cst_32 [1] : vector<16x16xf32> to vector<16xf32>
    %129 = vector.shape_cast %128 : vector<16xf32> to vector<16x1xf32>
    %130 = vector.broadcast %129 : vector<16x1xf32> to vector<16x16xf32>
    %131 = arith.subf %127, %130 : vector<16x16xf32>
    %132 = math.exp %131 : vector<16x16xf32>
    %cst_33 = arith.constant dense<0.000000e+00> : vector<16xf32>
    %133 = vector.multi_reduction <add>, %132, %cst_33 [1] : vector<16x16xf32> to vector<16xf32>
    %134 = vector.shape_cast %133 : vector<16xf32> to vector<16x1xf32>
    %135 = vector.broadcast %134 : vector<16x1xf32> to vector<16x16xf32>
    %136 = arith.divf %132, %135 : vector<16x16xf32>
    %cst_34 = arith.constant dense<0.000000e+00> : vector<16x8xf32>
    %137 = tpu.matmul %136, %123, %cst_34 {dimension_numbers = #tpu.dot_dimension_numbers<[1], [0], [0], [1], [0, 0, 1, 1], [], []>} : vector<16x16xf32>, vector<16x8xf32>, vector<16x8xf32> -> vector<16x8xf32>
    %138 = vector.extract_strided_slice %118 {offsets = [0, 8], sizes = [16, 8], strides = [1, 1]} : vector<16x32xf32> to vector<16x8xf32>
    %139 = vector.extract_strided_slice %119 {offsets = [0, 8], sizes = [16, 8], strides = [1, 1]} : vector<16x32xf32> to vector<16x8xf32>
    %140 = vector.extract_strided_slice %120 {offsets = [0, 8], sizes = [16, 8], strides = [1, 1]} : vector<16x32xf32> to vector<16x8xf32>
    %cst_35 = arith.constant dense<0.000000e+00> : vector<16x16xf32>
    %141 = tpu.matmul %138, %139, %cst_35 {dimension_numbers = #tpu.dot_dimension_numbers<[1], [1], [0], [0], [0, 0, 1, 0], [], []>} : vector<16x8xf32>, vector<16x8xf32>, vector<16x16xf32> -> vector<16x16xf32>
    %cst_36 = arith.constant 0.353553385 : f32
    %142 = vector.broadcast %cst_36 : f32 to vector<16x16xf32>
    %143 = arith.mulf %141, %142 : vector<16x16xf32>
    %144 = arith.addf %143, %88 : vector<16x16xf32>
    %cst_37 = arith.constant dense<0xFF800000> : vector<16xf32>
    %145 = vector.multi_reduction <maximumf>, %144, %cst_37 [1] : vector<16x16xf32> to vector<16xf32>
    %146 = vector.shape_cast %145 : vector<16xf32> to vector<16x1xf32>
    %147 = vector.broadcast %146 : vector<16x1xf32> to vector<16x16xf32>
    %148 = arith.subf %144, %147 : vector<16x16xf32>
    %149 = math.exp %148 : vector<16x16xf32>
    %cst_38 = arith.constant dense<0.000000e+00> : vector<16xf32>
    %150 = vector.multi_reduction <add>, %149, %cst_38 [1] : vector<16x16xf32> to vector<16xf32>
    %151 = vector.shape_cast %150 : vector<16xf32> to vector<16x1xf32>
    %152 = vector.broadcast %151 : vector<16x1xf32> to vector<16x16xf32>
    %153 = arith.divf %149, %152 : vector<16x16xf32>
    %cst_39 = arith.constant dense<0.000000e+00> : vector<16x8xf32>
    %154 = tpu.matmul %153, %140, %cst_39 {dimension_numbers = #tpu.dot_dimension_numbers<[1], [0], [0], [1], [0, 0, 1, 1], [], []>} : vector<16x16xf32>, vector<16x8xf32>, vector<16x8xf32> -> vector<16x8xf32>
    %155 = vector.extract_strided_slice %118 {offsets = [0, 16], sizes = [16, 8], strides = [1, 1]} : vector<16x32xf32> to vector<16x8xf32>
    %156 = vector.extract_strided_slice %119 {offsets = [0, 16], sizes = [16, 8], strides = [1, 1]} : vector<16x32xf32> to vector<16x8xf32>
    %157 = vector.extract_strided_slice %120 {offsets = [0, 16], sizes = [16, 8], strides = [1, 1]} : vector<16x32xf32> to vector<16x8xf32>
    %cst_40 = arith.constant dense<0.000000e+00> : vector<16x16xf32>
    %158 = tpu.matmul %155, %156, %cst_40 {dimension_numbers = #tpu.dot_dimension_numbers<[1], [1], [0], [0], [0, 0, 1, 0], [], []>} : vector<16x8xf32>, vector<16x8xf32>, vector<16x16xf32> -> vector<16x16xf32>
    %cst_41 = arith.constant 0.353553385 : f32
    %159 = vector.broadcast %cst_41 : f32 to vector<16x16xf32>
    %160 = arith.mulf %158, %159 : vector<16x16xf32>
    %161 = arith.addf %160, %88 : vector<16x16xf32>
    %cst_42 = arith.constant dense<0xFF800000> : vector<16xf32>
    %162 = vector.multi_reduction <maximumf>, %161, %cst_42 [1] : vector<16x16xf32> to vector<16xf32>
    %163 = vector.shape_cast %162 : vector<16xf32> to vector<16x1xf32>
    %164 = vector.broadcast %163 : vector<16x1xf32> to vector<16x16xf32>
    %165 = arith.subf %161, %164 : vector<16x16xf32>
    %166 = math.exp %165 : vector<16x16xf32>
    %cst_43 = arith.constant dense<0.000000e+00> : vector<16xf32>
    %167 = vector.multi_reduction <add>, %166, %cst_43 [1] : vector<16x16xf32> to vector<16xf32>
    %168 = vector.shape_cast %167 : vector<16xf32> to vector<16x1xf32>
    %169 = vector.broadcast %168 : vector<16x1xf32> to vector<16x16xf32>
    %170 = arith.divf %166, %169 : vector<16x16xf32>
    %cst_44 = arith.constant dense<0.000000e+00> : vector<16x8xf32>
    %171 = tpu.matmul %170, %157, %cst_44 {dimension_numbers = #tpu.dot_dimension_numbers<[1], [0], [0], [1], [0, 0, 1, 1], [], []>} : vector<16x16xf32>, vector<16x8xf32>, vector<16x8xf32> -> vector<16x8xf32>
    %172 = vector.extract_strided_slice %118 {offsets = [0, 24], sizes = [16, 8], strides = [1, 1]} : vector<16x32xf32> to vector<16x8xf32>
    %173 = vector.extract_strided_slice %119 {offsets = [0, 24], sizes = [16, 8], strides = [1, 1]} : vector<16x32xf32> to vector<16x8xf32>
    %174 = vector.extract_strided_slice %120 {offsets = [0, 24], sizes = [16, 8], strides = [1, 1]} : vector<16x32xf32> to vector<16x8xf32>
    %cst_45 = arith.constant dense<0.000000e+00> : vector<16x16xf32>
    %175 = tpu.matmul %172, %173, %cst_45 {dimension_numbers = #tpu.dot_dimension_numbers<[1], [1], [0], [0], [0, 0, 1, 0], [], []>} : vector<16x8xf32>, vector<16x8xf32>, vector<16x16xf32> -> vector<16x16xf32>
    %cst_46 = arith.constant 0.353553385 : f32
    %176 = vector.broadcast %cst_46 : f32 to vector<16x16xf32>
    %177 = arith.mulf %175, %176 : vector<16x16xf32>
    %178 = arith.addf %177, %88 : vector<16x16xf32>
    %cst_47 = arith.constant dense<0xFF800000> : vector<16xf32>
    %179 = vector.multi_reduction <maximumf>, %178, %cst_47 [1] : vector<16x16xf32> to vector<16xf32>
    %180 = vector.shape_cast %179 : vector<16xf32> to vector<16x1xf32>
    %181 = vector.broadcast %180 : vector<16x1xf32> to vector<16x16xf32>
    %182 = arith.subf %178, %181 : vector<16x16xf32>
    %183 = math.exp %182 : vector<16x16xf32>
    %cst_48 = arith.constant dense<0.000000e+00> : vector<16xf32>
    %184 = vector.multi_reduction <add>, %183, %cst_48 [1] : vector<16x16xf32> to vector<16xf32>
    %185 = vector.shape_cast %184 : vector<16xf32> to vector<16x1xf32>
    %186 = vector.broadcast %185 : vector<16x1xf32> to vector<16x16xf32>
    %187 = arith.divf %183, %186 : vector<16x16xf32>
    %cst_49 = arith.constant dense<0.000000e+00> : vector<16x8xf32>
    %188 = tpu.matmul %187, %174, %cst_49 {dimension_numbers = #tpu.dot_dimension_numbers<[1], [0], [0], [1], [0, 0, 1, 1], [], []>} : vector<16x16xf32>, vector<16x8xf32>, vector<16x8xf32> -> vector<16x8xf32>
    %189 = tpu.concatenate %137, %154, %171, %188 in 1 : vector<16x8xf32>, vector<16x8xf32>, vector<16x8xf32>, vector<16x8xf32> -> vector<16x32xf32>
    %c0_50 = arith.constant 0 : index
    %c128 = arith.constant 128 : index
    %190 = vector.load %arg2[%c0_50, %c128] : memref<32x1280xf32, #tpu.memory_space<vmem>>, vector<32x32xf32>
    %cst_51 = arith.constant dense<0.000000e+00> : vector<16x32xf32>
    %191 = tpu.matmul %189, %190, %cst_51 {dimension_numbers = #tpu.dot_dimension_numbers<[1], [0], [0], [1], [0, 0, 1, 1], [], []>} : vector<16x32xf32>, vector<32x32xf32>, vector<16x32xf32> -> vector<16x32xf32>
    %c80 = arith.constant 80 : index
    %c0_52 = arith.constant 0 : index
    %192 = vector.load %arg3[%c80, %c0_52] : memref<224x128xf32, #tpu.memory_space<vmem>>, vector<1x32xf32>
    %193 = vector.broadcast %192 : vector<1x32xf32> to vector<16x32xf32>
    %194 = arith.addf %191, %193 : vector<16x32xf32>
    %195 = arith.addf %46, %194 : vector<16x32xf32>
    %c88 = arith.constant 88 : index
    %c0_53 = arith.constant 0 : index
    %196 = vector.load %arg3[%c88, %c0_53] : memref<224x128xf32, #tpu.memory_space<vmem>>, vector<1x32xf32>
    %c96 = arith.constant 96 : index
    %c0_54 = arith.constant 0 : index
    %197 = vector.load %arg3[%c96, %c0_54] : memref<224x128xf32, #tpu.memory_space<vmem>>, vector<1x32xf32>
    %cst_55 = arith.constant dense<0.000000e+00> : vector<16xf32>
    %198 = vector.multi_reduction <add>, %195, %cst_55 [1] : vector<16x32xf32> to vector<16xf32>
    %199 = vector.shape_cast %198 : vector<16xf32> to vector<16x1xf32>
    %cst_56 = arith.constant 3.200000e+01 : f32
    %200 = vector.broadcast %cst_56 : f32 to vector<16x1xf32>
    %201 = arith.divf %199, %200 : vector<16x1xf32>
    %202 = vector.broadcast %201 : vector<16x1xf32> to vector<16x32xf32>
    %203 = arith.subf %195, %202 : vector<16x32xf32>
    %204 = arith.mulf %203, %203 : vector<16x32xf32>
    %cst_57 = arith.constant dense<0.000000e+00> : vector<16xf32>
    %205 = vector.multi_reduction <add>, %204, %cst_57 [1] : vector<16x32xf32> to vector<16xf32>
    %206 = vector.shape_cast %205 : vector<16xf32> to vector<16x1xf32>
    %cst_58 = arith.constant 3.200000e+01 : f32
    %207 = vector.broadcast %cst_58 : f32 to vector<16x1xf32>
    %208 = arith.divf %206, %207 : vector<16x1xf32>
    %209 = vector.broadcast %201 : vector<16x1xf32> to vector<16x32xf32>
    %210 = arith.subf %195, %209 : vector<16x32xf32>
    %211 = vector.broadcast %196 : vector<1x32xf32> to vector<16x32xf32>
    %212 = arith.mulf %211, %210 : vector<16x32xf32>
    %cst_59 = arith.constant 9.99999974E-6 : f32
    %213 = vector.broadcast %cst_59 : f32 to vector<16x1xf32>
    %214 = arith.addf %208, %213 : vector<16x1xf32>
    %215 = math.sqrt %214 : vector<16x1xf32>
    %216 = vector.broadcast %215 : vector<16x1xf32> to vector<16x32xf32>
    %217 = arith.divf %212, %216 : vector<16x32xf32>
    %218 = vector.broadcast %197 : vector<1x32xf32> to vector<16x32xf32>
    %219 = arith.addf %217, %218 : vector<16x32xf32>
    %c0_60 = arith.constant 0 : index
    %c256 = arith.constant 256 : index
    %220 = vector.load %arg2[%c0_60, %c256] : memref<32x1280xf32, #tpu.memory_space<vmem>>, vector<32x128xf32>
    %cst_61 = arith.constant dense<0.000000e+00> : vector<16x128xf32>
    %221 = tpu.matmul %219, %220, %cst_61 {dimension_numbers = #tpu.dot_dimension_numbers<[1], [0], [0], [1], [0, 0, 1, 1], [], []>} : vector<16x32xf32>, vector<32x128xf32>, vector<16x128xf32> -> vector<16x128xf32>
    %c104 = arith.constant 104 : index
    %c0_62 = arith.constant 0 : index
    %222 = vector.load %arg3[%c104, %c0_62] : memref<224x128xf32, #tpu.memory_space<vmem>>, vector<1x128xf32>
    %223 = vector.broadcast %222 : vector<1x128xf32> to vector<16x128xf32>
    %224 = arith.addf %221, %223 : vector<16x128xf32>
    %cst_63 = arith.constant 0.000000e+00 : f32
    %225 = vector.broadcast %cst_63 : f32 to vector<16x128xf32>
    %226 = arith.maximumf %224, %225 : vector<16x128xf32>
    %c0_64 = arith.constant 0 : index
    %c384 = arith.constant 384 : index
    %227 = vector.load %arg2[%c0_64, %c384] : memref<32x1280xf32, #tpu.memory_space<vmem>>, vector<32x128xf32>
    %cst_65 = arith.constant dense<0.000000e+00> : vector<16x32xf32>
    %228 = tpu.matmul %226, %227, %cst_65 {dimension_numbers = #tpu.dot_dimension_numbers<[1], [1], [0], [0], [0, 0, 1, 0], [], []>} : vector<16x128xf32>, vector<32x128xf32>, vector<16x32xf32> -> vector<16x32xf32>
    %c112 = arith.constant 112 : index
    %c0_66 = arith.constant 0 : index
    %229 = vector.load %arg3[%c112, %c0_66] : memref<224x128xf32, #tpu.memory_space<vmem>>, vector<1x32xf32>
    %230 = vector.broadcast %229 : vector<1x32xf32> to vector<16x32xf32>
    %231 = arith.addf %228, %230 : vector<16x32xf32>
    %232 = arith.addf %195, %231 : vector<16x32xf32>
    %c120 = arith.constant 120 : index
    %c0_67 = arith.constant 0 : index
    %233 = vector.load %arg3[%c120, %c0_67] : memref<224x128xf32, #tpu.memory_space<vmem>>, vector<1x32xf32>
    %c128_68 = arith.constant 128 : index
    %c0_69 = arith.constant 0 : index
    %234 = vector.load %arg3[%c128_68, %c0_69] : memref<224x128xf32, #tpu.memory_space<vmem>>, vector<1x32xf32>
    %cst_70 = arith.constant dense<0.000000e+00> : vector<16xf32>
    %235 = vector.multi_reduction <add>, %232, %cst_70 [1] : vector<16x32xf32> to vector<16xf32>
    %236 = vector.shape_cast %235 : vector<16xf32> to vector<16x1xf32>
    %cst_71 = arith.constant 3.200000e+01 : f32
    %237 = vector.broadcast %cst_71 : f32 to vector<16x1xf32>
    %238 = arith.divf %236, %237 : vector<16x1xf32>
    %239 = vector.broadcast %238 : vector<16x1xf32> to vector<16x32xf32>
    %240 = arith.subf %232, %239 : vector<16x32xf32>
    %241 = arith.mulf %240, %240 : vector<16x32xf32>
    %cst_72 = arith.constant dense<0.000000e+00> : vector<16xf32>
    %242 = vector.multi_reduction <add>, %241, %cst_72 [1] : vector<16x32xf32> to vector<16xf32>
    %243 = vector.shape_cast %242 : vector<16xf32> to vector<16x1xf32>
    %cst_73 = arith.constant 3.200000e+01 : f32
    %244 = vector.broadcast %cst_73 : f32 to vector<16x1xf32>
    %245 = arith.divf %243, %244 : vector<16x1xf32>
    %246 = vector.broadcast %238 : vector<16x1xf32> to vector<16x32xf32>
    %247 = arith.subf %232, %246 : vector<16x32xf32>
    %248 = vector.broadcast %233 : vector<1x32xf32> to vector<16x32xf32>
    %249 = arith.mulf %248, %247 : vector<16x32xf32>
    %cst_74 = arith.constant 9.99999974E-6 : f32
    %250 = vector.broadcast %cst_74 : f32 to vector<16x1xf32>
    %251 = arith.addf %245, %250 : vector<16x1xf32>
    %252 = math.sqrt %251 : vector<16x1xf32>
    %253 = vector.broadcast %252 : vector<16x1xf32> to vector<16x32xf32>
    %254 = arith.divf %249, %253 : vector<16x32xf32>
    %255 = vector.broadcast %234 : vector<1x32xf32> to vector<16x32xf32>
    %256 = arith.addf %254, %255 : vector<16x32xf32>
    %c0_75 = arith.constant 0 : index
    %c512 = arith.constant 512 : index
    %257 = vector.load %arg2[%c0_75, %c512] : memref<32x1280xf32, #tpu.memory_space<vmem>>, vector<32x96xf32>
    %cst_76 = arith.constant dense<0.000000e+00> : vector<16x96xf32>
    %258 = tpu.matmul %256, %257, %cst_76 {dimension_numbers = #tpu.dot_dimension_numbers<[1], [0], [0], [1], [0, 0, 1, 1], [], []>} : vector<16x32xf32>, vector<32x96xf32>, vector<16x96xf32> -> vector<16x96xf32>
    %c136 = arith.constant 136 : index
    %c0_77 = arith.constant 0 : index
    %259 = vector.load %arg3[%c136, %c0_77] : memref<224x128xf32, #tpu.memory_space<vmem>>, vector<1x96xf32>
    %260 = vector.broadcast %259 : vector<1x96xf32> to vector<16x96xf32>
    %261 = arith.addf %258, %260 : vector<16x96xf32>
    %262 = vector.extract_strided_slice %261 {offsets = [0, 0], sizes = [16, 32], strides = [1, 1]} : vector<16x96xf32> to vector<16x32xf32>
    %263 = vector.extract_strided_slice %261 {offsets = [0, 32], sizes = [16, 32], strides = [1, 1]} : vector<16x96xf32> to vector<16x32xf32>
    %264 = vector.extract_strided_slice %261 {offsets = [0, 64], sizes = [16, 32], strides = [1, 1]} : vector<16x96xf32> to vector<16x32xf32>
    %265 = vector.extract_strided_slice %262 {offsets = [0, 0], sizes = [16, 8], strides = [1, 1]} : vector<16x32xf32> to vector<16x8xf32>
    %266 = vector.extract_strided_slice %263 {offsets = [0, 0], sizes = [16, 8], strides = [1, 1]} : vector<16x32xf32> to vector<16x8xf32>
    %267 = vector.extract_strided_slice %264 {offsets = [0, 0], sizes = [16, 8], strides = [1, 1]} : vector<16x32xf32> to vector<16x8xf32>
    %cst_78 = arith.constant dense<0.000000e+00> : vector<16x16xf32>
    %268 = tpu.matmul %265, %266, %cst_78 {dimension_numbers = #tpu.dot_dimension_numbers<[1], [1], [0], [0], [0, 0, 1, 0], [], []>} : vector<16x8xf32>, vector<16x8xf32>, vector<16x16xf32> -> vector<16x16xf32>
    %cst_79 = arith.constant 0.353553385 : f32
    %269 = vector.broadcast %cst_79 : f32 to vector<16x16xf32>
    %270 = arith.mulf %268, %269 : vector<16x16xf32>
    %271 = arith.addf %270, %88 : vector<16x16xf32>
    %cst_80 = arith.constant dense<0xFF800000> : vector<16xf32>
    %272 = vector.multi_reduction <maximumf>, %271, %cst_80 [1] : vector<16x16xf32> to vector<16xf32>
    %273 = vector.shape_cast %272 : vector<16xf32> to vector<16x1xf32>
    %274 = vector.broadcast %273 : vector<16x1xf32> to vector<16x16xf32>
    %275 = arith.subf %271, %274 : vector<16x16xf32>
    %276 = math.exp %275 : vector<16x16xf32>
    %cst_81 = arith.constant dense<0.000000e+00> : vector<16xf32>
    %277 = vector.multi_reduction <add>, %276, %cst_81 [1] : vector<16x16xf32> to vector<16xf32>
    %278 = vector.shape_cast %277 : vector<16xf32> to vector<16x1xf32>
    %279 = vector.broadcast %278 : vector<16x1xf32> to vector<16x16xf32>
    %280 = arith.divf %276, %279 : vector<16x16xf32>
    %cst_82 = arith.constant dense<0.000000e+00> : vector<16x8xf32>
    %281 = tpu.matmul %280, %267, %cst_82 {dimension_numbers = #tpu.dot_dimension_numbers<[1], [0], [0], [1], [0, 0, 1, 1], [], []>} : vector<16x16xf32>, vector<16x8xf32>, vector<16x8xf32> -> vector<16x8xf32>
    %282 = vector.extract_strided_slice %262 {offsets = [0, 8], sizes = [16, 8], strides = [1, 1]} : vector<16x32xf32> to vector<16x8xf32>
    %283 = vector.extract_strided_slice %263 {offsets = [0, 8], sizes = [16, 8], strides = [1, 1]} : vector<16x32xf32> to vector<16x8xf32>
    %284 = vector.extract_strided_slice %264 {offsets = [0, 8], sizes = [16, 8], strides = [1, 1]} : vector<16x32xf32> to vector<16x8xf32>
    %cst_83 = arith.constant dense<0.000000e+00> : vector<16x16xf32>
    %285 = tpu.matmul %282, %283, %cst_83 {dimension_numbers = #tpu.dot_dimension_numbers<[1], [1], [0], [0], [0, 0, 1, 0], [], []>} : vector<16x8xf32>, vector<16x8xf32>, vector<16x16xf32> -> vector<16x16xf32>
    %cst_84 = arith.constant 0.353553385 : f32
    %286 = vector.broadcast %cst_84 : f32 to vector<16x16xf32>
    %287 = arith.mulf %285, %286 : vector<16x16xf32>
    %288 = arith.addf %287, %88 : vector<16x16xf32>
    %cst_85 = arith.constant dense<0xFF800000> : vector<16xf32>
    %289 = vector.multi_reduction <maximumf>, %288, %cst_85 [1] : vector<16x16xf32> to vector<16xf32>
    %290 = vector.shape_cast %289 : vector<16xf32> to vector<16x1xf32>
    %291 = vector.broadcast %290 : vector<16x1xf32> to vector<16x16xf32>
    %292 = arith.subf %288, %291 : vector<16x16xf32>
    %293 = math.exp %292 : vector<16x16xf32>
    %cst_86 = arith.constant dense<0.000000e+00> : vector<16xf32>
    %294 = vector.multi_reduction <add>, %293, %cst_86 [1] : vector<16x16xf32> to vector<16xf32>
    %295 = vector.shape_cast %294 : vector<16xf32> to vector<16x1xf32>
    %296 = vector.broadcast %295 : vector<16x1xf32> to vector<16x16xf32>
    %297 = arith.divf %293, %296 : vector<16x16xf32>
    %cst_87 = arith.constant dense<0.000000e+00> : vector<16x8xf32>
    %298 = tpu.matmul %297, %284, %cst_87 {dimension_numbers = #tpu.dot_dimension_numbers<[1], [0], [0], [1], [0, 0, 1, 1], [], []>} : vector<16x16xf32>, vector<16x8xf32>, vector<16x8xf32> -> vector<16x8xf32>
    %299 = vector.extract_strided_slice %262 {offsets = [0, 16], sizes = [16, 8], strides = [1, 1]} : vector<16x32xf32> to vector<16x8xf32>
    %300 = vector.extract_strided_slice %263 {offsets = [0, 16], sizes = [16, 8], strides = [1, 1]} : vector<16x32xf32> to vector<16x8xf32>
    %301 = vector.extract_strided_slice %264 {offsets = [0, 16], sizes = [16, 8], strides = [1, 1]} : vector<16x32xf32> to vector<16x8xf32>
    %cst_88 = arith.constant dense<0.000000e+00> : vector<16x16xf32>
    %302 = tpu.matmul %299, %300, %cst_88 {dimension_numbers = #tpu.dot_dimension_numbers<[1], [1], [0], [0], [0, 0, 1, 0], [], []>} : vector<16x8xf32>, vector<16x8xf32>, vector<16x16xf32> -> vector<16x16xf32>
    %cst_89 = arith.constant 0.353553385 : f32
    %303 = vector.broadcast %cst_89 : f32 to vector<16x16xf32>
    %304 = arith.mulf %302, %303 : vector<16x16xf32>
    %305 = arith.addf %304, %88 : vector<16x16xf32>
    %cst_90 = arith.constant dense<0xFF800000> : vector<16xf32>
    %306 = vector.multi_reduction <maximumf>, %305, %cst_90 [1] : vector<16x16xf32> to vector<16xf32>
    %307 = vector.shape_cast %306 : vector<16xf32> to vector<16x1xf32>
    %308 = vector.broadcast %307 : vector<16x1xf32> to vector<16x16xf32>
    %309 = arith.subf %305, %308 : vector<16x16xf32>
    %310 = math.exp %309 : vector<16x16xf32>
    %cst_91 = arith.constant dense<0.000000e+00> : vector<16xf32>
    %311 = vector.multi_reduction <add>, %310, %cst_91 [1] : vector<16x16xf32> to vector<16xf32>
    %312 = vector.shape_cast %311 : vector<16xf32> to vector<16x1xf32>
    %313 = vector.broadcast %312 : vector<16x1xf32> to vector<16x16xf32>
    %314 = arith.divf %310, %313 : vector<16x16xf32>
    %cst_92 = arith.constant dense<0.000000e+00> : vector<16x8xf32>
    %315 = tpu.matmul %314, %301, %cst_92 {dimension_numbers = #tpu.dot_dimension_numbers<[1], [0], [0], [1], [0, 0, 1, 1], [], []>} : vector<16x16xf32>, vector<16x8xf32>, vector<16x8xf32> -> vector<16x8xf32>
    %316 = vector.extract_strided_slice %262 {offsets = [0, 24], sizes = [16, 8], strides = [1, 1]} : vector<16x32xf32> to vector<16x8xf32>
    %317 = vector.extract_strided_slice %263 {offsets = [0, 24], sizes = [16, 8], strides = [1, 1]} : vector<16x32xf32> to vector<16x8xf32>
    %318 = vector.extract_strided_slice %264 {offsets = [0, 24], sizes = [16, 8], strides = [1, 1]} : vector<16x32xf32> to vector<16x8xf32>
    %cst_93 = arith.constant dense<0.000000e+00> : vector<16x16xf32>
    %319 = tpu.matmul %316, %317, %cst_93 {dimension_numbers = #tpu.dot_dimension_numbers<[1], [1], [0], [0], [0, 0, 1, 0], [], []>} : vector<16x8xf32>, vector<16x8xf32>, vector<16x16xf32> -> vector<16x16xf32>
    %cst_94 = arith.constant 0.353553385 : f32
    %320 = vector.broadcast %cst_94 : f32 to vector<16x16xf32>
    %321 = arith.mulf %319, %320 : vector<16x16xf32>
    %322 = arith.addf %321, %88 : vector<16x16xf32>
    %cst_95 = arith.constant dense<0xFF800000> : vector<16xf32>
    %323 = vector.multi_reduction <maximumf>, %322, %cst_95 [1] : vector<16x16xf32> to vector<16xf32>
    %324 = vector.shape_cast %323 : vector<16xf32> to vector<16x1xf32>
    %325 = vector.broadcast %324 : vector<16x1xf32> to vector<16x16xf32>
    %326 = arith.subf %322, %325 : vector<16x16xf32>
    %327 = math.exp %326 : vector<16x16xf32>
    %cst_96 = arith.constant dense<0.000000e+00> : vector<16xf32>
    %328 = vector.multi_reduction <add>, %327, %cst_96 [1] : vector<16x16xf32> to vector<16xf32>
    %329 = vector.shape_cast %328 : vector<16xf32> to vector<16x1xf32>
    %330 = vector.broadcast %329 : vector<16x1xf32> to vector<16x16xf32>
    %331 = arith.divf %327, %330 : vector<16x16xf32>
    %cst_97 = arith.constant dense<0.000000e+00> : vector<16x8xf32>
    %332 = tpu.matmul %331, %318, %cst_97 {dimension_numbers = #tpu.dot_dimension_numbers<[1], [0], [0], [1], [0, 0, 1, 1], [], []>} : vector<16x16xf32>, vector<16x8xf32>, vector<16x8xf32> -> vector<16x8xf32>
    %333 = tpu.concatenate %281, %298, %315, %332 in 1 : vector<16x8xf32>, vector<16x8xf32>, vector<16x8xf32>, vector<16x8xf32> -> vector<16x32xf32>
    %c0_98 = arith.constant 0 : index
    %c640 = arith.constant 640 : index
    %334 = vector.load %arg2[%c0_98, %c640] : memref<32x1280xf32, #tpu.memory_space<vmem>>, vector<32x32xf32>
    %cst_99 = arith.constant dense<0.000000e+00> : vector<16x32xf32>
    %335 = tpu.matmul %333, %334, %cst_99 {dimension_numbers = #tpu.dot_dimension_numbers<[1], [0], [0], [1], [0, 0, 1, 1], [], []>} : vector<16x32xf32>, vector<32x32xf32>, vector<16x32xf32> -> vector<16x32xf32>
    %c144 = arith.constant 144 : index
    %c0_100 = arith.constant 0 : index
    %336 = vector.load %arg3[%c144, %c0_100] : memref<224x128xf32, #tpu.memory_space<vmem>>, vector<1x32xf32>
    %337 = vector.broadcast %336 : vector<1x32xf32> to vector<16x32xf32>
    %338 = arith.addf %335, %337 : vector<16x32xf32>
    %339 = arith.addf %232, %338 : vector<16x32xf32>
    %c152 = arith.constant 152 : index
    %c0_101 = arith.constant 0 : index
    %340 = vector.load %arg3[%c152, %c0_101] : memref<224x128xf32, #tpu.memory_space<vmem>>, vector<1x32xf32>
    %c160 = arith.constant 160 : index
    %c0_102 = arith.constant 0 : index
    %341 = vector.load %arg3[%c160, %c0_102] : memref<224x128xf32, #tpu.memory_space<vmem>>, vector<1x32xf32>
    %cst_103 = arith.constant dense<0.000000e+00> : vector<16xf32>
    %342 = vector.multi_reduction <add>, %339, %cst_103 [1] : vector<16x32xf32> to vector<16xf32>
    %343 = vector.shape_cast %342 : vector<16xf32> to vector<16x1xf32>
    %cst_104 = arith.constant 3.200000e+01 : f32
    %344 = vector.broadcast %cst_104 : f32 to vector<16x1xf32>
    %345 = arith.divf %343, %344 : vector<16x1xf32>
    %346 = vector.broadcast %345 : vector<16x1xf32> to vector<16x32xf32>
    %347 = arith.subf %339, %346 : vector<16x32xf32>
    %348 = arith.mulf %347, %347 : vector<16x32xf32>
    %cst_105 = arith.constant dense<0.000000e+00> : vector<16xf32>
    %349 = vector.multi_reduction <add>, %348, %cst_105 [1] : vector<16x32xf32> to vector<16xf32>
    %350 = vector.shape_cast %349 : vector<16xf32> to vector<16x1xf32>
    %cst_106 = arith.constant 3.200000e+01 : f32
    %351 = vector.broadcast %cst_106 : f32 to vector<16x1xf32>
    %352 = arith.divf %350, %351 : vector<16x1xf32>
    %353 = vector.broadcast %345 : vector<16x1xf32> to vector<16x32xf32>
    %354 = arith.subf %339, %353 : vector<16x32xf32>
    %355 = vector.broadcast %340 : vector<1x32xf32> to vector<16x32xf32>
    %356 = arith.mulf %355, %354 : vector<16x32xf32>
    %cst_107 = arith.constant 9.99999974E-6 : f32
    %357 = vector.broadcast %cst_107 : f32 to vector<16x1xf32>
    %358 = arith.addf %352, %357 : vector<16x1xf32>
    %359 = math.sqrt %358 : vector<16x1xf32>
    %360 = vector.broadcast %359 : vector<16x1xf32> to vector<16x32xf32>
    %361 = arith.divf %356, %360 : vector<16x32xf32>
    %362 = vector.broadcast %341 : vector<1x32xf32> to vector<16x32xf32>
    %363 = arith.addf %361, %362 : vector<16x32xf32>
    %c0_108 = arith.constant 0 : index
    %c768 = arith.constant 768 : index
    %364 = vector.load %arg2[%c0_108, %c768] : memref<32x1280xf32, #tpu.memory_space<vmem>>, vector<32x128xf32>
    %cst_109 = arith.constant dense<0.000000e+00> : vector<16x128xf32>
    %365 = tpu.matmul %363, %364, %cst_109 {dimension_numbers = #tpu.dot_dimension_numbers<[1], [0], [0], [1], [0, 0, 1, 1], [], []>} : vector<16x32xf32>, vector<32x128xf32>, vector<16x128xf32> -> vector<16x128xf32>
    %c168 = arith.constant 168 : index
    %c0_110 = arith.constant 0 : index
    %366 = vector.load %arg3[%c168, %c0_110] : memref<224x128xf32, #tpu.memory_space<vmem>>, vector<1x128xf32>
    %367 = vector.broadcast %366 : vector<1x128xf32> to vector<16x128xf32>
    %368 = arith.addf %365, %367 : vector<16x128xf32>
    %cst_111 = arith.constant 0.000000e+00 : f32
    %369 = vector.broadcast %cst_111 : f32 to vector<16x128xf32>
    %370 = arith.maximumf %368, %369 : vector<16x128xf32>
    %c0_112 = arith.constant 0 : index
    %c896 = arith.constant 896 : index
    %371 = vector.load %arg2[%c0_112, %c896] : memref<32x1280xf32, #tpu.memory_space<vmem>>, vector<32x128xf32>
    %cst_113 = arith.constant dense<0.000000e+00> : vector<16x32xf32>
    %372 = tpu.matmul %370, %371, %cst_113 {dimension_numbers = #tpu.dot_dimension_numbers<[1], [1], [0], [0], [0, 0, 1, 0], [], []>} : vector<16x128xf32>, vector<32x128xf32>, vector<16x32xf32> -> vector<16x32xf32>
    %c176 = arith.constant 176 : index
    %c0_114 = arith.constant 0 : index
    %373 = vector.load %arg3[%c176, %c0_114] : memref<224x128xf32, #tpu.memory_space<vmem>>, vector<1x32xf32>
    %374 = vector.broadcast %373 : vector<1x32xf32> to vector<16x32xf32>
    %375 = arith.addf %372, %374 : vector<16x32xf32>
    %376 = arith.addf %339, %375 : vector<16x32xf32>
    %c184 = arith.constant 184 : index
    %c0_115 = arith.constant 0 : index
    %377 = vector.load %arg3[%c184, %c0_115] : memref<224x128xf32, #tpu.memory_space<vmem>>, vector<1x32xf32>
    %c192 = arith.constant 192 : index
    %c0_116 = arith.constant 0 : index
    %378 = vector.load %arg3[%c192, %c0_116] : memref<224x128xf32, #tpu.memory_space<vmem>>, vector<1x32xf32>
    %cst_117 = arith.constant dense<0.000000e+00> : vector<16xf32>
    %379 = vector.multi_reduction <add>, %376, %cst_117 [1] : vector<16x32xf32> to vector<16xf32>
    %380 = vector.shape_cast %379 : vector<16xf32> to vector<16x1xf32>
    %cst_118 = arith.constant 3.200000e+01 : f32
    %381 = vector.broadcast %cst_118 : f32 to vector<16x1xf32>
    %382 = arith.divf %380, %381 : vector<16x1xf32>
    %383 = vector.broadcast %382 : vector<16x1xf32> to vector<16x32xf32>
    %384 = arith.subf %376, %383 : vector<16x32xf32>
    %385 = arith.mulf %384, %384 : vector<16x32xf32>
    %cst_119 = arith.constant dense<0.000000e+00> : vector<16xf32>
    %386 = vector.multi_reduction <add>, %385, %cst_119 [1] : vector<16x32xf32> to vector<16xf32>
    %387 = vector.shape_cast %386 : vector<16xf32> to vector<16x1xf32>
    %cst_120 = arith.constant 3.200000e+01 : f32
    %388 = vector.broadcast %cst_120 : f32 to vector<16x1xf32>
    %389 = arith.divf %387, %388 : vector<16x1xf32>
    %390 = vector.broadcast %382 : vector<16x1xf32> to vector<16x32xf32>
    %391 = arith.subf %376, %390 : vector<16x32xf32>
    %392 = vector.broadcast %377 : vector<1x32xf32> to vector<16x32xf32>
    %393 = arith.mulf %392, %391 : vector<16x32xf32>
    %cst_121 = arith.constant 9.99999996E-13 : f32
    %394 = vector.broadcast %cst_121 : f32 to vector<16x1xf32>
    %395 = arith.addf %389, %394 : vector<16x1xf32>
    %396 = math.sqrt %395 : vector<16x1xf32>
    %397 = vector.broadcast %396 : vector<16x1xf32> to vector<16x32xf32>
    %398 = arith.divf %393, %397 : vector<16x32xf32>
    %399 = vector.broadcast %378 : vector<1x32xf32> to vector<16x32xf32>
    %400 = arith.addf %398, %399 : vector<16x32xf32>
    %401 = tpu.iota {dimensions = array<i32: 0>} : vector<2x16xi32>
    %402 = tpu.iota {dimensions = array<i32: 1>} : vector<2x16xi32>
    %c8_i32_122 = arith.constant 8 : i32
    %403 = vector.broadcast %c8_i32_122 : i32 to vector<2x16xi32>
    %404 = arith.muli %401, %403 : vector<2x16xi32>
    %405 = arith.cmpi sge, %402, %404 : vector<2x16xi32>
    %c1_i32 = arith.constant 1 : i32
    %406 = vector.broadcast %c1_i32 : i32 to vector<2x16xi32>
    %407 = arith.addi %401, %406 : vector<2x16xi32>
    %c8_i32_123 = arith.constant 8 : i32
    %408 = vector.broadcast %c8_i32_123 : i32 to vector<2x16xi32>
    %409 = arith.muli %407, %408 : vector<2x16xi32>
    %410 = arith.cmpi slt, %402, %409 : vector<2x16xi32>
    %411 = arith.andi %405, %410 : vector<2x16xi1>
    %cst_124 = arith.constant 1.250000e-01 : f32
    %cst_125 = arith.constant 0.000000e+00 : f32
    %412 = vector.broadcast %cst_124 : f32 to vector<2x16xf32>
    %413 = vector.broadcast %cst_125 : f32 to vector<2x16xf32>
    %414 = arith.select %411, %412, %413 : vector<2x16xi1>, vector<2x16xf32>
    %cst_126 = arith.constant dense<0.000000e+00> : vector<2x32xf32>
    %415 = tpu.matmul %414, %400, %cst_126 {dimension_numbers = #tpu.dot_dimension_numbers<[1], [0], [0], [1], [0, 0, 1, 1], [], []>} : vector<2x16xf32>, vector<16x32xf32>, vector<2x32xf32> -> vector<2x32xf32>
    %c0_127 = arith.constant 0 : index
    %c1024 = arith.constant 1024 : index
    %416 = vector.load %arg2[%c0_127, %c1024] : memref<32x1280xf32, #tpu.memory_space<vmem>>, vector<32x32xf32>
    %cst_128 = arith.constant dense<0.000000e+00> : vector<2x32xf32>
    %417 = tpu.matmul %415, %416, %cst_128 {dimension_numbers = #tpu.dot_dimension_numbers<[1], [0], [0], [1], [0, 0, 1, 1], [], []>} : vector<2x32xf32>, vector<32x32xf32>, vector<2x32xf32> -> vector<2x32xf32>
    %c200 = arith.constant 200 : index
    %c0_129 = arith.constant 0 : index
    %418 = vector.load %arg3[%c200, %c0_129] : memref<224x128xf32, #tpu.memory_space<vmem>>, vector<1x32xf32>
    %419 = vector.broadcast %418 : vector<1x32xf32> to vector<2x32xf32>
    %420 = arith.addf %417, %419 : vector<2x32xf32>
    %cst_130 = arith.constant 5.000000e-01 : f32
    %421 = vector.broadcast %cst_130 : f32 to vector<2x32xf32>
    %422 = arith.mulf %421, %420 : vector<2x32xf32>
    %cst_131 = arith.constant 0.707106769 : f32
    %423 = vector.broadcast %cst_131 : f32 to vector<2x32xf32>
    %424 = arith.mulf %420, %423 : vector<2x32xf32>
    %425 = math.erf %424 : vector<2x32xf32>
    %cst_132 = arith.constant 1.000000e+00 : f32
    %426 = vector.broadcast %cst_132 : f32 to vector<2x32xf32>
    %427 = arith.addf %426, %425 : vector<2x32xf32>
    %428 = arith.mulf %422, %427 : vector<2x32xf32>
    %429 = arith.addf %428, %415 : vector<2x32xf32>
    %c0_133 = arith.constant 0 : index
    %c1152 = arith.constant 1152 : index
    %430 = vector.load %arg2[%c0_133, %c1152] : memref<32x1280xf32, #tpu.memory_space<vmem>>, vector<32x16xf32>
    %cst_134 = arith.constant dense<0.000000e+00> : vector<2x16xf32>
    %431 = tpu.matmul %429, %430, %cst_134 {dimension_numbers = #tpu.dot_dimension_numbers<[1], [0], [0], [1], [0, 0, 1, 1], [], []>} : vector<2x32xf32>, vector<32x16xf32>, vector<2x16xf32> -> vector<2x16xf32>
    %c208 = arith.constant 208 : index
    %c0_135 = arith.constant 0 : index
    %432 = vector.load %arg3[%c208, %c0_135] : memref<224x128xf32, #tpu.memory_space<vmem>>, vector<1x16xf32>
    %433 = vector.broadcast %432 : vector<1x16xf32> to vector<2x16xf32>
    %434 = arith.addf %431, %433 : vector<2x16xf32>
    %cst_136 = arith.constant 5.000000e-01 : f32
    %435 = vector.broadcast %cst_136 : f32 to vector<2x16xf32>
    %436 = arith.mulf %435, %434 : vector<2x16xf32>
    %cst_137 = arith.constant 0.707106769 : f32
    %437 = vector.broadcast %cst_137 : f32 to vector<2x16xf32>
    %438 = arith.mulf %434, %437 : vector<2x16xf32>
    %439 = math.erf %438 : vector<2x16xf32>
    %cst_138 = arith.constant 1.000000e+00 : f32
    %440 = vector.broadcast %cst_138 : f32 to vector<2x16xf32>
    %441 = arith.addf %440, %439 : vector<2x16xf32>
    %442 = arith.mulf %436, %441 : vector<2x16xf32>
    %c40 = arith.constant 40 : index
    %c0_139 = arith.constant 0 : index
    %443 = vector.load %arg3[%c40, %c0_139] : memref<224x128xf32, #tpu.memory_space<vmem>>, vector<16x128xf32>
    %cst_140 = arith.constant dense<0.000000e+00> : vector<2x128xf32>
    %444 = tpu.matmul %442, %443, %cst_140 {dimension_numbers = #tpu.dot_dimension_numbers<[1], [0], [0], [1], [0, 0, 1, 1], [], []>} : vector<2x16xf32>, vector<16x128xf32>, vector<2x128xf32> -> vector<2x128xf32>
    %c216 = arith.constant 216 : index
    %c0_141 = arith.constant 0 : index
    %445 = vector.load %arg3[%c216, %c0_141] : memref<224x128xf32, #tpu.memory_space<vmem>>, vector<1x128xf32>
    %446 = vector.broadcast %445 : vector<1x128xf32> to vector<2x128xf32>
    %447 = arith.addf %444, %446 : vector<2x128xf32>
    %c0_142 = arith.constant 0 : index
    %c0_143 = arith.constant 0 : index
    %c0_144 = arith.constant 0 : index
    %448 = vector.load %arg4[%c0_142, %c0_143, %c0_144] : memref<1x2x128xf32, #tpu.memory_space<vmem>>, vector<1x2x128xf32>
    %449 = vector.shape_cast %448 : vector<1x2x128xf32> to vector<2x128xf32>
    %450 = vector.shape_cast %447 : vector<2x128xf32> to vector<1x2x128xf32>
    tpu.vector_store %arg4[%c0_142, %c0_143, %c0_144], %450 {strides = array<i32>} : memref<1x2x128xf32, #tpu.memory_space<vmem>>, vector<1x2x128xf32>,
    return
  }
  func.func @transform_0(%arg0: i32) -> (i32, i32, i32) {
    %c0_i32 = arith.constant 0 : i32
    %c0_i32_0 = arith.constant 0 : i32
    %c0_i32_1 = arith.constant 0 : i32
    return %arg0, %c0_i32, %c0_i32_0 : i32, i32, i32
  }
  func.func @transform_1(%arg0: i32) -> (i32, i32) {
    %c0_i32 = arith.constant 0 : i32
    %c0_i32_0 = arith.constant 0 : i32
    %c0_i32_1 = arith.constant 0 : i32
    return %c0_i32, %c0_i32_0 : i32, i32
  }
  func.func @transform_2(%arg0: i32) -> (i32, i32) {
    %c0_i32 = arith.constant 0 : i32
    %c0_i32_0 = arith.constant 0 : i32
    %c0_i32_1 = arith.constant 0 : i32
    return %c0_i32, %c0_i32_0 : i32, i32
  }
  func.func @transform_3(%arg0: i32) -> (i32, i32, i32) {
    %c0_i32 = arith.constant 0 : i32
    %c0_i32_0 = arith.constant 0 : i32
    %c0_i32_1 = arith.constant 0 : i32
    return %arg0, %c0_i32, %c0_i32_0 : i32, i32, i32
  }
}

</mosaic_0001>

<bundles_post_ra>
// kernel: tpu_custom_call.1
= control target key start
LH: loop header
LB: loop body
LE: loop exit
PB: predicated region body
PF: predicated region fallthrough
CT: control target
= control target key end

     0   :  { %8 = vsyncpa [#allocation3], 0  ;;  %s3255_s0 = inlined_call_operand.vmem [shape: s32[1,16,6], index: 0, kind: input, shape index: {}]   ;;  %s3256_s1 = inlined_call_operand.hbm [shape: f32[32,1280], index: 1, kind: input, shape index: {}]   ;;  %s3257_s2 = inlined_call_operand.hbm [shape: f32[224,128], index: 2, kind: input, shape index: {}]   ;;  %s3258_s3 = inlined_call_operand.hbm [shape: f32[1,2,128], index: 3, kind: output, shape index: {}]  }
   0x1   :  { %9 = vsyncpa [#allocation6], 0 }
   0x2   :  { %10 = vsyncpa [#allocation4], 0  ;;  %s17_s14 = sshll.u32 %s3256_s1, 4  ;;  %s2631_s15 = smov [#allocation2]   ;;  %s18_s14 = int_to_ptr.hbm [resolvable:$true] %s17_s14 }
   0x3   :  { %s19_s16 = sshll.u32 %s2631_s15, 4  ;;  %s30_s19 = sshll.u32 %s3257_s2, 4  ;;  %s20_s16 = int_to_ptr.vmem [resolvable:$true] %s19_s16  ;;  %s31_s19 = int_to_ptr.hbm [resolvable:$true] %s30_s19 }
   0x4   :  { %s2632_s20 = smov 1280   ;;  %s2633_s21 = smov 80  }
   0x5   :  { %25 = dma.hbm_to_vmem [thread:$0]  %s18_s14, 5120, %s20_s16, [#allocation3], %s2632_s20, %s2632_s20, %s2633_s21  }
   0x6   :  { %s2634_s22 = smov [#allocation5]   ;;  %s2635_s24 = smov 128  }
   0x7   :  { %s32_s23 = sshll.u32 %s2634_s22, 4  ;;  %s2636_s25 = smov 8   ;;  %s33_s23 = int_to_ptr.vmem [resolvable:$true] %s32_s23 }
   0x8   :  { %38 = dma.hbm_to_vmem [thread:$0]  %s31_s19, 3584, %s33_s23, [#allocation6], %s2635_s24, %s2635_s24, %s2636_s25  }
   0x9   :  { %2625 = dma.done.wait [#allocation3], 5120  }
   0xa   :  { %2626 = vsyncadd [#allocation3], 4294962176 }
   0xb   :  { %2627 = dma.done.wait [#allocation6], 3584  }
   0xc   :  { %2628 = vsyncadd [#allocation6], 4294963712  ;;  %v2637_v0 = vmov 2   ;;  %v2638_v1 = vmov 0   ;;  %v2639_v2 = vmov 4   ;;  %v2691_v3 = vld [vmem:[%s3255_s0] sm:$0xff]  ;;  %v49_v13 = vlaneseq }
   0xd   :  { %2371 = vset.pattern.permute.xlu1 %v2637_v0  ;;  %2369 = vset.pattern.permute.xlu0 %v2638_v1  ;;  %v2640_v4 = vmov 3   ;;  %v2641_v5 = vmov 1   ;;  %v2701_v6 = vld [vmem:[%s3255_s0 + $0x8] sm:$0xff]  ;;  %v2642_v7 = vmov 5   ;;  %v138_v8 = vld [vmem:[#allocation5 + $0x18] sm:$0xff]  ;;  %v137_v9 = vld [vmem:[#allocation5 + $0x10] sm:$0xff] }
   0xe   :  { %2373 = vset.pattern.permute.xlu2 %v2639_v2  ;;  %80 = vperm.xlu1 %2371, %v2691_v3   ;;  %v136_v10 = vld [vmem:[#allocation5 + $0x8] sm:$0xff]  ;;  %v135_v11 = vld [vmem:[#allocation5] sm:$0xff]  ;;  %v2711_v17 = vand.u32 127, %v49_v13  ;;  %v2643_v18 = vmov 0.0   ;;  %vm139_vm6 = vcmask 261120   ;;  %v2644_v58 = vmov 32.0  }
   0xf   :  { %52 = vperm.xlu0 %2369, %v2691_v3   ;;  %108 = vperm.xlu2 %2373, %v2691_v3   ;;  %v171_v50 = vld [vmem:[#allocation5 + $0x20] sm:$0xff]  ;;  %2443 = vrcp.f32 %v2644_v58  ;;  %s2645_s0 = smov 96   ;;  %s2646_s28 = smov 120  }
  0x10   :  { %158 = vmatpush.msra.mxu0 %v138_v8  ;;  %s2647_s29 = smov 88   ;;  %s2648_s30 = smov 72  }
  0x11   :  { %s2649_s4 = smov 112   ;;  %s2650_s5 = smov 104  }
  0x12   :  { %159 = vmatpush.msra.mxu0 %v137_v9  ;;  %s2653_s6 = smov 56   ;;  %s2654_s7 = smov 40  }
  0x13   :  { %s2655_s8 = smov 64   ;;  %s2656_s9 = smov 48  }
  0x14   :  { %160 = vmatpush.msra.mxu0 %v136_v10  ;;  %s2657_s10 = smov 24   ;;  %s2658_s11 = smov 16  }
  0x15   :  { %v2444_v59 = vpop.eup %2443  ;;  %s2659_s12 = smov [#allocation7]   ;;  %s2243_s16 = sshll.u32 %s3258_s3, 4  ;;  %s2244_s16 = int_to_ptr.hbm [resolvable:$true] %s2243_s16 }
  0x16   :  { %2372 = vset.pattern.permute.xlu1 %v2640_v4  ;;  %161 = vmatpush.msra.mxu0 %v135_v11  ;;  %v266_v60 = vmul.f32 32.0, %v2444_v59  ;;  %vm270_vm13 = vweird.f32 %v2444_v59  ;;  %s2241_s13 = sshll.u32 %s2659_s12, 4  ;;  %s2242_s13 = int_to_ptr.vmem [resolvable:$true] %s2241_s13 }
  0x17   :  { %2370 = vset.pattern.permute.xlu0 %v2641_v5  ;;  %94 = vperm.xlu1 %2372, %v2691_v3  }
  0x18   :  { %66 = vperm.xlu0 %2370, %v2691_v3   ;;  %2374 = vset.pattern.permute.xlu2 %v2638_v1  ;;  %v267_v61 = vsub.f32 1.0, %v266_v60 }
  0x19   :  { %55 = vperm.xlu2 %2374, %v2701_v6  }
  0x1a   :  { %v268_v62 = vmul.f32 %v2444_v59, %v267_v61 }
  0x1c   :  { %v269_v63 = vadd.f32 %v2444_v59, %v268_v62 }
  0x1f   :  { %2375 = vset.pattern.permute.xlu1 %v2641_v5 }
  0x20   :  { %2377 = vset.pattern.permute.xlu0 %v2637_v0  ;;  %69 = vperm.xlu1 %2375, %v2701_v6   ;;  %v2747_v0 = vsel %vm270_vm13, %v2444_v59, %v269_v63 }
  0x21   :  { %83 = vperm.xlu0 %2377, %v2701_v6   ;;  %2376 = vset.pattern.permute.xlu2 %v2642_v7 }
  0x22   :  { %122 = vperm.xlu2 %2376, %v2691_v3  }
  0x28   :  { %2378 = vset.pattern.permute.xlu1 %v2640_v4 }
  0x29   :  { %2421 = vset.pattern.permute.xlu0 %v2642_v7  ;;  %97 = vperm.xlu1 %2378, %v2701_v6  }
  0x2a   :  { %2379 = vset.pattern.permute.xlu2 %v2639_v2 }
  0x2b   :  { %111 = vperm.xlu2 %2379, %v2701_v6  }
  0x31   :  { %2380 = vset.pattern.permute.xlu1 %v2642_v7 }
  0x32   :  { %125 = vperm.xlu1 %2380, %v2701_v6  }
  0x69   :  { %v109_v12 = vpop.permute.xlu2 %108 }
  0x6a   :  { %vm113_vm4 = vcmp.eq.s32.totalorder %v109_v12, %v2711_v17 }
  0x6b   :  { %v2262_v29 = vsel %vm113_vm4, 1.0, %v2643_v18 }
  0x73   :  { %v56_v16 = vpop.permute.xlu2 %55 }
  0x74   :  { %vm58_vm8 = vcmp.eq.s32.totalorder %v56_v16, %v2711_v17  ;;  %v351_v16 = vld [vmem:[#allocation2 + $0xf0] sm:$0xff] }
  0x75   :  { %v2255_v36 = vsel %vm58_vm8, 1.0, %v2643_v18  ;;  %372 = vmatpush.msra.mxu2 %v351_v16 }
  0x7c   :  { %v123_v23 = vpop.permute.xlu2 %122 }
  0x7d   :  { %vm127_vm5 = vcmp.eq.s32.totalorder %v123_v23, %v2711_v17 }
  0x7e   :  { %v2264_v30 = vsel %vm127_vm5, 1.0, %v2643_v18 }
  0x80   :  { %v81_v14 = vpop.permute.xlu1 %80 }
  0x81   :  { %v53_v15 = vpop.permute.xlu0 %52  ;;  %vm85_vm1 = vcmp.eq.s32.totalorder %v81_v14, %v2711_v17 }
  0x82   :  { %vm57_vm0 = vcmp.eq.s32.totalorder %v53_v15, %v2711_v17  ;;  %v2258_v25 = vsel %vm85_vm1, 1.0, %v2643_v18 }
  0x83   :  { %v2254_v19 = vsel %vm57_vm0, 1.0, %v2643_v18  ;;  %vm176_vm0 = vcmask 48128  }
  0x85   :  { %v112_v40 = vpop.permute.xlu2 %111 }
  0x86   :  { %vm114_vm11 = vcmp.eq.s32.totalorder %v112_v40, %v2711_v17 }
  0x87   :  { %v2263_v44 = vsel %vm114_vm11, 1.0, %v2643_v18 }
  0x89   :  { %v95_v20 = vpop.permute.xlu1 %94 }
  0x8a   :  { %v67_v21 = vpop.permute.xlu0 %66  ;;  %vm99_vm3 = vcmp.eq.s32.totalorder %v95_v20, %v2711_v17 }
  0x8b   :  { %vm71_vm2 = vcmp.eq.s32.totalorder %v67_v21, %v2711_v17  ;;  %v2260_v27 = vsel %vm99_vm3, 1.0, %v2643_v18  ;;  %v349_v21 = vld [vmem:[#allocation2 + $0x50] sm:$0xff] }
  0x8c   :  { %v2256_v22 = vsel %vm71_vm2, 1.0, %v2643_v18 }
  0x8d   :  { %v77_v24 = vadd.f32 %v2256_v22, %v2254_v19  ;;  %v350_v19 = vld [vmem:[#allocation2 + $0xa0] sm:$0xff] }
  0x8e   :  { %373 = vmatpush.msra.mxu2 %v350_v19  ;;  %v348_v22 = vld [vmem:[#allocation2] sm:$0xff] }
  0x8f   :  { %v91_v26 = vadd.f32 %v2258_v25, %v77_v24 }
  0x90   :  { %374 = vmatpush.msra.mxu2 %v349_v21  ;;  %v2424_v21 = vld [vmem:[#allocation5 + $0x48] ss:$0 sm:$0xff] }
  0x91   :  { %v105_v28 = vadd.f32 %v2260_v27, %v91_v26 }
  0x92   :  { %v70_v32 = vpop.permute.xlu1 %69  ;;  %375 = vmatpush.msra.mxu2 %v348_v22 }
  0x93   :  { %v119_v31 = vadd.f32 %v2262_v29, %v105_v28  ;;  %vm72_vm7 = vcmp.eq.s32.totalorder %v70_v32, %v2711_v17  ;;  %v84_v34 = vpop.permute.xlu0 %83 }
  0x94   :  { %v2257_v35 = vsel %vm72_vm7, 1.0, %v2643_v18  ;;  %vm86_vm9 = vcmp.eq.s32.totalorder %v84_v34, %v2711_v17 }
  0x95   :  { %v133_v33 = vadd.f32 %v2264_v30, %v119_v31  ;;  %v78_v37 = vadd.f32 %v2257_v35, %v2255_v36  ;;  %v2259_v39 = vsel %vm86_vm9, 1.0, %v2643_v18 }
  0x97   :  { %2266 = vmatmul.msk.f32.vlgmr.msra.gmra.mxu0 %vm139_vm6, %v133_v33  ;;  %v92_v42 = vadd.f32 %v2259_v39, %v78_v37 }
  0x9b   :  { %v98_v38 = vpop.permute.xlu1 %97 }
  0x9c   :  { %vm100_vm10 = vcmp.eq.s32.totalorder %v98_v38, %v2711_v17 }
  0x9d   :  { %v2261_v41 = vsel %vm100_vm10, 1.0, %v2643_v18 }
  0x9e   :  { %v106_v43 = vadd.f32 %v2261_v41, %v92_v42  ;;  %v174_v41 = vcvt.s32.f32 %v2691_v3  ;;  %v175_v42 = vcvt.s32.f32 %v2701_v6 }
  0xa0   :  { %v120_v46 = vadd.f32 %v2263_v44, %v106_v43 }
  0xa4   :  { %v126_v45 = vpop.permute.xlu1 %125 }
  0xa5   :  { %vm128_vm12 = vcmp.eq.s32.totalorder %v126_v45, %v2711_v17 }
  0xa6   :  { %v2265_v47 = vsel %vm128_vm12, 1.0, %v2643_v18  ;;  %vm189_vm12 = vcmask 7168  }
  0xa7   :  { %v134_v48 = vadd.f32 %v2265_v47, %v120_v46  ;;  %v177_v46 = vsel %vm176_vm0, %v174_v41, 0.0  ;;  %v180_v47 = vsel %vm176_vm0, %v175_v42, 0.0  ;;  %vm234_vm0 = vcmp.lt.s32.totalorder %v2711_v17, 8 }
  0xa9   :  { %2267 = vmatmul.msk.f32.gmra.mxu0 %vm139_vm6, %v134_v48  ;;  %v2422_v48 = vld [vmem:[#allocation5 + $0x38] ss:$0 sm:$0xff] }
 0x114   :  { %v163_v49 = vpop.f32.mrf.mxu0 }
 0x115   :  { %v169_v51 = vmul.f32 0.16666667, %v163_v49 }
 0x117   :  { %v2739_v52 = vadd.f32 %v171_v50, %v169_v51 }
 0x119   :  { %v259_v53 = vsel %vm139_vm6, %v2739_v52, 0.0 }
 0x11a   :  { %260 = vadd.xlane.f32.xlu2 %v259_v53 }
 0x126   :  { %v166_v54 = vpop.f32.mrf.mxu0 }
 0x127   :  { %v170_v55 = vmul.f32 0.16666667, %v166_v54 }
 0x129   :  { %v2743_v56 = vadd.f32 %v171_v50, %v170_v55 }
 0x12b   :  { %v262_v57 = vsel %vm139_vm6, %v2743_v56, 0.0 }
 0x12c   :  { %263 = vadd.xlane.f32.xlu0 %v262_v57  ;;  %v2423_v57 = vld [vmem:[#allocation5 + $0x40] ss:$0 sm:$0xff] }
 0x134   :  { %178 = vadd.xlane.f32.xlu0 %v177_v46 }
 0x18d   :  { %v261_v1 = vpop.xlane.xlu2 %260 }
 0x18e   :  { %v272_v2 = vmul.f32 %v2747_v0, %v261_v1 }
 0x190   :  { %v2751_v4 = vsub.f32 %v2739_v52, %v272_v2 }
 0x192   :  { %v276_v5 = vmul.f32 %v2751_v4, %v2751_v4  ;;  %v287_v55 = vmul.f32 %v2422_v48, %v2751_v4 }
 0x194   :  { %v278_v7 = vsel %vm139_vm6, %v276_v5, 0.0 }
 0x195   :  { %279 = vadd.xlane.f32.xlu1 %v278_v7 }
 0x19f   :  { %v264_v8 = vpop.xlane.xlu0 %263 }
 0x1a0   :  { %v273_v9 = vmul.f32 %v2747_v0, %v264_v8 }
 0x1a2   :  { %v2758_v10 = vsub.f32 %v2743_v56, %v273_v9 }
 0x1a4   :  { %v277_v11 = vmul.f32 %v2758_v10, %v2758_v10 }
 0x1a6   :  { %v281_v12 = vsel %vm139_vm6, %v277_v11, 0.0 }
 0x1a7   :  { %282 = vadd.xlane.f32.xlu2 %v281_v12 }
 0x1af   :  { %181 = vadd.xlane.f32.xlu2 %v180_v47 }
 0x208   :  { %v280_v14 = vpop.xlane.xlu1 %279 }
 0x209   :  { %v284_v15 = vmul.f32 %v280_v14, %v2747_v0  ;;  %v288_v14 = vmul.f32 %v2422_v48, %v2758_v10  ;;  %v2652_v48 = vmov -1e+09  }
 0x20b   :  { %v289_v20 = vadd.f32 1e-05, %v284_v15 }
 0x20d   :  { %2445 = vrsqrt.f32 %v289_v20  ;;  %vm298_vm14 = vcmp.eq.f32.partialorder %v289_v20, inf  ;;  %v301_v33 = vand.u32 2147483648, %v289_v20  ;;  %vm300_vm15 = vcmp.eq.f32.partialorder %v289_v20, 0.0 }
 0x213   :  { %v2446_v23 = vpop.eup %2445 }
 0x214   :  { %v292_v24 = vmul.f32 %v2446_v23, %v289_v20 }
 0x216   :  { %v293_v25 = vmul.f32 %v2446_v23, %v292_v24 }
 0x218   :  { %v294_v26 = vmul.f32 0.5, %v293_v25 }
 0x21a   :  { %v295_v27 = vsub.f32 1.5, %v294_v26  ;;  %v283_v28 = vpop.xlane.xlu2 %282  ;;  %v179_v26 = vpop.xlane.xlu0 %178 }
 0x21b   :  { %v285_v29 = vmul.f32 %v283_v28, %v2747_v0 }
 0x21c   :  { %v296_v30 = vmul.f32 %v2446_v23, %v295_v27 }
 0x21d   :  { %v290_v31 = vadd.f32 1e-05, %v285_v29  ;;  %v2651_v29 = vmov 1.0  }
 0x21e   :  { %v297_v32 = vmul.f32 %v296_v30, %v289_v20 }
 0x21f   :  { %2447 = vrsqrt.f32 %v290_v31  ;;  %vm310_vm5 = vcmp.eq.f32.partialorder %v290_v31, inf  ;;  %v313_v60 = vand.u32 2147483648, %v290_v31  ;;  %vm312_vm7 = vcmp.eq.f32.partialorder %v290_v31, 0.0 }
 0x220   :  { %v299_v34 = vsel %vm298_vm14, %v289_v20, %v297_v32  ;;  %vm183_vm14 = vcmp.eq.f32.partialorder %v179_v26, 0.0 }
 0x221   :  { %v302_v35 = vsel %vm300_vm15, %v301_v33, %v299_v34  ;;  %v2268_v28 = vsel %vm183_vm14, 1.0, %v2643_v18  ;;  %vm389_vm15 = vcmask 64512  }
 0x222   :  { %2449 = vrcp.f32 %v302_v35  ;;  %v326_v45 = vand.u32 2147483648, %v302_v35  ;;  %v324_v50 = vand.u32 2147483647, %v302_v35  ;;  %vm320_vm2 = vweird.f32 %v302_v35  ;;  %v182_v25 = vpop.xlane.xlu2 %181 }
 0x223   :  { %vm184_vm13 = vcmp.eq.f32.partialorder %v182_v25, 0.0 }
 0x224   :  { %v327_v3 = vor.u32 1.1754944e-38, %v326_v45  ;;  %vm325_vm4 = vcmp.eq.f32.partialorder %v324_v50, 8.507059e+37  ;;  %v2269_v27 = vsel %vm184_vm13, 1.0, %v2643_v18 }
 0x225   :  { %v2448_v36 = vpop.eup %2447  ;;  %2270 = vmatpush.xpose.msk.msra.mxu1 %vm189_vm12, %v2269_v27 }
 0x226   :  { %v304_v37 = vmul.f32 %v2448_v36, %v290_v31 }
 0x228   :  { %v2450_v38 = vpop.eup %2449  ;;  %v305_v39 = vmul.f32 %v2448_v36, %v304_v37 }
 0x229   :  { %v316_v40 = vmul.f32 %v2450_v38, %v302_v35  ;;  %vm321_vm1 = vweird.f32 %v2450_v38  ;;  %2271 = vmatpush.xpose.msk.msra.mxu1 %vm189_vm12, %v2268_v28 }
 0x22a   :  { %v306_v44 = vmul.f32 0.5, %v305_v39  ;;  %vm322_vm3 = vmor %vm320_vm2, %vm321_vm1 }
 0x22b   :  { %v317_v43 = vsub.f32 1.0, %v316_v40 }
 0x22c   :  { %v307_v51 = vsub.f32 1.5, %v306_v44  ;;  %2272 = vmatmul.msk.f32.vlgmr.msra.gmra.mxu1 %vm189_vm12, %v2651_v29 }
 0x22d   :  { %v318_v49 = vmul.f32 %v2450_v38, %v317_v43 }
 0x22e   :  { %v308_v54 = vmul.f32 %v2448_v36, %v307_v51 }
 0x22f   :  { %v319_v53 = vadd.f32 %v2450_v38, %v318_v49 }
 0x230   :  { %v309_v58 = vmul.f32 %v308_v54, %v290_v31 }
 0x231   :  { %v323_v6 = vsel %vm322_vm3, %v2450_v38, %v319_v53  ;;  %vm243_vm3 = vcmp.ge.s32.totalorder %v2711_v17, 8 }
 0x232   :  { %v328_v59 = vsel %vm325_vm4, %v327_v3, %v323_v6  ;;  %v311_v62 = vsel %vm310_vm5, %v290_v31, %v309_v58  ;;  %vm246_vm4 = vcmp.lt.s32.totalorder %v2711_v17, 16  ;;  %vm425_vm5 = vcmask 130048  }
 0x233   :  { %v329_v61 = vmul.f32 %v328_v59, %v287_v55  ;;  %v314_v63 = vsel %vm312_vm7, %v313_v60, %v311_v62  ;;  %vm248_vm7 = vmand %vm243_vm3, %vm246_vm4 }
 0x234   :  { %2451 = vrcp.f32 %v314_v63  ;;  %v341_v8 = vand.u32 2147483648, %v314_v63  ;;  %v339_v9 = vand.u32 2147483647, %v314_v63  ;;  %vm335_vm9 = vweird.f32 %v314_v63  ;;  %2273 = vmatmul.msk.f32.gmra.mxu1 %vm189_vm12, %v2651_v29 }
 0x235   :  { %v346_v1 = vadd.f32 %v2423_v57, %v329_v61 }
 0x236   :  { %v342_v12 = vor.u32 1.1754944e-38, %v341_v8  ;;  %vm340_vm11 = vcmp.eq.f32.partialorder %v339_v9, 8.507059e+37 }
 0x237   :  { %2274 = vmatmul.msk.f32.vlgmr.msra.gmra.mxu2 %vm139_vm6, %v346_v1 }
 0x23a   :  { %v2452_v2 = vpop.eup %2451 }
 0x23b   :  { %v331_v5 = vmul.f32 %v2452_v2, %v314_v63  ;;  %vm336_vm8 = vweird.f32 %v2452_v2 }
 0x23c   :  { %vm337_vm10 = vmor %vm335_vm9, %vm336_vm8 }
 0x23d   :  { %v332_v7 = vsub.f32 1.0, %v331_v5 }
 0x23f   :  { %v333_v4 = vmul.f32 %v2452_v2, %v332_v7 }
 0x241   :  { %v334_v11 = vadd.f32 %v2452_v2, %v333_v4 }
 0x243   :  { %v338_v15 = vsel %vm337_vm10, %v2452_v2, %v334_v11 }
 0x244   :  { %v343_v16 = vsel %vm340_vm11, %v342_v12, %v338_v15 }
 0x245   :  { %v344_v19 = vmul.f32 %v343_v16, %v288_v14 }
 0x247   :  { %v347_v20 = vadd.f32 %v2423_v57, %v344_v19 }
 0x249   :  { %2275 = vmatmul.msk.f32.gmra.mxu2 %vm139_vm6, %v347_v20 }
 0x2a9   :  { %v216_v44 = vpop.f32.mrf.mxu1 }
 0x2aa   :  { %vm251_vm1 = vcmp.eq.f32.partialorder %v216_v44, 0.0 }
 0x2ab   :  { %vm253_vm2 = vmand %vm234_vm0, %vm251_vm1 }
 0x2ac   :  { %v2830_v49 = vsel %vm253_vm2, 0.0, %v2652_v48 }
 0x2b1   :  { %v219_v45 = vpop.f32.mrf.mxu1 }
 0x2b2   :  { %vm252_vm8 = vcmp.eq.f32.partialorder %v219_v45, 0.0 }
 0x2b3   :  { %vm254_vm9 = vmand %vm248_vm7, %vm252_vm8 }
 0x2b4   :  { %v2836_v58 = vsel %vm254_vm9, 0.0, %v2652_v48 }
 0x2ba   :  { %v377_v22 = vpop.f32.mrf.mxu2 }
 0x2bb   :  { %v2771_v23 = vadd.f32 %v2424_v21, %v377_v22 }
 0x2bd   :  { %385 = vrot.lane.b32.xlu0 %v2771_v23, %s2645_s0 }
 0x2c5   :  { %509 = vrot.lane.b32.xlu0 %v2771_v23, %s2646_s28 }
 0x2cc   :  { %v380_v10 = vpop.f32.mrf.mxu2 }
 0x2cd   :  { %v2777_v24 = vadd.f32 %v2424_v21, %v380_v10 }
 0x2cf   :  { %515 = vrot.lane.b32.xlu2 %v2777_v24, %s2647_s29  ;;  %387 = vrot.lane.b32.xlu1 %v2777_v24, %s2645_s0  ;;  %v2852_v25 = vpack.i.bf16 %v2771_v23, %v2777_v24 }
 0x2d0   :  { %767 = vrot.lane.b32.xlu0 %v2777_v24, %s2648_s30 }
 0x2d7   :  { %639 = vrot.lane.b32.xlu2 %v2771_v23, %s2633_s21  ;;  %513 = vrot.lane.b32.xlu1 %v2771_v23, %s2647_s29 }
 0x2d8   :  { %635 = vrot.lane.b32.xlu0 %v2771_v23, %s2649_s4 }
 0x2df   :  { %511 = vrot.lane.b32.xlu2 %v2777_v24, %s2646_s28  ;;  %641 = vrot.lane.b32.xlu1 %v2777_v24, %s2633_s21 }
 0x2e0   :  { %763 = vrot.lane.b32.xlu0 %v2777_v24, %s2650_s5 }
 0x2e7   :  { %761 = vrot.lane.b32.xlu2 %v2771_v23, %s2650_s5  ;;  %765 = vrot.lane.b32.xlu1 %v2771_v23, %s2648_s30 }
 0x2ef   :  { %637 = vrot.lane.b32.xlu1 %v2777_v24, %s2649_s4 }
 0x329   :  { %v516_v30 = vpop.permute.xlu2 %515 }
 0x32a   :  { %2282 = vmatpush.xpose.msk.msrb.mxu1 %vm389_vm15, %v516_v30 }
 0x32f   :  { %v386_v31 = vpop.permute.xlu0 %385 }
 0x331   :  { %v640_v34 = vpop.permute.xlu2 %639 }
 0x337   :  { %v510_v33 = vpop.permute.xlu0 %509 }
 0x339   :  { %v512_v38 = vpop.permute.xlu2 %511 }
 0x341   :  { %v388_v32 = vpop.permute.xlu1 %387  ;;  %v762_v41 = vpop.permute.xlu2 %761 }
 0x342   :  { %2276 = vmatpush.xpose.msk.msra.mxu3 %vm389_vm15, %v388_v32  ;;  %v768_v36 = vpop.permute.xlu0 %767 }
 0x346   :  { %2277 = vmatpush.xpose.msk.msra.mxu3 %vm389_vm15, %v386_v31 }
 0x349   :  { %v514_v35 = vpop.permute.xlu1 %513  ;;  %2278 = vmatmul.msk.f32.vlgmr.msra.gmra.mxu3 %vm389_vm15, %v2771_v23 }
 0x34a   :  { %2283 = vmatpush.xpose.msk.msrb.mxu1 %vm389_vm15, %v514_v35  ;;  %v636_v39 = vpop.permute.xlu0 %635 }
 0x34d   :  { %2284 = vmatmul.msk.f32.vlgmr.msrb.gmra.mxu1 %vm389_vm15, %v510_v33 }
 0x34e   :  { %2294 = vmatpush.xpose.msk.msra.mxu1 %vm389_vm15, %v768_v36 }
 0x351   :  { %v642_v37 = vpop.permute.xlu1 %641  ;;  %2279 = vmatmul.msk.f32.gmra.mxu3 %vm389_vm15, %v2777_v24 }
 0x352   :  { %2288 = vmatpush.xpose.msk.msrb.mxu3 %vm389_vm15, %v642_v37  ;;  %v764_v43 = vpop.permute.xlu0 %763 }
 0x355   :  { %2285 = vmatmul.msk.f32.gmra.mxu1 %vm389_vm15, %v512_v38 }
 0x356   :  { %2289 = vmatpush.xpose.msk.msrb.mxu3 %vm389_vm15, %v640_v34 }
 0x359   :  { %v766_v40 = vpop.permute.xlu1 %765  ;;  %2290 = vmatmul.msk.f32.vlgmr.msrb.gmra.mxu3 %vm389_vm15, %v636_v39 }
 0x35a   :  { %2295 = vmatpush.xpose.msk.msra.mxu1 %vm389_vm15, %v766_v40 }
 0x35d   :  { %2296 = vmatmul.msk.f32.vlgmr.msra.gmra.mxu1 %vm389_vm15, %v762_v41 }
 0x361   :  { %v638_v42 = vpop.permute.xlu1 %637 }
 0x362   :  { %2291 = vmatmul.msk.f32.gmra.mxu3 %vm389_vm15, %v638_v42 }
 0x365   :  { %2297 = vmatmul.msk.f32.gmra.mxu1 %vm389_vm15, %v764_v43 }
 0x3ca   :  { %v542_v46 = vpop.f32.mrf.mxu1 }
 0x3cb   :  { %v548_v47 = vmul.f32 0.35355338, %v542_v46 }
 0x3cc   :  { %v415_v50 = vpop.f32.mrf.mxu3 }
 0x3cd   :  { %v421_v51 = vmul.f32 0.35355338, %v415_v50  ;;  %v550_v53 = vadd.f32 %v548_v47, %v2830_v49 }
 0x3cf   :  { %v552_v54 = vsel %vm425_vm5, %v550_v53, -inf  ;;  %v423_v3 = vadd.f32 %v421_v51, %v2830_v49 }
 0x3d0   :  { %553 = vmax.xlane.f32.xlu2 %v552_v54 }
 0x3d1   :  { %v426_v55 = vsel %vm425_vm5, %v423_v3, -inf }
 0x3d2   :  { %427 = vmax.xlane.f32.xlu1 %v426_v55  ;;  %v545_v6 = vpop.f32.mrf.mxu1 }
 0x3d3   :  { %v549_v57 = vmul.f32 0.35355338, %v545_v6 }
 0x3d4   :  { %v418_v59 = vpop.f32.mrf.mxu3 }
 0x3d5   :  { %v422_v60 = vmul.f32 0.35355338, %v418_v59  ;;  %v551_v61 = vadd.f32 %v549_v57, %v2836_v58 }
 0x3d7   :  { %v555_v62 = vsel %vm425_vm5, %v551_v61, -inf  ;;  %v424_v63 = vadd.f32 %v422_v60, %v2836_v58 }
 0x3d8   :  { %556 = vmax.xlane.f32.xlu0 %v555_v62 }
 0x3d9   :  { %v429_v1 = vsel %vm425_vm5, %v424_v63, -inf }
 0x3da   :  { %430 = vmax.xlane.f32.xlu2 %v429_v1  ;;  %v794_v2 = vpop.f32.mrf.mxu1 }
 0x3db   :  { %v800_v5 = vmul.f32 0.35355338, %v794_v2 }
 0x3dc   :  { %v668_v7 = vpop.f32.mrf.mxu3 }
 0x3dd   :  { %v674_v8 = vmul.f32 0.35355338, %v668_v7  ;;  %v802_v4 = vadd.f32 %v800_v5, %v2830_v49 }
 0x3df   :  { %v804_v9 = vsel %vm425_vm5, %v802_v4, -inf  ;;  %v676_v11 = vadd.f32 %v674_v8, %v2830_v49 }
 0x3e0   :  { %805 = vmax.xlane.f32.xlu1 %v804_v9 }
 0x3e1   :  { %v678_v12 = vsel %vm425_vm5, %v676_v11, -inf }
 0x3e2   :  { %679 = vmax.xlane.f32.xlu0 %v678_v12  ;;  %v797_v14 = vpop.f32.mrf.mxu1 }
 0x3e3   :  { %v801_v15 = vmul.f32 0.35355338, %v797_v14 }
 0x3e5   :  { %v671_v16 = vpop.f32.mrf.mxu3  ;;  %v803_v19 = vadd.f32 %v801_v15, %v2836_v58 }
 0x3e6   :  { %v675_v20 = vmul.f32 0.35355338, %v671_v16 }
 0x3e7   :  { %v807_v21 = vsel %vm425_vm5, %v803_v19, -inf }
 0x3e8   :  { %808 = vmax.xlane.f32.xlu2 %v807_v21  ;;  %v677_v22 = vadd.f32 %v675_v20, %v2836_v58 }
 0x3ea   :  { %v681_v10 = vsel %vm425_vm5, %v677_v22, -inf }
 0x3eb   :  { %682 = vmax.xlane.f32.xlu1 %v681_v10 }
 0x404   :  { %2382 = vrot.lane.b32.xlu1 %v2852_v25, %s2653_s6 }
 0x443   :  { %v554_v26 = vpop.xlane.xlu2 %553 }
 0x444   :  { %v558_v27 = vsub.f32 %v550_v53, %v554_v26 }
 0x445   :  { %v428_v28 = vpop.xlane.xlu1 %427 }
 0x446   :  { %v560_v29 = vmul.f32 1.442695, %v558_v27  ;;  %v432_v30 = vsub.f32 %v423_v3, %v428_v28 }
 0x448   :  { %2453 = vpow2.f32 %v560_v29  ;;  %v434_v31 = vmul.f32 1.442695, %v432_v30 }
 0x44a   :  { %2455 = vpow2.f32 %v434_v31 }
 0x44b   :  { %v557_v32 = vpop.xlane.xlu0 %556 }
 0x44c   :  { %v559_v33 = vsub.f32 %v551_v61, %v557_v32 }
 0x44d   :  { %v431_v34 = vpop.xlane.xlu2 %430 }
 0x44e   :  { %v2856_v35 = vpop.eup %2453  ;;  %v562_v36 = vmul.f32 1.442695, %v559_v33  ;;  %v433_v23 = vsub.f32 %v424_v63, %v431_v34 }
 0x44f   :  { %v564_v24 = vsel %vm425_vm5, %v2856_v35, 0.0 }
 0x450   :  { %v2860_v37 = vpop.eup %2455  ;;  %2457 = vpow2.f32 %v562_v36  ;;  %v436_v38 = vmul.f32 1.442695, %v433_v23  ;;  %565 = vadd.xlane.f32.xlu0 %v564_v24 }
 0x451   :  { %v438_v39 = vsel %vm425_vm5, %v2860_v37, 0.0 }
 0x452   :  { %2459 = vpow2.f32 %v436_v38  ;;  %439 = vadd.xlane.f32.xlu2 %v438_v39 }
 0x453   :  { %v806_v40 = vpop.xlane.xlu1 %805 }
 0x454   :  { %v810_v41 = vsub.f32 %v802_v4, %v806_v40 }
 0x455   :  { %v680_v42 = vpop.xlane.xlu0 %679 }
 0x456   :  { %v2864_v43 = vpop.eup %2457  ;;  %v812_v44 = vmul.f32 1.442695, %v810_v41  ;;  %v684_v45 = vsub.f32 %v676_v11, %v680_v42 }
 0x457   :  { %v567_v46 = vsel %vm425_vm5, %v2864_v43, 0.0 }
 0x458   :  { %v2868_v47 = vpop.eup %2459  ;;  %2461 = vpow2.f32 %v812_v44  ;;  %v686_v48 = vmul.f32 1.442695, %v684_v45  ;;  %568 = vadd.xlane.f32.xlu1 %v567_v46 }
 0x459   :  { %v441_v50 = vsel %vm425_vm5, %v2868_v47, 0.0 }
 0x45a   :  { %2463 = vpow2.f32 %v686_v48  ;;  %442 = vadd.xlane.f32.xlu0 %v441_v50 }
 0x45b   :  { %v809_v51 = vpop.xlane.xlu2 %808 }
 0x45c   :  { %v811_v53 = vsub.f32 %v803_v19, %v809_v51 }
 0x45e   :  { %v2872_v54 = vpop.eup %2461  ;;  %v814_v3 = vmul.f32 1.442695, %v811_v53  ;;  %v683_v55 = vpop.xlane.xlu1 %682 }
 0x45f   :  { %v816_v6 = vsel %vm425_vm5, %v2872_v54, 0.0  ;;  %v685_v59 = vsub.f32 %v677_v22, %v683_v55 }
 0x460   :  { %v2876_v57 = vpop.eup %2463  ;;  %2465 = vpow2.f32 %v814_v3  ;;  %817 = vadd.xlane.f32.xlu2 %v816_v6 }
 0x461   :  { %v690_v60 = vsel %vm425_vm5, %v2876_v57, 0.0  ;;  %v688_v61 = vmul.f32 1.442695, %v685_v59 }
 0x462   :  { %691 = vadd.xlane.f32.xlu0 %v690_v60 }
 0x463   :  { %2467 = vpow2.f32 %v688_v61 }
 0x466   :  { %v2880_v62 = vpop.eup %2465 }
 0x467   :  { %v819_v63 = vsel %vm425_vm5, %v2880_v62, 0.0 }
 0x469   :  { %v2884_v1 = vpop.eup %2467 }
 0x46a   :  { %820 = vadd.xlane.f32.xlu0 %v819_v63  ;;  %v693_v2 = vsel %vm425_vm5, %v2884_v1, 0.0 }
 0x471   :  { %2392 = vrot.lane.b32.xlu1 %v2852_v25, %s2654_s7 }
 0x472   :  { %694 = vadd.xlane.f32.xlu0 %v693_v2 }
 0x476   :  { %v2383_v5 = vpop.permute.xlu1 %2382 }
 0x477   :  { %v2384_v7 = vunpack.i.l.bf16 %v2383_v5  ;;  %v2385_v8 = vunpack.i.h.bf16 %v2383_v5 }
 0x478   :  { %2387 = vrot.lane.b32.xlu2 %v2852_v25, %s2655_s8 }
 0x479   :  { %626 = vmatpush.msrb.mxu2 %v2384_v7 }
 0x47b   :  { %627 = vmatpush.msrb.mxu2 %v2385_v8 }
 0x486   :  { %2397 = vrot.lane.b32.xlu0 %v2852_v25, %s2656_s9 }
 0x4c3   :  { %v566_v4 = vpop.xlane.xlu0 %565 }
 0x4c4   :  { %2469 = vrcp.f32 %v566_v4  ;;  %v581_v22 = vand.u32 2147483648, %v566_v4  ;;  %v579_v25 = vand.u32 2147483647, %v566_v4  ;;  %vm575_vm11 = vweird.f32 %v566_v4 }
 0x4c5   :  { %v440_v9 = vpop.xlane.xlu2 %439 }
 0x4c6   :  { %2471 = vrcp.f32 %v440_v9  ;;  %v582_v29 = vor.u32 1.1754944e-38, %v581_v22  ;;  %vm580_vm13 = vcmp.eq.f32.partialorder %v579_v25, 8.507059e+37  ;;  %vm449_vm0 = vweird.f32 %v440_v9 }
 0x4c7   :  { %v453_v39 = vand.u32 2147483647, %v440_v9  ;;  %v455_v40 = vand.u32 2147483648, %v440_v9 }
 0x4c9   :  { %vm454_vm4 = vcmp.eq.f32.partialorder %v453_v39, 8.507059e+37  ;;  %v456_v55 = vor.u32 1.1754944e-38, %v455_v40 }
 0x4ca   :  { %v2470_v11 = vpop.eup %2469 }
 0x4cb   :  { %v571_v12 = vmul.f32 %v2470_v11, %v566_v4  ;;  %v569_v14 = vpop.xlane.xlu1 %568  ;;  %vm576_vm10 = vweird.f32 %v2470_v11 }
 0x4cc   :  { %v2472_v15 = vpop.eup %2471  ;;  %2473 = vrcp.f32 %v569_v14  ;;  %vm577_vm12 = vmor %vm575_vm11, %vm576_vm10  ;;  %v596_v41 = vand.u32 2147483648, %v569_v14  ;;  %v594_v45 = vand.u32 2147483647, %v569_v14  ;;  %vm590_vm3 = vweird.f32 %v569_v14 }
 0x4cd   :  { %v572_v16 = vsub.f32 1.0, %v571_v12  ;;  %v445_v19 = vmul.f32 %v2472_v15, %v440_v9  ;;  %v2894_v20 = vpop.xlane.xlu0 %442  ;;  %vm450_vm14 = vweird.f32 %v2472_v15 }
 0x4ce   :  { %2475 = vrcp.f32 %v2894_v20  ;;  %vm2907_vm2 = vmor %vm449_vm0, %vm450_vm14  ;;  %v597_v6 = vor.u32 1.1754944e-38, %v596_v41  ;;  %vm464_vm8 = vweird.f32 %v2894_v20  ;;  %vm595_vm9 = vcmp.eq.f32.partialorder %v594_v45, 8.507059e+37 }
 0x4cf   :  { %v573_v21 = vmul.f32 %v2470_v11, %v572_v16  ;;  %v446_v10 = vsub.f32 1.0, %v445_v19  ;;  %v470_v61 = vand.u32 2147483648, %v2894_v20  ;;  %v468_v12 = vand.u32 2147483647, %v2894_v20 }
 0x4d1   :  { %v574_v26 = vadd.f32 %v2470_v11, %v573_v21  ;;  %v447_v27 = vmul.f32 %v2472_v15, %v446_v10  ;;  %v471_v10 = vor.u32 1.1754944e-38, %v470_v61  ;;  %vm469_vm0 = vcmp.eq.f32.partialorder %v468_v12, 8.507059e+37 }
 0x4d2   :  { %v2474_v28 = vpop.eup %2473 }
 0x4d3   :  { %v586_v30 = vmul.f32 %v2474_v28, %v569_v14  ;;  %v2897_v31 = vpop.xlane.xlu2 %817  ;;  %v578_v32 = vsel %vm577_vm12, %v2470_v11, %v574_v26  ;;  %v448_v34 = vadd.f32 %v2472_v15, %v447_v27  ;;  %vm591_vm1 = vweird.f32 %v2474_v28 }
 0x4d4   :  { %v2899_v33 = vpop.eup %2475  ;;  %2477 = vrcp.f32 %v2897_v31  ;;  %v583_v38 = vsel %vm580_vm13, %v582_v29, %v578_v32  ;;  %vm592_vm7 = vmor %vm590_vm3, %vm591_vm1  ;;  %v831_v19 = vand.u32 2147483647, %v2897_v31  ;;  %vm827_vm13 = vweird.f32 %v2897_v31 }
 0x4d5   :  { %v587_v36 = vsub.f32 1.0, %v586_v30  ;;  %v460_v23 = vmul.f32 %v2899_v33, %v2894_v20  ;;  %v2904_v24 = vpop.xlane.xlu0 %691  ;;  %v584_v48 = vmul.f32 %v2856_v35, %v583_v38  ;;  %v452_v53 = vsel %vm2907_vm2, %v2472_v15, %v448_v34 }
 0x4d6   :  { %v457_v5 = vsel %vm454_vm4, %v456_v55, %v452_v53  ;;  %2479 = vrcp.f32 %v2904_v24  ;;  %vm465_vm10 = vweird.f32 %v2899_v33  ;;  %v833_v15 = vand.u32 2147483648, %v2897_v31 }
 0x4d7   :  { %v588_v42 = vmul.f32 %v2474_v28, %v587_v36  ;;  %v461_v44 = vsub.f32 1.0, %v460_v23  ;;  %2286 = vmatmul.msk.f32.vlgmr.msrb.gmra.mxu2 %vm425_vm5, %v584_v48  ;;  %v458_v16 = vmul.f32 %v2860_v37, %v457_v5  ;;  %vm2929_vm12 = vmor %vm464_vm8, %vm465_vm10  ;;  %vm832_vm1 = vcmp.eq.f32.partialorder %v831_v19, 8.507059e+37 }
 0x4d8   :  { %v834_v20 = vor.u32 1.1754944e-38, %v833_v15  ;;  %v707_v55 = vand.u32 2147483648, %v2904_v24 }
 0x4d9   :  { %v462_v50 = vmul.f32 %v2899_v33, %v461_v44  ;;  %v589_v51 = vadd.f32 %v2474_v28, %v588_v42 }
 0x4da   :  { %v2478_v3 = vpop.eup %2477 }
 0x4db   :  { %v823_v59 = vmul.f32 %v2478_v3, %v2897_v31  ;;  %v2388_v60 = vpop.permute.xlu2 %2387  ;;  %v593_v35 = vsel %vm592_vm7, %v2474_v28, %v589_v51  ;;  %v463_v4 = vadd.f32 %v2899_v33, %v462_v50  ;;  %vm828_vm11 = vweird.f32 %v2478_v3 }
 0x4dc   :  { %v2389_v63 = vunpack.i.l.bf16 %v2388_v60  ;;  %v598_v2 = vsel %vm595_vm9, %v597_v6, %v593_v35  ;;  %v2390_v11 = vunpack.i.h.bf16 %v2388_v60  ;;  %vm829_vm14 = vmor %vm827_vm13, %vm828_vm11  ;;  %v2480_v37 = vpop.eup %2479  ;;  %vm701_vm9 = vweird.f32 %v2904_v24 }
 0x4dd   :  { %v824_v7 = vsub.f32 1.0, %v823_v59  ;;  %v821_v8 = vpop.xlane.xlu0 %820  ;;  %v599_v9 = vmul.f32 %v2864_v43, %v598_v2  ;;  %v467_v43 = vsel %vm2929_vm12, %v2899_v33, %v463_v4  ;;  %v697_v34 = vmul.f32 %v2480_v37, %v2904_v24 }
 0x4de   :  { %2481 = vrcp.f32 %v821_v8  ;;  %500 = vmatpush.msrb.mxu0 %v2389_v63  ;;  %v472_v29 = vsel %vm469_vm0, %v471_v10, %v467_v43  ;;  %v848_v38 = vand.u32 2147483648, %v821_v8  ;;  %v846_v41 = vand.u32 2147483647, %v821_v8  ;;  %v921_v43 = vld [vmem:[#allocation2 + $0xf8] sm:$0xff]  ;;  %v920_v10 = vld [vmem:[#allocation2 + $0xa8] sm:$0xff] }
 0x4df   :  { %v825_v14 = vmul.f32 %v2478_v3, %v824_v7  ;;  %2287 = vmatmul.msk.f32.gmra.mxu2 %vm425_vm5, %v599_v9  ;;  %v473_v23 = vmul.f32 %v2868_v47, %v472_v29  ;;  %v698_v42 = vsub.f32 1.0, %v697_v34  ;;  %vm842_vm3 = vweird.f32 %v821_v8  ;;  %942 = vmatpush.msra.mxu3 %v921_v43 }
 0x4e0   :  { %501 = vmatpush.msrb.mxu0 %v2390_v11  ;;  %v849_v46 = vor.u32 1.1754944e-38, %v848_v38  ;;  %vm847_vm7 = vcmp.eq.f32.partialorder %v846_v41, 8.507059e+37  ;;  %vm702_vm8 = vweird.f32 %v2480_v37  ;;  %v705_v6 = vand.u32 2147483647, %v2904_v24  ;;  %v2425_v38 = vld [vmem:[#allocation5 + $0x50] ss:$0 sm:$0xff] }
 0x4e1   :  { %v826_v22 = vadd.f32 %v2478_v3, %v825_v14  ;;  %2280 = vmatmul.msk.f32.vlgmr.msrb.gmra.mxu0 %vm425_vm5, %v458_v16  ;;  %v699_v47 = vmul.f32 %v2480_v37, %v698_v42  ;;  %vm703_vm10 = vmor %vm701_vm9, %vm702_vm8  ;;  %v708_v35 = vor.u32 1.1754944e-38, %v707_v55  ;;  %943 = vmatpush.msra.mxu3 %v920_v10 }
 0x4e2   :  { %vm706_vm11 = vcmp.eq.f32.partialorder %v705_v6, 8.507059e+37 }
 0x4e3   :  { %v830_v25 = vsel %vm829_vm14, %v2478_v3, %v826_v22  ;;  %v2393_v26 = vpop.permute.xlu1 %2392  ;;  %v700_v53 = vadd.f32 %v2480_v37, %v699_v47 }
 0x4e4   :  { %v2482_v27 = vpop.eup %2481  ;;  %v2394_v28 = vunpack.i.l.bf16 %v2393_v26  ;;  %v835_v30 = vsel %vm832_vm1, %v834_v20, %v830_v25  ;;  %v2395_v36 = vunpack.i.h.bf16 %v2393_v26  ;;  %v918_v25 = vld [vmem:[#allocation2 + $0x8] sm:$0xff]  ;;  %vm915_vm1 = vcmask 195584  }
 0x4e5   :  { %v838_v31 = vmul.f32 %v2482_v27, %v821_v8  ;;  %v695_v32 = vpop.xlane.xlu0 %694  ;;  %v836_v39 = vmul.f32 %v2872_v54, %v835_v30  ;;  %vm843_vm2 = vweird.f32 %v2482_v27  ;;  %v704_v59 = vsel %vm703_vm10, %v2480_v37, %v700_v53  ;;  %v919_v37 = vld [vmem:[#allocation2 + $0x58] sm:$0xff] }
 0x4e6   :  { %2483 = vrcp.f32 %v695_v32  ;;  %878 = vmatpush.msra.mxu2 %v2394_v28  ;;  %vm844_vm4 = vmor %vm842_vm3, %vm843_vm2  ;;  %v709_v63 = vsel %vm706_vm11, %v708_v35, %v704_v59  ;;  %v722_v5 = vand.u32 2147483648, %v695_v32  ;;  %vm716_vm13 = vweird.f32 %v695_v32  ;;  %944 = vmatpush.msra.mxu3 %v919_v37  ;;  %v1042_v59 = vld [vmem:[#allocation2 + $0x100] sm:$0xff]  ;;  %v1078_v37 = vld [vmem:[#allocation2 + $0xb8] sm:$0xff] }
 0x4e7   :  { %v839_v33 = vsub.f32 1.0, %v838_v31  ;;  %v710_v8 = vmul.f32 %v2876_v57, %v709_v63  ;;  %v720_v4 = vand.u32 2147483647, %v695_v32  ;;  %v1040_v35 = vld [vmem:[#allocation2 + $0x60] sm:$0xff] }
 0x4e8   :  { %879 = vmatpush.msra.mxu2 %v2395_v36  ;;  %v723_v9 = vor.u32 1.1754944e-38, %v722_v5  ;;  %945 = vmatpush.msra.mxu3 %v918_v25 }
 0x4e9   :  { %v840_v40 = vmul.f32 %v2482_v27, %v839_v33  ;;  %2281 = vmatmul.msk.f32.gmra.mxu0 %vm425_vm5, %v473_v23  ;;  %2298 = vmatmul.msk.f32.vlgmr.msra.gmra.mxu2 %vm425_vm5, %v836_v39  ;;  %vm721_vm0 = vcmp.eq.f32.partialorder %v720_v4, 8.507059e+37 }
 0x4eb   :  { %v841_v44 = vadd.f32 %v2482_v27, %v840_v40 }
 0x4ec   :  { %v2484_v45 = vpop.eup %2483 }
 0x4ed   :  { %v845_v48 = vsel %vm844_vm4, %v2482_v27, %v841_v44  ;;  %v712_v50 = vmul.f32 %v2484_v45, %v695_v32  ;;  %vm717_vm12 = vweird.f32 %v2484_v45 }
 0x4ee   :  { %v850_v51 = vsel %vm847_vm7, %v849_v46, %v845_v48  ;;  %vm718_vm14 = vmor %vm716_vm13, %vm717_vm12 }
 0x4ef   :  { %v851_v54 = vmul.f32 %v2880_v62, %v850_v51  ;;  %v713_v3 = vsub.f32 1.0, %v712_v50 }
 0x4f1   :  { %2299 = vmatmul.msk.f32.gmra.mxu2 %vm425_vm5, %v851_v54  ;;  %v714_v60 = vmul.f32 %v2484_v45, %v713_v3 }
 0x4f3   :  { %v715_v62 = vadd.f32 %v2484_v45, %v714_v60  ;;  %v1041_v60 = vld [vmem:[#allocation2 + $0xb0] sm:$0xff] }
 0x4f5   :  { %v719_v24 = vsel %vm718_vm14, %v2484_v45, %v715_v62 }
 0x4f6   :  { %v724_v11 = vsel %vm721_vm0, %v723_v9, %v719_v24 }
 0x4f7   :  { %v725_v12 = vmul.f32 %v2884_v1, %v724_v11 }
 0x4f8   :  { %v2398_v61 = vpop.permute.xlu0 %2397 }
 0x4f9   :  { %v2399_v2 = vunpack.i.l.bf16 %v2398_v61  ;;  %v2400_v7 = vunpack.i.h.bf16 %v2398_v61  ;;  %v1039_v61 = vld [vmem:[#allocation2 + $0x10] sm:$0xff] }
 0x4fb   :  { %752 = vmatpush.msra.mxu0 %v2399_v2 }
 0x4fd   :  { %753 = vmatpush.msra.mxu0 %v2400_v7 }
 0x4fe   :  { %2292 = vmatmul.msk.f32.vlgmr.msra.gmra.mxu0 %vm425_vm5, %v710_v8 }
 0x4ff   :  { %1063 = vmatpush.msrb.mxu0 %v1042_v59 }
 0x501   :  { %1064 = vmatpush.msrb.mxu0 %v1041_v60 }
 0x503   :  { %1065 = vmatpush.msrb.mxu0 %v1040_v35 }
 0x505   :  { %1066 = vmatpush.msrb.mxu0 %v1039_v61 }
 0x506   :  { %2293 = vmatmul.msk.f32.gmra.mxu0 %vm425_vm5, %v725_v12 }
 0x55a   :  { %v629_v14 = vpop.f32.mrf.mxu2 }
 0x55b   :  { %889 = vrot.lane.b32.xlu2 %v629_v14, %s2636_s25 }
 0x55e   :  { %v503_v16 = vpop.f32.mrf.mxu0 }
 0x562   :  { %v632_v15 = vpop.f32.mrf.mxu2 }
 0x566   :  { %v506_v57 = vpop.f32.mrf.mxu0 }
 0x56c   :  { %v881_v19 = vpop.f32.mrf.mxu2 }
 0x56d   :  { %905 = vrot.lane.b32.xlu2 %v881_v19, %s2657_s10 }
 0x574   :  { %v884_v21 = vpop.f32.mrf.mxu2 }
 0x575   :  { %907 = vrot.lane.b32.xlu0 %v884_v21, %s2657_s10 }
 0x57b   :  { %v755_v22 = vpop.f32.mrf.mxu0 }
 0x57c   :  { %897 = vrot.lane.b32.xlu1 %v755_v22, %s2658_s11 }
 0x583   :  { %v758_v1 = vpop.f32.mrf.mxu0 }
 0x584   :  { %891 = vrot.lane.b32.xlu1 %v632_v15, %s2636_s25  ;;  %899 = vrot.lane.b32.xlu2 %v758_v1, %s2658_s11  ;;  %v1079_v1 = vld [vmem:[#allocation2 + $0x108] sm:$0xff] }
 0x585   :  { %1094 = vmatpush.xpose.msrb.mxu1 %v1079_v1 }
 0x589   :  { %1095 = vmatpush.xpose.msrb.mxu1 %v1078_v37 }
 0x5b5   :  { %v890_v20 = vpop.permute.xlu2 %889 }
 0x5b6   :  { %v911_v26 = vsel %vm389_vm15, %v503_v16, %v890_v20 }
 0x5c7   :  { %v906_v28 = vpop.permute.xlu2 %905 }
 0x5de   :  { %v900_v32 = vpop.permute.xlu2 %899 }
 0x5e7   :  { %v908_v36 = vpop.permute.xlu0 %907 }
 0x5ee   :  { %v898_v27 = vpop.permute.xlu1 %897 }
 0x5ef   :  { %v913_v29 = vsel %vm425_vm5, %v911_v26, %v898_v27  ;;  %v1077_v26 = vld [vmem:[#allocation2 + $0x68] sm:$0xff] }
 0x5f0   :  { %v916_v30 = vsel %vm915_vm1, %v913_v29, %v906_v28  ;;  %1096 = vmatpush.xpose.msrb.mxu1 %v1077_v26 }
 0x5f1   :  { %2300 = vmatmul.msk.f32.vlgmr.msra.gmra.mxu3 %vm139_vm6, %v916_v30 }
 0x5f6   :  { %v892_v31 = vpop.permute.xlu1 %891 }
 0x5f7   :  { %v912_v34 = vsel %vm389_vm15, %v506_v57, %v892_v31 }
 0x5f8   :  { %v914_v33 = vsel %vm425_vm5, %v912_v34, %v900_v32 }
 0x5f9   :  { %v917_v23 = vsel %vm915_vm1, %v914_v33, %v908_v36  ;;  %v2426_v33 = vld [vmem:[#allocation5 + $0x58] ss:$0 sm:$0xff] }
 0x5fa   :  { %2301 = vmatmul.msk.f32.gmra.mxu3 %vm139_vm6, %v917_v23 }
 0x674   :  { %v947_v39 = vpop.f32.mrf.mxu3 }
 0x675   :  { %v948_v40 = vadd.f32 %v2425_v38, %v947_v39 }
 0x677   :  { %v2968_v41 = vadd.f32 %v948_v40, %v2739_v52 }
 0x679   :  { %v957_v42 = vsel %vm139_vm6, %v2968_v41, 0.0 }
 0x67a   :  { %958 = vadd.xlane.f32.xlu1 %v957_v42 }
 0x67d   :  { %v950_v44 = vpop.f32.mrf.mxu3 }
 0x67e   :  { %v951_v45 = vadd.f32 %v2425_v38, %v950_v44 }
 0x680   :  { %v2973_v46 = vadd.f32 %v951_v45, %v2743_v56 }
 0x682   :  { %v960_v48 = vsel %vm139_vm6, %v2973_v46, 0.0 }
 0x683   :  { %961 = vadd.xlane.f32.xlu2 %v960_v48  ;;  %v2427_v48 = vld [vmem:[#allocation5 + $0x60] ss:$0 sm:$0xff] }
 0x6ed   :  { %v959_v47 = vpop.xlane.xlu1 %958 }
 0x6ee   :  { %v963_v50 = vmul.f32 %v959_v47, %v2747_v0 }
 0x6f0   :  { %v2979_v51 = vsub.f32 %v2968_v41, %v963_v50 }
 0x6f2   :  { %v967_v52 = vmul.f32 %v2979_v51, %v2979_v51  ;;  %v978_v44 = vmul.f32 %v2426_v33, %v2979_v51 }
 0x6f4   :  { %v969_v54 = vsel %vm139_vm6, %v967_v52, 0.0 }
 0x6f5   :  { %970 = vadd.xlane.f32.xlu0 %v969_v54 }
 0x6f6   :  { %v962_v53 = vpop.xlane.xlu2 %961 }
 0x6f7   :  { %v964_v56 = vmul.f32 %v962_v53, %v2747_v0 }
 0x6f9   :  { %v2986_v3 = vsub.f32 %v2973_v46, %v964_v56 }
 0x6fb   :  { %v968_v55 = vmul.f32 %v2986_v3, %v2986_v3  ;;  %v979_v51 = vmul.f32 %v2426_v33, %v2986_v3 }
 0x6fd   :  { %v972_v6 = vsel %vm139_vm6, %v968_v55, 0.0 }
 0x6fe   :  { %973 = vadd.xlane.f32.xlu1 %v972_v6 }
 0x768   :  { %v971_v63 = vpop.xlane.xlu0 %970 }
 0x769   :  { %v975_v2 = vmul.f32 %v971_v63, %v2747_v0 }
 0x76b   :  { %v980_v62 = vadd.f32 1e-05, %v975_v2 }
 0x76d   :  { %2485 = vrsqrt.f32 %v980_v62  ;;  %vm989_vm2 = vcmp.eq.f32.partialorder %v980_v62, inf  ;;  %v992_v57 = vand.u32 2147483648, %v980_v62  ;;  %vm991_vm3 = vcmp.eq.f32.partialorder %v980_v62, 0.0 }
 0x771   :  { %v974_v5 = vpop.xlane.xlu1 %973 }
 0x772   :  { %v976_v7 = vmul.f32 %v974_v5, %v2747_v0  ;;  %v2428_v5 = vld [vmem:[#allocation5 + $0x68] ss:$0 sm:$0xff] }
 0x773   :  { %v2486_v8 = vpop.eup %2485 }
 0x774   :  { %v983_v4 = vmul.f32 %v2486_v8, %v980_v62  ;;  %v981_v24 = vadd.f32 1e-05, %v976_v7 }
 0x776   :  { %v984_v9 = vmul.f32 %v2486_v8, %v983_v4  ;;  %2487 = vrsqrt.f32 %v981_v24  ;;  %vm1001_vm4 = vcmp.eq.f32.partialorder %v981_v24, inf  ;;  %v1004_v29 = vand.u32 2147483648, %v981_v24 }
 0x777   :  { %vm1003_vm7 = vcmp.eq.f32.partialorder %v981_v24, 0.0 }
 0x778   :  { %v985_v11 = vmul.f32 0.5, %v984_v9 }
 0x77a   :  { %v986_v12 = vsub.f32 1.5, %v985_v11 }
 0x77c   :  { %v2488_v14 = vpop.eup %2487  ;;  %v987_v15 = vmul.f32 %v2486_v8, %v986_v12  ;;  %v2429_v12 = vld [vmem:[#allocation5 + $0x70] ss:$0 sm:$0xff] }
 0x77d   :  { %v995_v16 = vmul.f32 %v2488_v14, %v981_v24 }
 0x77e   :  { %v988_v19 = vmul.f32 %v987_v15, %v980_v62 }
 0x77f   :  { %v996_v21 = vmul.f32 %v2488_v14, %v995_v16 }
 0x780   :  { %v990_v22 = vsel %vm989_vm2, %v980_v62, %v988_v19  ;;  %v1076_v62 = vld [vmem:[#allocation2 + $0x18] sm:$0xff] }
 0x781   :  { %v993_v43 = vsel %vm991_vm3, %v992_v57, %v990_v22  ;;  %v997_v10 = vmul.f32 0.5, %v996_v21  ;;  %1097 = vmatpush.xpose.msrb.mxu1 %v1076_v62 }
 0x782   :  { %2489 = vrcp.f32 %v993_v43  ;;  %v1017_v36 = vand.u32 2147483648, %v993_v43  ;;  %v1015_v38 = vand.u32 2147483647, %v993_v43  ;;  %vm1011_vm9 = vweird.f32 %v993_v43 }
 0x783   :  { %v998_v25 = vsub.f32 1.5, %v997_v10 }
 0x784   :  { %v1018_v40 = vor.u32 1.1754944e-38, %v1017_v36  ;;  %vm1016_vm11 = vcmp.eq.f32.partialorder %v1015_v38, 8.507059e+37 }
 0x785   :  { %v999_v20 = vmul.f32 %v2488_v14, %v998_v25 }
 0x787   :  { %v1000_v27 = vmul.f32 %v999_v20, %v981_v24 }
 0x788   :  { %v2490_v28 = vpop.eup %2489 }
 0x789   :  { %v1007_v30 = vmul.f32 %v2490_v28, %v993_v43  ;;  %v1002_v31 = vsel %vm1001_vm4, %v981_v24, %v1000_v27  ;;  %vm1012_vm8 = vweird.f32 %v2490_v28 }
 0x78a   :  { %v1005_v32 = vsel %vm1003_vm7, %v1004_v29, %v1002_v31  ;;  %vm1013_vm10 = vmor %vm1011_vm9, %vm1012_vm8  ;;  %v1193_v29 = vld [vmem:[#allocation2 + $0xc0] sm:$0xff] }
 0x78b   :  { %v1008_v34 = vsub.f32 1.0, %v1007_v30  ;;  %2491 = vrcp.f32 %v1005_v32  ;;  %v1032_v56 = vand.u32 2147483648, %v1005_v32  ;;  %v1030_v6 = vand.u32 2147483647, %v1005_v32  ;;  %v1192_v30 = vld [vmem:[#allocation2 + $0x70] sm:$0xff]  ;;  %v1191_v31 = vld [vmem:[#allocation2 + $0x20] sm:$0xff] }
 0x78c   :  { %vm1026_vm13 = vweird.f32 %v1005_v32 }
 0x78d   :  { %v1009_v23 = vmul.f32 %v2490_v28, %v1008_v34  ;;  %v1033_v60 = vor.u32 1.1754944e-38, %v1032_v56  ;;  %vm1031_vm0 = vcmp.eq.f32.partialorder %v1030_v6, 8.507059e+37 }
 0x78f   :  { %v1010_v39 = vadd.f32 %v2490_v28, %v1009_v23 }
 0x791   :  { %v2492_v42 = vpop.eup %2491  ;;  %v1014_v45 = vsel %vm1013_vm10, %v2490_v28, %v1010_v39  ;;  %v1194_v28 = vld [vmem:[#allocation2 + $0x110] sm:$0xff] }
 0x792   :  { %v1019_v47 = vsel %vm1016_vm11, %v1018_v40, %v1014_v45  ;;  %v1022_v50 = vmul.f32 %v2492_v42, %v1005_v32  ;;  %vm1027_vm12 = vweird.f32 %v2492_v42  ;;  %1215 = vmatpush.msrb.mxu2 %v1194_v28 }
 0x793   :  { %v1020_v52 = vmul.f32 %v1019_v47, %v978_v44  ;;  %vm1028_vm14 = vmor %vm1026_vm13, %vm1027_vm12 }
 0x794   :  { %v1023_v54 = vsub.f32 1.0, %v1022_v50  ;;  %1216 = vmatpush.msrb.mxu2 %v1193_v29 }
 0x795   :  { %v1037_v53 = vadd.f32 %v2427_v48, %v1020_v52 }
 0x796   :  { %v1024_v55 = vmul.f32 %v2492_v42, %v1023_v54  ;;  %1217 = vmatpush.msrb.mxu2 %v1192_v30 }
 0x797   :  { %2302 = vmatmul.msk.f32.vlgmr.msrb.gmra.mxu0 %vm139_vm6, %v1037_v53 }
 0x798   :  { %v1025_v59 = vadd.f32 %v2492_v42, %v1024_v55  ;;  %1218 = vmatpush.msrb.mxu2 %v1191_v31  ;;  %v2432_v31 = vld [vmem:[#allocation5 + $0x88] ss:$0 sm:$0xff] }
 0x79a   :  { %v1029_v35 = vsel %vm1028_vm14, %v2492_v42, %v1025_v59 }
 0x79b   :  { %v1034_v61 = vsel %vm1031_vm0, %v1033_v60, %v1029_v35 }
 0x79c   :  { %v1035_v63 = vmul.f32 %v1034_v61, %v979_v51 }
 0x79e   :  { %v1038_v2 = vadd.f32 %v2427_v48, %v1035_v63 }
 0x7a0   :  { %2303 = vmatmul.msk.f32.gmra.mxu0 %vm139_vm6, %v1038_v2 }
 0x814   :  { %v1068_v7 = vpop.f32.mrf.mxu0 }
 0x815   :  { %v1069_v8 = vadd.f32 %v2428_v5, %v1068_v7 }
 0x817   :  { %v1074_v4 = vmax.f32 %v1069_v8, 0.0  ;;  %v2430_v8 = vld [vmem:[#allocation5 + $0x78] ss:$0 sm:$0xff] }
 0x819   :  { %1098 = vmatmul.f32.vlgmr.msrb.gmra.mxu1 %v1074_v4 }
 0x81d   :  { %v1071_v24 = vpop.f32.mrf.mxu0 }
 0x81e   :  { %v1072_v9 = vadd.f32 %v2428_v5, %v1071_v24 }
 0x820   :  { %v1075_v11 = vmax.f32 %v1072_v9, 0.0 }
 0x822   :  { %1101 = vmatmul.f32.gmra.mxu1 %v1075_v11 }
 0x896   :  { %v1099_v3 = vpop.f32.mrf.mxu1 }
 0x897   :  { %v1100_v14 = vadd.f32 %v2429_v12, %v1099_v3 }
 0x899   :  { %v2998_v15 = vadd.f32 %v1100_v14, %v2968_v41 }
 0x89b   :  { %v1109_v16 = vsel %vm139_vm6, %v2998_v15, 0.0 }
 0x89c   :  { %1110 = vadd.xlane.f32.xlu2 %v1109_v16  ;;  %v2431_v16 = vld [vmem:[#allocation5 + $0x80] ss:$0 sm:$0xff] }
 0x89f   :  { %v1102_v19 = vpop.f32.mrf.mxu1 }
 0x8a0   :  { %v1103_v57 = vadd.f32 %v2429_v12, %v1102_v19 }
 0x8a2   :  { %v3003_v21 = vadd.f32 %v1103_v57, %v2973_v46 }
 0x8a4   :  { %v1112_v22 = vsel %vm139_vm6, %v3003_v21, 0.0 }
 0x8a5   :  { %1113 = vadd.xlane.f32.xlu0 %v1112_v22 }
 0x90f   :  { %v1111_v1 = vpop.xlane.xlu2 %1110 }
 0x910   :  { %v1115_v43 = vmul.f32 %v1111_v1, %v2747_v0 }
 0x912   :  { %v3009_v10 = vsub.f32 %v2998_v15, %v1115_v43 }
 0x914   :  { %v1119_v41 = vmul.f32 %v3009_v10, %v3009_v10  ;;  %v1130_v3 = vmul.f32 %v2430_v8, %v3009_v10 }
 0x916   :  { %v1121_v37 = vsel %vm139_vm6, %v1119_v41, 0.0 }
 0x917   :  { %1122 = vadd.xlane.f32.xlu1 %v1121_v37 }
 0x918   :  { %v1114_v25 = vpop.xlane.xlu0 %1113 }
 0x919   :  { %v1116_v46 = vmul.f32 %v1114_v25, %v2747_v0 }
 0x91b   :  { %v3016_v20 = vsub.f32 %v3003_v21, %v1116_v46 }
 0x91d   :  { %v1120_v26 = vmul.f32 %v3016_v20, %v3016_v20  ;;  %v1131_v10 = vmul.f32 %v2430_v8, %v3016_v20 }
 0x91f   :  { %v1124_v27 = vsel %vm139_vm6, %v1120_v26, 0.0 }
 0x920   :  { %1125 = vadd.xlane.f32.xlu2 %v1124_v27 }
 0x98a   :  { %v1123_v32 = vpop.xlane.xlu1 %1122 }
 0x98b   :  { %v1127_v34 = vmul.f32 %v1123_v32, %v2747_v0 }
 0x98d   :  { %v1132_v36 = vadd.f32 1e-05, %v1127_v34 }
 0x98f   :  { %2493 = vrsqrt.f32 %v1132_v36  ;;  %vm1141_vm2 = vcmp.eq.f32.partialorder %v1132_v36, inf  ;;  %v1144_v54 = vand.u32 2147483648, %v1132_v36  ;;  %vm1143_vm3 = vcmp.eq.f32.partialorder %v1132_v36, 0.0 }
 0x993   :  { %v1126_v33 = vpop.xlane.xlu2 %1125 }
 0x994   :  { %v1128_v23 = vmul.f32 %v1126_v33, %v2747_v0 }
 0x995   :  { %v2494_v38 = vpop.eup %2493 }
 0x996   :  { %v1135_v39 = vmul.f32 %v2494_v38, %v1132_v36  ;;  %v1133_v40 = vadd.f32 1e-05, %v1128_v23 }
 0x998   :  { %v1136_v42 = vmul.f32 %v2494_v38, %v1135_v39  ;;  %2495 = vrsqrt.f32 %v1133_v40  ;;  %vm1153_vm4 = vcmp.eq.f32.partialorder %v1133_v40, inf  ;;  %v1156_v61 = vand.u32 2147483648, %v1133_v40 }
 0x999   :  { %vm1155_vm7 = vcmp.eq.f32.partialorder %v1133_v40, 0.0 }
 0x99a   :  { %v1137_v44 = vmul.f32 0.5, %v1136_v42 }
 0x99c   :  { %v1138_v45 = vsub.f32 1.5, %v1137_v44 }
 0x99e   :  { %v2496_v48 = vpop.eup %2495  ;;  %v1139_v47 = vmul.f32 %v2494_v38, %v1138_v45 }
 0x99f   :  { %v1147_v50 = vmul.f32 %v2496_v48, %v1133_v40 }
 0x9a0   :  { %v1140_v52 = vmul.f32 %v1139_v47, %v1132_v36 }
 0x9a1   :  { %v1148_v53 = vmul.f32 %v2496_v48, %v1147_v50 }
 0x9a2   :  { %v1142_v56 = vsel %vm1141_vm2, %v1132_v36, %v1140_v52 }
 0x9a3   :  { %v1145_v55 = vsel %vm1143_vm3, %v1144_v54, %v1142_v56  ;;  %v1149_v6 = vmul.f32 0.5, %v1148_v53 }
 0x9a4   :  { %2497 = vrcp.f32 %v1145_v55  ;;  %v1169_v7 = vand.u32 2147483648, %v1145_v55  ;;  %v1167_v24 = vand.u32 2147483647, %v1145_v55  ;;  %vm1163_vm9 = vweird.f32 %v1145_v55 }
 0x9a5   :  { %v1150_v59 = vsub.f32 1.5, %v1149_v6 }
 0x9a6   :  { %v1170_v11 = vor.u32 1.1754944e-38, %v1169_v7  ;;  %vm1168_vm11 = vcmp.eq.f32.partialorder %v1167_v24, 8.507059e+37 }
 0x9a7   :  { %v1151_v60 = vmul.f32 %v2496_v48, %v1150_v59 }
 0x9a9   :  { %v1152_v51 = vmul.f32 %v1151_v60, %v1133_v40 }
 0x9aa   :  { %v2498_v35 = vpop.eup %2497 }
 0x9ab   :  { %v1159_v63 = vmul.f32 %v2498_v35, %v1145_v55  ;;  %v1154_v2 = vsel %vm1153_vm4, %v1133_v40, %v1152_v51  ;;  %vm1164_vm8 = vweird.f32 %v2498_v35 }
 0x9ac   :  { %v1157_v62 = vsel %vm1155_vm7, %v1156_v61, %v1154_v2  ;;  %vm1165_vm10 = vmor %vm1163_vm9, %vm1164_vm8 }
 0x9ad   :  { %v1160_v5 = vsub.f32 1.0, %v1159_v63  ;;  %2499 = vrcp.f32 %v1157_v62  ;;  %v1184_v41 = vand.u32 2147483648, %v1157_v62  ;;  %v1182_v25 = vand.u32 2147483647, %v1157_v62 }
 0x9ae   :  { %vm1178_vm13 = vweird.f32 %v1157_v62 }
 0x9af   :  { %v1161_v4 = vmul.f32 %v2498_v35, %v1160_v5  ;;  %v1185_v26 = vor.u32 1.1754944e-38, %v1184_v41  ;;  %vm1183_vm0 = vcmp.eq.f32.partialorder %v1182_v25, 8.507059e+37 }
 0x9b1   :  { %v1162_v9 = vadd.f32 %v2498_v35, %v1161_v4 }
 0x9b3   :  { %v2500_v12 = vpop.eup %2499  ;;  %v1166_v14 = vsel %vm1165_vm10, %v2498_v35, %v1162_v9 }
 0x9b4   :  { %v1171_v19 = vsel %vm1168_vm11, %v1170_v11, %v1166_v14  ;;  %v1174_v57 = vmul.f32 %v2500_v12, %v1157_v62  ;;  %vm1179_vm12 = vweird.f32 %v2500_v12 }
 0x9b5   :  { %v1172_v22 = vmul.f32 %v1171_v19, %v1130_v3  ;;  %vm1180_vm14 = vmor %vm1178_vm13, %vm1179_vm12 }
 0x9b6   :  { %v1175_v1 = vsub.f32 1.0, %v1174_v57 }
 0x9b7   :  { %v1189_v43 = vadd.f32 %v2431_v16, %v1172_v22 }
 0x9b8   :  { %v1176_v37 = vmul.f32 %v2500_v12, %v1175_v1 }
 0x9b9   :  { %2304 = vmatmul.msk.f32.vlgmr.msrb.gmra.mxu2 %vm139_vm6, %v1189_v43 }
 0x9ba   :  { %v1177_v46 = vadd.f32 %v2500_v12, %v1176_v37 }
 0x9bc   :  { %v1181_v27 = vsel %vm1180_vm14, %v2500_v12, %v1177_v46 }
 0x9bd   :  { %v1186_v28 = vsel %vm1183_vm0, %v1185_v26, %v1181_v27 }
 0x9be   :  { %v1187_v29 = vmul.f32 %v1186_v28, %v1131_v10 }
 0x9c0   :  { %v1190_v30 = vadd.f32 %v2431_v16, %v1187_v29 }
 0x9c2   :  { %2305 = vmatmul.msk.f32.gmra.mxu2 %vm139_vm6, %v1190_v30 }
 0xa3c   :  { %v1220_v32 = vpop.f32.mrf.mxu2 }
 0xa3d   :  { %v3027_v34 = vadd.f32 %v2432_v31, %v1220_v32 }
 0xa3f   :  { %1354 = vrot.lane.b32.xlu0 %v3027_v34, %s2647_s29  ;;  %1228 = vrot.lane.b32.xlu2 %v3027_v34, %s2645_s0 }
 0xa45   :  { %v1223_v36 = vpop.f32.mrf.mxu2 }
 0xa46   :  { %v3033_v33 = vadd.f32 %v2432_v31, %v1223_v36 }
 0xa48   :  { %1482 = vrot.lane.b32.xlu2 %v3033_v33, %s2633_s21  ;;  %1356 = vrot.lane.b32.xlu1 %v3033_v33, %s2647_s29  ;;  %v3095_v10 = vpack.i.bf16 %v3027_v34, %v3033_v33 }
 0xa49   :  { %1230 = vrot.lane.b32.xlu0 %v3033_v33, %s2645_s0 }
 0xa50   :  { %1606 = vrot.lane.b32.xlu2 %v3027_v34, %s2648_s30  ;;  %1350 = vrot.lane.b32.xlu1 %v3027_v34, %s2646_s28 }
 0xa51   :  { %1480 = vrot.lane.b32.xlu0 %v3027_v34, %s2633_s21 }
 0xa58   :  { %1478 = vrot.lane.b32.xlu2 %v3033_v33, %s2649_s4  ;;  %1608 = vrot.lane.b32.xlu1 %v3033_v33, %s2648_s30 }
 0xa59   :  { %1352 = vrot.lane.b32.xlu0 %v3033_v33, %s2646_s28 }
 0xa60   :  { %1476 = vrot.lane.b32.xlu1 %v3027_v34, %s2649_s4 }
 0xa61   :  { %1602 = vrot.lane.b32.xlu0 %v3027_v34, %s2650_s5 }
 0xa68   :  { %1604 = vrot.lane.b32.xlu1 %v3033_v33, %s2650_s5 }
 0xa99   :  { %v1229_v23 = vpop.permute.xlu2 %1228 }
 0xaa2   :  { %v1483_v40 = vpop.permute.xlu2 %1482 }
 0xaaa   :  { %v1607_v47 = vpop.permute.xlu2 %1606 }
 0xab1   :  { %v1355_v20 = vpop.permute.xlu0 %1354 }
 0xab2   :  { %v1479_v54 = vpop.permute.xlu2 %1478 }
 0xaba   :  { %v1357_v38 = vpop.permute.xlu1 %1356 }
 0xabb   :  { %v1231_v39 = vpop.permute.xlu0 %1230  ;;  %2312 = vmatpush.xpose.msk.msra.mxu1 %vm389_vm15, %v1357_v38 }
 0xabc   :  { %2306 = vmatpush.xpose.msk.msrb.mxu3 %vm389_vm15, %v1231_v39 }
 0xabf   :  { %2313 = vmatpush.xpose.msk.msra.mxu1 %vm389_vm15, %v1355_v20 }
 0xac0   :  { %2307 = vmatpush.xpose.msk.msrb.mxu3 %vm389_vm15, %v1229_v23 }
 0xac2   :  { %v1351_v42 = vpop.permute.xlu1 %1350 }
 0xac3   :  { %v1481_v44 = vpop.permute.xlu0 %1480  ;;  %2308 = vmatmul.msk.f32.vlgmr.msrb.gmra.mxu3 %vm389_vm15, %v3027_v34  ;;  %2314 = vmatmul.msk.f32.vlgmr.msra.gmra.mxu1 %vm389_vm15, %v1351_v42 }
 0xac4   :  { %2318 = vmatpush.xpose.msk.msra.mxu3 %vm389_vm15, %v1483_v40 }
 0xac8   :  { %2319 = vmatpush.xpose.msk.msra.mxu3 %vm389_vm15, %v1481_v44 }
 0xaca   :  { %v1609_v45 = vpop.permute.xlu1 %1608 }
 0xacb   :  { %v1353_v48 = vpop.permute.xlu0 %1352  ;;  %2309 = vmatmul.msk.f32.gmra.mxu3 %vm389_vm15, %v3033_v33  ;;  %2324 = vmatpush.xpose.msk.msrb.mxu1 %vm389_vm15, %v1609_v45 }
 0xacc   :  { %2315 = vmatmul.msk.f32.gmra.mxu1 %vm389_vm15, %v1353_v48 }
 0xacf   :  { %2325 = vmatpush.xpose.msk.msrb.mxu1 %vm389_vm15, %v1607_v47 }
 0xad2   :  { %v1477_v50 = vpop.permute.xlu1 %1476 }
 0xad3   :  { %v1603_v52 = vpop.permute.xlu0 %1602  ;;  %2320 = vmatmul.msk.f32.vlgmr.msra.gmra.mxu3 %vm389_vm15, %v1477_v50 }
 0xad4   :  { %2326 = vmatmul.msk.f32.vlgmr.msrb.gmra.mxu1 %vm389_vm15, %v1603_v52 }
 0xada   :  { %v1605_v53 = vpop.permute.xlu1 %1604 }
 0xadb   :  { %2321 = vmatmul.msk.f32.gmra.mxu3 %vm389_vm15, %v1479_v54 }
 0xadc   :  { %2327 = vmatmul.msk.f32.gmra.mxu1 %vm389_vm15, %v1605_v53 }
 0xb40   :  { %v1383_v56 = vpop.f32.mrf.mxu1 }
 0xb41   :  { %v1389_v55 = vmul.f32 0.35355338, %v1383_v56 }
 0xb43   :  { %v1391_v6 = vadd.f32 %v1389_v55, %v2830_v49 }
 0xb45   :  { %v1393_v59 = vsel %vm425_vm5, %v1391_v6, -inf }
 0xb46   :  { %v1257_v60 = vpop.f32.mrf.mxu3  ;;  %1394 = vmax.xlane.f32.xlu0 %v1393_v59 }
 0xb47   :  { %v1263_v51 = vmul.f32 0.35355338, %v1257_v60 }
 0xb49   :  { %v1386_v35 = vpop.f32.mrf.mxu1  ;;  %v1265_v61 = vadd.f32 %v1263_v51, %v2830_v49 }
 0xb4a   :  { %v1390_v63 = vmul.f32 0.35355338, %v1386_v35 }
 0xb4b   :  { %v1267_v2 = vsel %vm425_vm5, %v1265_v61, -inf }
 0xb4c   :  { %1268 = vmax.xlane.f32.xlu2 %v1267_v2  ;;  %v1392_v62 = vadd.f32 %v1390_v63, %v2836_v58 }
 0xb4e   :  { %v1260_v5 = vpop.f32.mrf.mxu3  ;;  %v1396_v7 = vsel %vm425_vm5, %v1392_v62, -inf }
 0xb4f   :  { %v1264_v8 = vmul.f32 0.35355338, %v1260_v5  ;;  %1397 = vmax.xlane.f32.xlu1 %v1396_v7 }
 0xb51   :  { %v1635_v4 = vpop.f32.mrf.mxu1  ;;  %v1266_v24 = vadd.f32 %v1264_v8, %v2836_v58 }
 0xb52   :  { %v1641_v9 = vmul.f32 0.35355338, %v1635_v4 }
 0xb53   :  { %v1270_v11 = vsel %vm425_vm5, %v1266_v24, -inf }
 0xb54   :  { %1271 = vmax.xlane.f32.xlu0 %v1270_v11  ;;  %v1643_v12 = vadd.f32 %v1641_v9, %v2830_v49 }
 0xb56   :  { %v1509_v3 = vpop.f32.mrf.mxu3  ;;  %v1645_v14 = vsel %vm425_vm5, %v1643_v12, -inf }
 0xb57   :  { %v1515_v16 = vmul.f32 0.35355338, %v1509_v3  ;;  %1646 = vmax.xlane.f32.xlu2 %v1645_v14 }
 0xb59   :  { %v1638_v19 = vpop.f32.mrf.mxu1  ;;  %v1517_v57 = vadd.f32 %v1515_v16, %v2830_v49 }
 0xb5a   :  { %v1642_v22 = vmul.f32 0.35355338, %v1638_v19 }
 0xb5b   :  { %v1519_v1 = vsel %vm425_vm5, %v1517_v57, -inf }
 0xb5c   :  { %1520 = vmax.xlane.f32.xlu1 %v1519_v1  ;;  %v1644_v43 = vadd.f32 %v1642_v22, %v2836_v58 }
 0xb5e   :  { %v1648_v41 = vsel %vm425_vm5, %v1644_v43, -inf  ;;  %v1512_v37 = vpop.f32.mrf.mxu3 }
 0xb5f   :  { %1649 = vmax.xlane.f32.xlu0 %v1648_v41  ;;  %v1516_v25 = vmul.f32 0.35355338, %v1512_v37 }
 0xb61   :  { %v1518_v46 = vadd.f32 %v1516_v25, %v2836_v58 }
 0xb63   :  { %v1522_v26 = vsel %vm425_vm5, %v1518_v46, -inf }
 0xb64   :  { %1523 = vmax.xlane.f32.xlu2 %v1522_v26 }
 0xb73   :  { %2407 = vrot.lane.b32.xlu0 %v3095_v10, %s2655_s8 }
 0xb7c   :  { %2402 = vrot.lane.b32.xlu2 %v3095_v10, %s2653_s6 }
 0xbb9   :  { %v1395_v49 = vpop.xlane.xlu0 %1394 }
 0xbba   :  { %v1399_v27 = vsub.f32 %v1391_v6, %v1395_v49 }
 0xbbc   :  { %v1401_v28 = vmul.f32 1.442695, %v1399_v27 }
 0xbbe   :  { %2501 = vpow2.f32 %v1401_v28 }
 0xbbf   :  { %v1269_v29 = vpop.xlane.xlu2 %1268 }
 0xbc0   :  { %v1273_v30 = vsub.f32 %v1265_v61, %v1269_v29 }
 0xbc2   :  { %v1275_v58 = vmul.f32 1.442695, %v1273_v30  ;;  %v1398_v31 = vpop.xlane.xlu1 %1397 }
 0xbc3   :  { %v1400_v32 = vsub.f32 %v1392_v62, %v1398_v31 }
 0xbc4   :  { %v3101_v36 = vpop.eup %2501  ;;  %2503 = vpow2.f32 %v1275_v58 }
 0xbc5   :  { %v1403_v34 = vmul.f32 1.442695, %v1400_v32  ;;  %v1405_v33 = vsel %vm425_vm5, %v3101_v36, 0.0 }
 0xbc6   :  { %1406 = vadd.xlane.f32.xlu1 %v1405_v33 }
 0xbc7   :  { %2505 = vpow2.f32 %v1403_v34  ;;  %v1272_v20 = vpop.xlane.xlu0 %1271 }
 0xbc8   :  { %v1274_v23 = vsub.f32 %v1266_v24, %v1272_v20 }
 0xbca   :  { %v3105_v38 = vpop.eup %2503  ;;  %v1277_v39 = vmul.f32 1.442695, %v1274_v23  ;;  %v1647_v40 = vpop.xlane.xlu2 %1646 }
 0xbcb   :  { %v1651_v42 = vsub.f32 %v1643_v12, %v1647_v40  ;;  %v1279_v44 = vsel %vm425_vm5, %v3105_v38, 0.0 }
 0xbcc   :  { %2507 = vpow2.f32 %v1277_v39  ;;  %1280 = vadd.xlane.f32.xlu0 %v1279_v44 }
 0xbcd   :  { %v3109_v45 = vpop.eup %2505  ;;  %v1653_v48 = vmul.f32 1.442695, %v1651_v42 }
 0xbce   :  { %v1408_v47 = vsel %vm425_vm5, %v3109_v45, 0.0 }
 0xbcf   :  { %2509 = vpow2.f32 %v1653_v48  ;;  %1409 = vadd.xlane.f32.xlu2 %v1408_v47  ;;  %v1521_v50 = vpop.xlane.xlu1 %1520 }
 0xbd0   :  { %v1525_v52 = vsub.f32 %v1517_v57, %v1521_v50 }
 0xbd2   :  { %v3113_v54 = vpop.eup %2507  ;;  %v1527_v53 = vmul.f32 1.442695, %v1525_v52  ;;  %v1650_v56 = vpop.xlane.xlu0 %1649 }
 0xbd3   :  { %v1652_v55 = vsub.f32 %v1644_v43, %v1650_v56  ;;  %v1282_v6 = vsel %vm425_vm5, %v3113_v54, 0.0 }
 0xbd4   :  { %2511 = vpow2.f32 %v1527_v53  ;;  %1283 = vadd.xlane.f32.xlu1 %v1282_v6 }
 0xbd5   :  { %v3117_v59 = vpop.eup %2509  ;;  %v1655_v60 = vmul.f32 1.442695, %v1652_v55 }
 0xbd6   :  { %v1657_v51 = vsel %vm425_vm5, %v3117_v59, 0.0 }
 0xbd7   :  { %1658 = vadd.xlane.f32.xlu0 %v1657_v51  ;;  %v1524_v35 = vpop.xlane.xlu2 %1523  ;;  %2513 = vpow2.f32 %v1655_v60 }
 0xbd8   :  { %v1526_v63 = vsub.f32 %v1518_v46, %v1524_v35 }
 0xbda   :  { %v3121_v61 = vpop.eup %2511  ;;  %v1529_v62 = vmul.f32 1.442695, %v1526_v63 }
 0xbdb   :  { %v1531_v2 = vsel %vm425_vm5, %v3121_v61, 0.0 }
 0xbdc   :  { %1532 = vadd.xlane.f32.xlu1 %v1531_v2  ;;  %2515 = vpow2.f32 %v1529_v62 }
 0xbdd   :  { %v3125_v7 = vpop.eup %2513 }
 0xbde   :  { %v1660_v24 = vsel %vm425_vm5, %v3125_v7, 0.0 }
 0xbdf   :  { %v2403_v5 = vpop.permute.xlu2 %2402 }
 0xbe0   :  { %v2404_v8 = vunpack.i.l.bf16 %v2403_v5  ;;  %v2405_v4 = vunpack.i.h.bf16 %v2403_v5 }
 0xbe2   :  { %1467 = vmatpush.msra.mxu2 %v2404_v8  ;;  %v3131_v12 = vpop.eup %2515 }
 0xbe3   :  { %v1534_v14 = vsel %vm425_vm5, %v3131_v12, 0.0 }
 0xbe4   :  { %1661 = vadd.xlane.f32.xlu1 %v1660_v24  ;;  %1468 = vmatpush.msra.mxu2 %v2405_v4 }
 0xbe5   :  { %v2408_v9 = vpop.permute.xlu0 %2407 }
 0xbe6   :  { %v2409_v11 = vunpack.i.l.bf16 %v2408_v9  ;;  %v2410_v3 = vunpack.i.h.bf16 %v2408_v9 }
 0xbe7   :  { %2412 = vrot.lane.b32.xlu2 %v3095_v10, %s2654_s7 }
 0xbe8   :  { %1341 = vmatpush.msra.mxu0 %v2409_v11 }
 0xbea   :  { %1342 = vmatpush.msra.mxu0 %v2410_v3 }
 0xbeb   :  { %2417 = vrot.lane.b32.xlu0 %v3095_v10, %s2656_s9 }
 0xbec   :  { %1535 = vadd.xlane.f32.xlu1 %v1534_v14 }
 0xc39   :  { %v1407_v16 = vpop.xlane.xlu1 %1406 }
 0xc3a   :  { %2517 = vrcp.f32 %v1407_v16  ;;  %v1422_v41 = vand.u32 2147483648, %v1407_v16  ;;  %v1420_v25 = vand.u32 2147483647, %v1407_v16  ;;  %vm1416_vm3 = vweird.f32 %v1407_v16 }
 0xc3c   :  { %v1423_v27 = vor.u32 1.1754944e-38, %v1422_v41  ;;  %vm1421_vm7 = vcmp.eq.f32.partialorder %v1420_v25, 8.507059e+37 }
 0xc3f   :  { %v1281_v19 = vpop.xlane.xlu0 %1280 }
 0xc40   :  { %v2518_v57 = vpop.eup %2517  ;;  %2519 = vrcp.f32 %v1281_v19  ;;  %v1296_v58 = vand.u32 2147483648, %v1281_v19  ;;  %v1294_v23 = vand.u32 2147483647, %v1281_v19  ;;  %vm1290_vm9 = vweird.f32 %v1281_v19 }
 0xc41   :  { %v1412_v22 = vmul.f32 %v2518_v57, %v1407_v16  ;;  %vm1417_vm2 = vweird.f32 %v2518_v57 }
 0xc42   :  { %v1410_v1 = vpop.xlane.xlu2 %1409  ;;  %vm1418_vm4 = vmor %vm1416_vm3, %vm1417_vm2  ;;  %v1297_v44 = vor.u32 1.1754944e-38, %v1296_v58  ;;  %vm1295_vm11 = vcmp.eq.f32.partialorder %v1294_v23, 8.507059e+37 }
 0xc43   :  { %v1413_v43 = vsub.f32 1.0, %v1412_v22  ;;  %2521 = vrcp.f32 %v1410_v1  ;;  %v1437_v52 = vand.u32 2147483648, %v1410_v1  ;;  %v1435_v56 = vand.u32 2147483647, %v1410_v1 }
 0xc44   :  { %vm1431_vm13 = vweird.f32 %v1410_v1 }
 0xc45   :  { %v1414_v37 = vmul.f32 %v2518_v57, %v1413_v43  ;;  %v1438_v62 = vor.u32 1.1754944e-38, %v1437_v52  ;;  %vm1436_vm0 = vcmp.eq.f32.partialorder %v1435_v56, 8.507059e+37 }
 0xc46   :  { %v2520_v46 = vpop.eup %2519 }
 0xc47   :  { %v1415_v26 = vadd.f32 %v2518_v57, %v1414_v37  ;;  %v1286_v10 = vmul.f32 %v2520_v46, %v1281_v19  ;;  %v3137_v49 = vpop.xlane.xlu1 %1283  ;;  %vm1291_vm8 = vweird.f32 %v2520_v46 }
 0xc48   :  { %2523 = vrcp.f32 %v3137_v49  ;;  %vm1292_vm10 = vmor %vm1290_vm9, %vm1291_vm8  ;;  %v1311_v4 = vand.u32 2147483648, %v3137_v49  ;;  %v1309_v3 = vand.u32 2147483647, %v3137_v49  ;;  %vm1305_vm3 = vweird.f32 %v3137_v49 }
 0xc49   :  { %v2522_v28 = vpop.eup %2521  ;;  %v1419_v29 = vsel %vm1418_vm4, %v2518_v57, %v1415_v26  ;;  %v1287_v30 = vsub.f32 1.0, %v1286_v10 }
 0xc4a   :  { %v1424_v31 = vsel %vm1421_vm7, %v1423_v27, %v1419_v29  ;;  %v1427_v32 = vmul.f32 %v2522_v28, %v1410_v1  ;;  %v3140_v34 = vpop.xlane.xlu0 %1658  ;;  %v2413_v33 = vpop.permute.xlu2 %2412  ;;  %vm1432_vm12 = vweird.f32 %v2522_v28  ;;  %v1312_v1 = vor.u32 1.1754944e-38, %v1311_v4 }
 0xc4b   :  { %v1288_v20 = vmul.f32 %v2520_v46, %v1287_v30  ;;  %2525 = vrcp.f32 %v3140_v34  ;;  %v2414_v40 = vunpack.i.l.bf16 %v2413_v33  ;;  %v1425_v48 = vmul.f32 %v3101_v36, %v1424_v31  ;;  %vm1433_vm14 = vmor %vm1431_vm13, %vm1432_vm12 }
 0xc4c   :  { %v1428_v39 = vsub.f32 1.0, %v1427_v32  ;;  %v2415_v53 = vunpack.i.h.bf16 %v2413_v33  ;;  %v1672_v22 = vand.u32 2147483647, %v3140_v34  ;;  %vm1668_vm8 = vweird.f32 %v3140_v34 }
 0xc4d   :  { %v1289_v42 = vadd.f32 %v2520_v46, %v1288_v20  ;;  %1719 = vmatpush.msrb.mxu2 %v2414_v40  ;;  %vm1310_vm9 = vcmp.eq.f32.partialorder %v1309_v3, 8.507059e+37 }
 0xc4e   :  { %v2524_v47 = vpop.eup %2523  ;;  %v1429_v50 = vmul.f32 %v2522_v28, %v1428_v39  ;;  %2316 = vmatmul.msk.f32.vlgmr.msra.gmra.mxu2 %vm425_vm5, %v1425_v48 }
 0xc4f   :  { %v1293_v55 = vsel %vm1292_vm10, %v2520_v46, %v1289_v42  ;;  %v1301_v6 = vmul.f32 %v2524_v47, %v3137_v49  ;;  %v3146_v60 = vpop.xlane.xlu1 %1532  ;;  %1720 = vmatpush.msrb.mxu2 %v2415_v53  ;;  %vm1306_vm2 = vweird.f32 %v2524_v47 }
 0xc50   :  { %v1298_v51 = vsel %vm1295_vm11, %v1297_v44, %v1293_v55  ;;  %2527 = vrcp.f32 %v3146_v60  ;;  %v1430_v2 = vadd.f32 %v2522_v28, %v1429_v50  ;;  %vm1307_vm7 = vmor %vm1305_vm3, %vm1306_vm2  ;;  %vm1673_vm11 = vcmp.eq.f32.partialorder %v1672_v22, 8.507059e+37  ;;  %v1758_v22 = vld [vmem:[#allocation2 + $0x28] sm:$0xff] }
 0xc51   :  { %v2526_v36 = vpop.eup %2525  ;;  %v1302_v35 = vsub.f32 1.0, %v1301_v6  ;;  %v1299_v63 = vmul.f32 %v3105_v38, %v1298_v51  ;;  %v1674_v38 = vand.u32 2147483648, %v3140_v34  ;;  %v1548_v49 = vand.u32 2147483648, %v3146_v60 }
 0xc52   :  { %v1664_v5 = vmul.f32 %v2526_v36, %v3140_v34  ;;  %v1434_v24 = vsel %vm1433_vm14, %v2522_v28, %v1430_v2  ;;  %vm1669_vm4 = vweird.f32 %v2526_v36  ;;  %v1546_v30 = vand.u32 2147483647, %v3146_v60 }
 0xc53   :  { %v1303_v8 = vmul.f32 %v2524_v47, %v1302_v35  ;;  %2310 = vmatmul.msk.f32.vlgmr.msra.gmra.mxu0 %vm425_vm5, %v1299_v63  ;;  %v1439_v11 = vsel %vm1436_vm0, %v1438_v62, %v1434_v24  ;;  %vm1670_vm10 = vmor %vm1668_vm8, %vm1669_vm4  ;;  %vm1542_vm13 = vweird.f32 %v3146_v60  ;;  %v1549_v33 = vor.u32 1.1754944e-38, %v1548_v49 }
 0xc54   :  { %v1665_v9 = vsub.f32 1.0, %v1664_v5  ;;  %v1440_v14 = vmul.f32 %v3109_v45, %v1439_v11  ;;  %v1675_v45 = vor.u32 1.1754944e-38, %v1674_v38  ;;  %vm1547_vm0 = vcmp.eq.f32.partialorder %v1546_v30, 8.507059e+37 }
 0xc55   :  { %v1304_v16 = vadd.f32 %v2524_v47, %v1303_v8 }
 0xc56   :  { %v2528_v19 = vpop.eup %2527  ;;  %v1666_v57 = vmul.f32 %v2526_v36, %v1665_v9  ;;  %2317 = vmatmul.msk.f32.gmra.mxu2 %vm425_vm5, %v1440_v14 }
 0xc57   :  { %v1538_v43 = vmul.f32 %v2528_v19, %v3146_v60  ;;  %v1662_v41 = vpop.xlane.xlu1 %1661  ;;  %v1308_v37 = vsel %vm1307_vm7, %v2524_v47, %v1304_v16  ;;  %vm1543_vm12 = vweird.f32 %v2528_v19 }
 0xc58   :  { %v1667_v25 = vadd.f32 %v2526_v36, %v1666_v57  ;;  %2529 = vrcp.f32 %v1662_v41  ;;  %v1313_v26 = vsel %vm1310_vm9, %v1312_v1, %v1308_v37  ;;  %vm1544_vm14 = vmor %vm1542_vm13, %vm1543_vm12  ;;  %v1689_v48 = vand.u32 2147483648, %v1662_v41  ;;  %v1759_v57 = vld [vmem:[#allocation2 + $0x78] sm:$0xff] }
 0xc59   :  { %v1539_v46 = vsub.f32 1.0, %v1538_v43  ;;  %v1314_v27 = vmul.f32 %v3113_v54, %v1313_v26  ;;  %v1687_v50 = vand.u32 2147483647, %v1662_v41  ;;  %vm1683_vm3 = vweird.f32 %v1662_v41 }
 0xc5a   :  { %v1671_v10 = vsel %vm1670_vm10, %v2526_v36, %v1667_v25  ;;  %v1690_v56 = vor.u32 1.1754944e-38, %v1689_v48 }
 0xc5b   :  { %v1676_v28 = vsel %vm1673_vm11, %v1675_v45, %v1671_v10  ;;  %v1540_v29 = vmul.f32 %v2528_v19, %v1539_v46  ;;  %2311 = vmatmul.msk.f32.gmra.mxu0 %vm425_vm5, %v1314_v27  ;;  %vm1688_vm7 = vcmp.eq.f32.partialorder %v1687_v50, 8.507059e+37  ;;  %v1882_v50 = vld [vmem:[#allocation2 + $0x120] sm:$0xff] }
 0xc5c   :  { %v1677_v58 = vmul.f32 %v3117_v59, %v1676_v28 }
 0xc5d   :  { %v1541_v31 = vadd.f32 %v2528_v19, %v1540_v29  ;;  %v2418_v32 = vpop.permute.xlu0 %2417  ;;  %v2433_v29 = vld [vmem:[#allocation5 + $0x90] ss:$0 sm:$0xff] }
 0xc5e   :  { %v2530_v34 = vpop.eup %2529  ;;  %v2419_v20 = vunpack.i.l.bf16 %v2418_v32  ;;  %2328 = vmatmul.msk.f32.vlgmr.msrb.gmra.mxu2 %vm425_vm5, %v1677_v58  ;;  %v2420_v42 = vunpack.i.h.bf16 %v2418_v32 }
 0xc5f   :  { %v1545_v23 = vsel %vm1544_vm14, %v2528_v19, %v1541_v31  ;;  %v1679_v54 = vmul.f32 %v2530_v34, %v1662_v41  ;;  %v1536_v39 = vpop.xlane.xlu1 %1535  ;;  %vm1684_vm2 = vweird.f32 %v2530_v34  ;;  %v1760_v19 = vld [vmem:[#allocation2 + $0xc8] sm:$0xff] }
 0xc60   :  { %v1550_v40 = vsel %vm1547_vm0, %v1549_v33, %v1545_v23  ;;  %1593 = vmatpush.msrb.mxu0 %v2419_v20  ;;  %2531 = vrcp.f32 %v1536_v39  ;;  %vm1685_vm4 = vmor %vm1683_vm3, %vm1684_vm2  ;;  %v1561_v63 = vand.u32 2147483647, %v1536_v39  ;;  %vm1557_vm9 = vweird.f32 %v1536_v39 }
 0xc61   :  { %v1680_v44 = vsub.f32 1.0, %v1679_v54  ;;  %v1551_v59 = vmul.f32 %v3121_v61, %v1550_v40  ;;  %v1563_v61 = vand.u32 2147483648, %v1536_v39 }
 0xc62   :  { %1594 = vmatpush.msrb.mxu0 %v2420_v42  ;;  %vm1562_vm11 = vcmp.eq.f32.partialorder %v1561_v63, 8.507059e+37 }
 0xc63   :  { %v1681_v47 = vmul.f32 %v2530_v34, %v1680_v44  ;;  %2322 = vmatmul.msk.f32.vlgmr.msrb.gmra.mxu0 %vm425_vm5, %v1551_v59  ;;  %v1564_v62 = vor.u32 1.1754944e-38, %v1563_v61 }
 0xc64   :  { %1903 = vmatpush.msra.mxu0 %v1882_v50 }
 0xc65   :  { %v1682_v52 = vadd.f32 %v2530_v34, %v1681_v47 }
 0xc66   :  { %v2532_v53 = vpop.eup %2531 }
 0xc67   :  { %v1553_v55 = vmul.f32 %v2532_v53, %v1536_v39  ;;  %v1686_v6 = vsel %vm1685_vm4, %v2530_v34, %v1682_v52  ;;  %vm1558_vm8 = vweird.f32 %v2532_v53  ;;  %v1881_v52 = vld [vmem:[#allocation2 + $0xd0] sm:$0xff] }
 0xc68   :  { %v1691_v60 = vsel %vm1688_vm7, %v1690_v56, %v1686_v6  ;;  %vm1559_vm10 = vmor %vm1557_vm9, %vm1558_vm8  ;;  %1904 = vmatpush.msra.mxu0 %v1881_v52  ;;  %v1879_v6 = vld [vmem:[#allocation2 + $0x30] sm:$0xff] }
 0xc69   :  { %v1554_v51 = vsub.f32 1.0, %v1553_v55  ;;  %v1692_v36 = vmul.f32 %v3125_v7, %v1691_v60 }
 0xc6b   :  { %v1555_v35 = vmul.f32 %v2532_v53, %v1554_v51  ;;  %2329 = vmatmul.msk.f32.gmra.mxu2 %vm425_vm5, %v1692_v36 }
 0xc6d   :  { %v1556_v2 = vadd.f32 %v2532_v53, %v1555_v35 }
 0xc6f   :  { %v1560_v5 = vsel %vm1559_vm10, %v2532_v53, %v1556_v2  ;;  %v1880_v53 = vld [vmem:[#allocation2 + $0x80] sm:$0xff] }
 0xc70   :  { %v1565_v8 = vsel %vm1562_vm11, %v1564_v62, %v1560_v5  ;;  %1905 = vmatpush.msra.mxu0 %v1880_v53 }
 0xc71   :  { %v1566_v4 = vmul.f32 %v3131_v12, %v1565_v8  ;;  %v1761_v12 = vld [vmem:[#allocation2 + $0x118] sm:$0xff] }
 0xc72   :  { %1782 = vmatpush.msrb.mxu3 %v1761_v12  ;;  %1906 = vmatpush.msra.mxu0 %v1879_v6  ;;  %v2436_v6 = vld [vmem:[#allocation5 + $0xa8] ss:$0 sm:$0xff] }
 0xc73   :  { %2323 = vmatmul.msk.f32.gmra.mxu0 %vm425_vm5, %v1566_v4 }
 0xc74   :  { %1783 = vmatpush.msrb.mxu3 %v1760_v19  ;;  %v1918_v19 = vld [vmem:[#allocation2 + $0xd8] sm:$0xff] }
 0xc76   :  { %1784 = vmatpush.msrb.mxu3 %v1759_v57 }
 0xc78   :  { %1785 = vmatpush.msrb.mxu3 %v1758_v22 }
 0xcd0   :  { %v1344_v24 = vpop.f32.mrf.mxu0 }
 0xcd1   :  { %v1470_v9 = vpop.f32.mrf.mxu2 }
 0xcd2   :  { %1730 = vrot.lane.b32.xlu1 %v1470_v9, %s2636_s25 }
 0xcd8   :  { %v1347_v7 = vpop.f32.mrf.mxu0 }
 0xcd9   :  { %v1473_v11 = vpop.f32.mrf.mxu2 }
 0xce0   :  { %v1596_v3 = vpop.f32.mrf.mxu0 }
 0xce1   :  { %v1722_v38 = vpop.f32.mrf.mxu2  ;;  %1738 = vrot.lane.b32.xlu2 %v1596_v3, %s2658_s11 }
 0xce2   :  { %1746 = vrot.lane.b32.xlu0 %v1722_v38, %s2657_s10 }
 0xce9   :  { %1732 = vrot.lane.b32.xlu2 %v1473_v11, %s2636_s25 }
 0xcee   :  { %v1725_v16 = vpop.f32.mrf.mxu2 }
 0xcf0   :  { %v1599_v14 = vpop.f32.mrf.mxu0 }
 0xcf1   :  { %1740 = vrot.lane.b32.xlu0 %v1599_v14, %s2658_s11  ;;  %1748 = vrot.lane.b32.xlu2 %v1725_v16, %s2657_s10  ;;  %v1919_v14 = vld [vmem:[#allocation2 + $0x128] sm:$0xff] }
 0xcf2   :  { %1934 = vmatpush.xpose.msra.mxu1 %v1919_v14 }
 0xcf6   :  { %1935 = vmatpush.xpose.msra.mxu1 %v1918_v19 }
 0xd3b   :  { %v1739_v43 = vpop.permute.xlu2 %1738 }
 0xd43   :  { %v1733_v46 = vpop.permute.xlu2 %1732 }
 0xd44   :  { %v1731_v1 = vpop.permute.xlu1 %1730  ;;  %v1753_v26 = vsel %vm389_vm15, %v1347_v7, %v1733_v46 }
 0xd45   :  { %v1752_v41 = vsel %vm389_vm15, %v1344_v24, %v1731_v1 }
 0xd46   :  { %v1754_v37 = vsel %vm425_vm5, %v1752_v41, %v1739_v43 }
 0xd4b   :  { %v1749_v49 = vpop.permute.xlu2 %1748 }
 0xd54   :  { %v1747_v25 = vpop.permute.xlu0 %1746 }
 0xd55   :  { %v1756_v45 = vsel %vm915_vm1, %v1754_v37, %v1747_v25  ;;  %v1917_v37 = vld [vmem:[#allocation2 + $0x88] sm:$0xff]  ;;  %v2434_v25 = vld [vmem:[#allocation5 + $0x98] ss:$0 sm:$0xff] }
 0xd56   :  { %2330 = vmatmul.msk.f32.vlgmr.msrb.gmra.mxu3 %vm139_vm6, %v1756_v45  ;;  %1936 = vmatpush.xpose.msra.mxu1 %v1917_v37 }
 0xd63   :  { %v1741_v10 = vpop.permute.xlu0 %1740 }
 0xd64   :  { %v1755_v27 = vsel %vm425_vm5, %v1753_v26, %v1741_v10 }
 0xd65   :  { %v1757_v28 = vsel %vm915_vm1, %v1755_v27, %v1749_v49 }
 0xd66   :  { %2331 = vmatmul.msk.f32.gmra.mxu3 %vm139_vm6, %v1757_v28 }
 0xdd9   :  { %v1787_v30 = vpop.f32.mrf.mxu3 }
 0xdda   :  { %v1788_v58 = vadd.f32 %v2433_v29, %v1787_v30 }
 0xddc   :  { %v3189_v31 = vadd.f32 %v1788_v58, %v2998_v15 }
 0xdde   :  { %v1797_v32 = vsel %vm139_vm6, %v3189_v31, 0.0 }
 0xddf   :  { %1798 = vadd.xlane.f32.xlu0 %v1797_v32  ;;  %v2435_v32 = vld [vmem:[#allocation5 + $0xa0] ss:$0 sm:$0xff] }
 0xde9   :  { %v1790_v34 = vpop.f32.mrf.mxu3 }
 0xdea   :  { %v1791_v33 = vadd.f32 %v2433_v29, %v1790_v34 }
 0xdec   :  { %v3194_v20 = vadd.f32 %v1791_v33, %v3003_v21 }
 0xdee   :  { %v1800_v23 = vsel %vm139_vm6, %v3194_v20, 0.0 }
 0xdef   :  { %1801 = vadd.xlane.f32.xlu1 %v1800_v23 }
 0xe52   :  { %v1799_v54 = vpop.xlane.xlu0 %1798 }
 0xe53   :  { %v1803_v39 = vmul.f32 %v1799_v54, %v2747_v0 }
 0xe55   :  { %v3200_v40 = vsub.f32 %v3189_v31, %v1803_v39 }
 0xe57   :  { %v1807_v15 = vmul.f32 %v3200_v40, %v3200_v40  ;;  %v1818_v30 = vmul.f32 %v2434_v25, %v3200_v40 }
 0xe59   :  { %v1809_v42 = vsel %vm139_vm6, %v1807_v15, 0.0 }
 0xe5a   :  { %1810 = vadd.xlane.f32.xlu2 %v1809_v42 }
 0xe62   :  { %v1802_v44 = vpop.xlane.xlu1 %1801 }
 0xe63   :  { %v1804_v21 = vmul.f32 %v1802_v44, %v2747_v0 }
 0xe65   :  { %v3207_v59 = vsub.f32 %v3194_v20, %v1804_v21 }
 0xe67   :  { %v1808_v48 = vmul.f32 %v3207_v59, %v3207_v59 }
 0xe69   :  { %v1812_v47 = vsel %vm139_vm6, %v1808_v48, 0.0 }
 0xe6a   :  { %1813 = vadd.xlane.f32.xlu0 %v1812_v47  ;;  %v1819_v47 = vmul.f32 %v2434_v25, %v3207_v59 }
 0xecd   :  { %v1811_v56 = vpop.xlane.xlu2 %1810 }
 0xece   :  { %v1815_v55 = vmul.f32 %v1811_v56, %v2747_v0 }
 0xed0   :  { %v1820_v60 = vadd.f32 1e-05, %v1815_v55  ;;  %v1916_v55 = vld [vmem:[#allocation2 + $0x38] sm:$0xff] }
 0xed1   :  { %1937 = vmatpush.xpose.msra.mxu1 %v1916_v55 }
 0xed2   :  { %2533 = vrsqrt.f32 %v1820_v60  ;;  %vm1829_vm15 = vcmp.eq.f32.partialorder %v1820_v60, inf  ;;  %v1832_v24 = vand.u32 2147483648, %v1820_v60  ;;  %vm1831_vm1 = vcmp.eq.f32.partialorder %v1820_v60, 0.0 }
 0xed8   :  { %v2534_v51 = vpop.eup %2533 }
 0xed9   :  { %v1823_v36 = vmul.f32 %v2534_v51, %v1820_v60 }
 0xedb   :  { %v1824_v61 = vmul.f32 %v2534_v51, %v1823_v36 }
 0xedd   :  { %v1814_v35 = vpop.xlane.xlu0 %1813  ;;  %v1825_v63 = vmul.f32 0.5, %v1824_v61 }
 0xede   :  { %v1816_v2 = vmul.f32 %v1814_v35, %v2747_v0 }
 0xedf   :  { %v1826_v62 = vsub.f32 1.5, %v1825_v63 }
 0xee0   :  { %v1821_v5 = vadd.f32 1e-05, %v1816_v2  ;;  %v2437_v2 = vld [vmem:[#allocation5 + $0xb0] ss:$0 sm:$0xff] }
 0xee1   :  { %v1827_v8 = vmul.f32 %v2534_v51, %v1826_v62 }
 0xee2   :  { %2535 = vrsqrt.f32 %v1821_v5  ;;  %vm1841_vm13 = vcmp.eq.f32.partialorder %v1821_v5, inf  ;;  %v1844_v10 = vand.u32 2147483648, %v1821_v5  ;;  %vm1843_vm0 = vcmp.eq.f32.partialorder %v1821_v5, 0.0 }
 0xee3   :  { %v1828_v4 = vmul.f32 %v1827_v8, %v1820_v60 }
 0xee5   :  { %v1830_v9 = vsel %vm1829_vm15, %v1820_v60, %v1828_v4 }
 0xee6   :  { %v1833_v7 = vsel %vm1831_vm1, %v1832_v24, %v1830_v9 }
 0xee7   :  { %2537 = vrcp.f32 %v1833_v7  ;;  %v1857_v41 = vand.u32 2147483648, %v1833_v7  ;;  %v1855_v46 = vand.u32 2147483647, %v1833_v7  ;;  %vm1851_vm14 = vweird.f32 %v1833_v7 }
 0xee8   :  { %v2536_v11 = vpop.eup %2535 }
 0xee9   :  { %v1835_v3 = vmul.f32 %v2536_v11, %v1821_v5  ;;  %v1858_v28 = vor.u32 1.1754944e-38, %v1857_v41  ;;  %vm1856_vm3 = vcmp.eq.f32.partialorder %v1855_v46, 8.507059e+37 }
 0xeeb   :  { %v1836_v38 = vmul.f32 %v2536_v11, %v1835_v3 }
 0xeed   :  { %v1837_v16 = vmul.f32 0.5, %v1836_v38  ;;  %v2538_v12 = vpop.eup %2537 }
 0xeee   :  { %v1847_v57 = vmul.f32 %v2538_v12, %v1833_v7  ;;  %vm1852_vm12 = vweird.f32 %v2538_v12 }
 0xeef   :  { %v1838_v22 = vsub.f32 1.5, %v1837_v16  ;;  %vm1853_vm2 = vmor %vm1851_vm14, %vm1852_vm12 }
 0xef0   :  { %v1848_v1 = vsub.f32 1.0, %v1847_v57 }
 0xef1   :  { %v1839_v43 = vmul.f32 %v2536_v11, %v1838_v22 }
 0xef2   :  { %v1849_v45 = vmul.f32 %v2538_v12, %v1848_v1 }
 0xef3   :  { %v1840_v26 = vmul.f32 %v1839_v43, %v1821_v5 }
 0xef4   :  { %v1850_v49 = vadd.f32 %v2538_v12, %v1849_v45 }
 0xef5   :  { %v1842_v27 = vsel %vm1841_vm13, %v1821_v5, %v1840_v26 }
 0xef6   :  { %v1845_v29 = vsel %vm1843_vm0, %v1844_v10, %v1842_v27  ;;  %v1854_v58 = vsel %vm1853_vm2, %v2538_v12, %v1850_v49 }
 0xef7   :  { %2539 = vrcp.f32 %v1845_v29  ;;  %v1859_v34 = vsel %vm1856_vm3, %v1858_v28, %v1854_v58  ;;  %v1872_v42 = vand.u32 2147483648, %v1845_v29  ;;  %v1870_v21 = vand.u32 2147483647, %v1845_v29 }
 0xef8   :  { %v1860_v33 = vmul.f32 %v1859_v34, %v1818_v30  ;;  %vm1866_vm7 = vweird.f32 %v1845_v29 }
 0xef9   :  { %v1873_v40 = vor.u32 1.1754944e-38, %v1872_v42  ;;  %vm1871_vm9 = vcmp.eq.f32.partialorder %v1870_v21, 8.507059e+37 }
 0xefa   :  { %v1877_v23 = vadd.f32 %v2435_v32, %v1860_v33 }
 0xefc   :  { %2332 = vmatmul.msk.f32.vlgmr.msra.gmra.mxu0 %vm139_vm6, %v1877_v23 }
 0xefd   :  { %v2540_v54 = vpop.eup %2539 }
 0xefe   :  { %v1862_v39 = vmul.f32 %v2540_v54, %v1845_v29  ;;  %vm1867_vm4 = vweird.f32 %v2540_v54 }
 0xeff   :  { %vm1868_vm8 = vmor %vm1866_vm7, %vm1867_vm4 }
 0xf00   :  { %v1863_v15 = vsub.f32 1.0, %v1862_v39 }
 0xf02   :  { %v1864_v44 = vmul.f32 %v2540_v54, %v1863_v15  ;;  %v2064_v15 = vld [vmem:[#allocation2 + $0x130] sm:$0xff] }
 0xf03   :  { %2082 = vmatpush.msra.mxu3 %v2064_v15 }
 0xf04   :  { %v1865_v48 = vadd.f32 %v2540_v54, %v1864_v44  ;;  %v2062_v44 = vld [vmem:[#allocation2 + $0x90] sm:$0xff] }
 0xf06   :  { %v1869_v50 = vsel %vm1868_vm8, %v2540_v54, %v1865_v48 }
 0xf07   :  { %v1874_v52 = vsel %vm1871_vm9, %v1873_v40, %v1869_v50 }
 0xf08   :  { %v1875_v53 = vmul.f32 %v1874_v52, %v1819_v47 }
 0xf0a   :  { %v1878_v56 = vadd.f32 %v2435_v32, %v1875_v53  ;;  %v223_v53 = vshrl.u32 %v49_v13, 7 }
 0xf0c   :  { %2333 = vmatmul.msk.f32.gmra.mxu0 %vm139_vm6, %v1878_v56 }
 0xf79   :  { %v1908_v60 = vpop.f32.mrf.mxu0 }
 0xf7a   :  { %v1909_v51 = vadd.f32 %v2436_v6, %v1908_v60 }
 0xf7c   :  { %v1914_v36 = vmax.f32 %v1909_v51, 0.0 }
 0xf7e   :  { %1938 = vmatmul.f32.vlgmr.msra.gmra.mxu1 %v1914_v36 }
 0xf89   :  { %v1911_v61 = vpop.f32.mrf.mxu0 }
 0xf8a   :  { %v1912_v35 = vadd.f32 %v2436_v6, %v1911_v61  ;;  %v2033_v6 = vadd.s32 1, %v223_v53 }
 0xf8c   :  { %v1915_v63 = vmax.f32 %v1912_v35, 0.0 }
 0xf8e   :  { %1941 = vmatmul.f32.gmra.mxu1 %v1915_v63  ;;  %v2438_v63 = vld [vmem:[#allocation5 + $0xb8] ss:$0 sm:$0xff] }
 0xffb   :  { %v1939_v59 = vpop.f32.mrf.mxu1 }
 0xffc   :  { %v1940_v62 = vadd.f32 %v2437_v2, %v1939_v59 }
 0xffe   :  { %v1945_v5 = vadd.f32 %v1940_v62, %v3189_v31  ;;  %v2031_v62 = vmul.u32 8, %v223_v53 }
0x1000   :  { %v1949_v8 = vsel %vm139_vm6, %v1945_v5, 0.0  ;;  %vm2032_vm8 = vcmp.ge.s32.totalorder %v2711_v17, %v2031_v62 }
0x1001   :  { %1950 = vadd.xlane.f32.xlu1 %v1949_v8 }
0x100b   :  { %v1942_v4 = vpop.f32.mrf.mxu1 }
0x100c   :  { %v1943_v24 = vadd.f32 %v2437_v2, %v1942_v4 }
0x100e   :  { %v1946_v9 = vadd.f32 %v1943_v24, %v3194_v20 }
0x1010   :  { %v1952_v7 = vsel %vm139_vm6, %v1946_v9, 0.0 }
0x1011   :  { %1953 = vadd.xlane.f32.xlu2 %v1952_v7 }
0x1074   :  { %v1951_v11 = vpop.xlane.xlu1 %1950 }
0x1075   :  { %v1955_v3 = vmul.f32 %v1951_v11, %v2747_v0 }
0x1077   :  { %v3223_v38 = vsub.f32 %v1945_v5, %v1955_v3  ;;  %v2034_v5 = vmul.u32 8, %v2033_v6 }
0x1079   :  { %v1959_v14 = vmul.f32 %v3223_v38, %v3223_v38  ;;  %v1970_v7 = vmul.f32 %v2438_v63, %v3223_v38  ;;  %vm2035_vm9 = vcmp.lt.s32.totalorder %v2711_v17, %v2034_v5 }
0x107b   :  { %v1961_v31 = vsel %vm139_vm6, %v1959_v14, 0.0 }
0x107c   :  { %1962 = vadd.xlane.f32.xlu2 %v1961_v31 }
0x1084   :  { %v1954_v16 = vpop.xlane.xlu2 %1953 }
0x1085   :  { %v1956_v12 = vmul.f32 %v1954_v16, %v2747_v0 }
0x1087   :  { %v3229_v19 = vsub.f32 %v1946_v9, %v1956_v12 }
0x1089   :  { %v1960_v20 = vmul.f32 %v3229_v19, %v3229_v19  ;;  %v1971_v11 = vmul.f32 %v2438_v63, %v3229_v19  ;;  %v2061_v19 = vld [vmem:[#allocation2 + $0x40] sm:$0xff] }
0x108b   :  { %v1964_v57 = vsel %vm139_vm6, %v1960_v20, 0.0  ;;  %v2439_v20 = vld [vmem:[#allocation5 + $0xc0] ss:$0 sm:$0xff] }
0x108c   :  { %1965 = vadd.xlane.f32.xlu0 %v1964_v57 }
0x10ef   :  { %v1963_v22 = vpop.xlane.xlu2 %1962 }
0x10f0   :  { %v1967_v1 = vmul.f32 %v1963_v22, %v2747_v0 }
0x10f2   :  { %v1972_v43 = vadd.f32 1e-12, %v1967_v1 }
0x10f4   :  { %2541 = vrsqrt.f32 %v1972_v43  ;;  %vm1981_vm10 = vcmp.eq.f32.partialorder %v1972_v43, inf  ;;  %v1984_v29 = vand.u32 2147483648, %v1972_v43  ;;  %vm1983_vm11 = vcmp.eq.f32.partialorder %v1972_v43, 0.0 }
0x10fa   :  { %v2542_v41 = vpop.eup %2541 }
0x10fb   :  { %v1975_v37 = vmul.f32 %v2542_v41, %v1972_v43 }
0x10fd   :  { %v1976_v25 = vmul.f32 %v2542_v41, %v1975_v37 }
0x10ff   :  { %v1966_v45 = vpop.xlane.xlu0 %1965  ;;  %v1977_v26 = vmul.f32 0.5, %v1976_v25 }
0x1100   :  { %v1968_v46 = vmul.f32 %v1966_v45, %v2747_v0  ;;  %v2063_v0 = vld [vmem:[#allocation2 + $0xe0] sm:$0xff] }
0x1101   :  { %v1978_v49 = vsub.f32 1.5, %v1977_v26  ;;  %2083 = vmatpush.msra.mxu3 %v2063_v0 }
0x1102   :  { %v1973_v10 = vadd.f32 1e-12, %v1968_v46 }
0x1103   :  { %v1979_v27 = vmul.f32 %v2542_v41, %v1978_v49  ;;  %2084 = vmatpush.msra.mxu3 %v2062_v44  ;;  %v2440_v41 = vld [vmem:[#allocation5 + $0xc8] ss:$0 sm:$0xff] }
0x1104   :  { %2543 = vrsqrt.f32 %v1973_v10  ;;  %vm1993_vm15 = vcmp.eq.f32.partialorder %v1973_v10, inf  ;;  %v1996_v40 = vand.u32 2147483648, %v1973_v10  ;;  %vm1995_vm1 = vcmp.eq.f32.partialorder %v1973_v10, 0.0 }
0x1105   :  { %v1980_v28 = vmul.f32 %v1979_v27, %v1972_v43  ;;  %2085 = vmatpush.msra.mxu3 %v2061_v19 }
0x1107   :  { %v1982_v30 = vsel %vm1981_vm10, %v1972_v43, %v1980_v28  ;;  %vm2036_vm10 = vmand %vm2032_vm8, %vm2035_vm9 }
0x1108   :  { %v1985_v32 = vsel %vm1983_vm11, %v1984_v29, %v1982_v30  ;;  %v2037_v38 = vsel %vm2036_vm10, 0.125, %v2643_v18 }
0x1109   :  { %2545 = vrcp.f32 %v1985_v32  ;;  %v2009_v36 = vand.u32 2147483648, %v1985_v32  ;;  %vm2003_vm13 = vweird.f32 %v1985_v32  ;;  %v2007_v35 = vand.u32 2147483647, %v1985_v32 }
0x110a   :  { %v2544_v58 = vpop.eup %2543 }
0x110b   :  { %v1987_v34 = vmul.f32 %v2544_v58, %v1973_v10  ;;  %v2010_v24 = vor.u32 1.1754944e-38, %v2009_v36  ;;  %vm2008_vm3 = vcmp.eq.f32.partialorder %v2007_v35, 8.507059e+37 }
0x110d   :  { %v1988_v33 = vmul.f32 %v2544_v58, %v1987_v34 }
0x110f   :  { %v1989_v23 = vmul.f32 0.5, %v1988_v33  ;;  %v2546_v54 = vpop.eup %2545  ;;  %v2138_v33 = vld [vmem:[#allocation2 + $0x138] sm:$0xff] }
0x1110   :  { %v1999_v21 = vmul.f32 %v2546_v54, %v1985_v32  ;;  %vm2004_vm12 = vweird.f32 %v2546_v54 }
0x1111   :  { %v1990_v39 = vsub.f32 1.5, %v1989_v23  ;;  %vm3237_vm14 = vmor %vm2003_vm13, %vm2004_vm12 }
0x1112   :  { %v2000_v52 = vsub.f32 1.0, %v1999_v21 }
0x1113   :  { %v1991_v42 = vmul.f32 %v2544_v58, %v1990_v39  ;;  %v2136_v39 = vld [vmem:[#allocation2 + $0x98] sm:$0xff] }
0x1114   :  { %v2001_v56 = vmul.f32 %v2546_v54, %v2000_v52 }
0x1115   :  { %v1992_v48 = vmul.f32 %v1991_v42, %v1973_v10  ;;  %v2135_v42 = vld [vmem:[#allocation2 + $0x48] sm:$0xff] }
0x1116   :  { %v2002_v51 = vadd.f32 %v2546_v54, %v2001_v56 }
0x1117   :  { %v1994_v47 = vsel %vm1993_vm15, %v1973_v10, %v1992_v48 }
0x1118   :  { %v1997_v50 = vsel %vm1995_vm1, %v1996_v40, %v1994_v47  ;;  %v2006_v4 = vsel %vm3237_vm14, %v2546_v54, %v2002_v51  ;;  %v2137_v54 = vld [vmem:[#allocation2 + $0xe8] sm:$0xff] }
0x1119   :  { %2547 = vrcp.f32 %v1997_v50  ;;  %v2024_v2 = vand.u32 2147483648, %v1997_v50  ;;  %v2022_v13 = vand.u32 2147483647, %v1997_v50  ;;  %vm2018_vm2 = vweird.f32 %v1997_v50 }
0x111a   :  { %v2011_v14 = vsel %vm2008_vm3, %v2010_v24, %v2006_v4  ;;  %v2441_v4 = vld [vmem:[#allocation5 + $0xd0] ss:$0 sm:$0xff] }
0x111b   :  { %v2025_v3 = vor.u32 1.1754944e-38, %v2024_v2  ;;  %vm2023_vm7 = vcmp.eq.f32.partialorder %v2022_v13, 8.507059e+37  ;;  %v2012_v57 = vmul.f32 %v2011_v14, %v1970_v7 }
0x111d   :  { %v2029_v1 = vadd.f32 %v2439_v20, %v2012_v57 }
0x111f   :  { %v2548_v55 = vpop.eup %2547 }
0x1120   :  { %v2014_v60 = vmul.f32 %v2548_v55, %v1997_v50  ;;  %vm2019_vm0 = vweird.f32 %v2548_v55 }
0x1121   :  { %vm2020_vm4 = vmor %vm2018_vm2, %vm2019_vm0 }
0x1122   :  { %v2015_v61 = vsub.f32 1.0, %v2014_v60 }
0x1124   :  { %v2016_v8 = vmul.f32 %v2548_v55, %v2015_v61 }
0x1126   :  { %v2017_v9 = vadd.f32 %v2548_v55, %v2016_v8 }
0x1128   :  { %v2021_v31 = vsel %vm2020_vm4, %v2548_v55, %v2017_v9 }
0x1129   :  { %v2026_v16 = vsel %vm2023_vm7, %v2025_v3, %v2021_v31 }
0x112a   :  { %v2027_v12 = vmul.f32 %v2026_v16, %v1971_v11 }
0x112c   :  { %v2030_v22 = vadd.f32 %v2439_v20, %v2027_v12 }
0x112e   :  { %2055 = vmatpush.msra.mxu2 %v2030_v22 }
0x1130   :  { %2056 = vmatpush.msra.mxu2 %v2029_v1 }
0x1131   :  { %2334 = vmatmul.msk.f32.vlgmr.msra.gmra.mxu2 %vm425_vm5, %v2037_v38 }
0x1132   :  { %2156 = vmatpush.msrb.mxu2 %v2138_v33 }
0x1134   :  { %2157 = vmatpush.msrb.mxu2 %v2137_v54 }
0x1136   :  { %2158 = vmatpush.msrb.mxu2 %v2136_v39 }
0x1138   :  { %2159 = vmatpush.msrb.mxu2 %v2135_v42 }
0x11b4   :  { %v2058_v43 = vpop.f32.mrf.mxu2 }
0x11b5   :  { %2335 = vmatmul.msk.f32.vlgmr.msra.gmra.mxu3 %vm139_vm6, %v2058_v43 }
0x1238   :  { %v2087_v17 = vpop.f32.mrf.mxu3 }
0x1239   :  { %v2088_v37 = vadd.f32 %v2440_v41, %v2087_v17  ;;  %v2208_v17 = vld [vmem:[#allocation5 + $0x28] sm:$0xff] }
0x123b   :  { %v2091_v25 = vmul.f32 0.70710677, %v2088_v37  ;;  %v2090_v62 = vmul.f32 0.5, %v2088_v37 }
0x123d   :  { %v2092_v45 = vmul.f32 %v2091_v25, %v2091_v25 }
0x123f   :  { %v2093_v46 = vmin.f32 %v2092_v45, 16.0 }
0x1241   :  { %v2094_v26 = vmul.f32 2.1237322e-06, %v2093_v46  ;;  %v2105_v10 = vmul.f32 3.8918573e-05, %v2093_v46 }
0x1243   :  { %v2095_v49 = vadd.f32 0.00028619796, %v2094_v26  ;;  %v2106_v27 = vadd.f32 0.001143296, %v2105_v10 }
0x1245   :  { %v2096_v28 = vmul.f32 %v2095_v49, %v2093_v46  ;;  %v2107_v18 = vmul.f32 %v2106_v27, %v2093_v46 }
0x1247   :  { %v2108_v29 = vadd.f32 0.014752088, %v2107_v18  ;;  %v2097_v30 = vadd.f32 0.0036580483, %v2096_v28 }
0x1249   :  { %v2109_v58 = vmul.f32 %v2108_v29, %v2093_v46  ;;  %v2098_v34 = vmul.f32 %v2097_v30, %v2093_v46 }
0x124b   :  { %v2110_v32 = vadd.f32 0.112945676, %v2109_v58  ;;  %v2099_v0 = vadd.f32 0.05243302, %v2098_v34 }
0x124d   :  { %v2111_v23 = vmul.f32 %v2110_v32, %v2093_v46  ;;  %v2100_v48 = vmul.f32 %v2099_v0, %v2093_v46 }
0x124f   :  { %v2112_v15 = vadd.f32 0.4994258, %v2111_v23  ;;  %v2101_v40 = vadd.f32 0.18741608, %v2100_v48 }
0x1251   :  { %v2113_v44 = vmul.f32 %v2112_v15, %v2093_v46  ;;  %v2102_v50 = vmul.f32 %v2101_v40, %v2093_v46  ;;  %v2442_v40 = vld [vmem:[#allocation5 + $0xd8] ss:$0 sm:$0xff] }
0x1253   :  { %v2114_v21 = vadd.f32 1.0, %v2113_v44  ;;  %v2103_v55 = vadd.f32 1.1283791, %v2102_v50 }
0x1255   :  { %2549 = vrcp.f32 %v2114_v21  ;;  %v2126_v56 = vand.u32 2147483648, %v2114_v21  ;;  %v2124_v60 = vand.u32 2147483647, %v2114_v21  ;;  %vm2120_vm15 = vweird.f32 %v2114_v21 }
0x1256   :  { %v2104_v61 = vmul.f32 %v2103_v55, %v2091_v25 }
0x1257   :  { %v2127_v36 = vor.u32 1.1754944e-38, %v2126_v56  ;;  %vm2125_vm12 = vcmp.eq.f32.partialorder %v2124_v60, 8.507059e+37 }
0x125b   :  { %v2550_v47 = vpop.eup %2549 }
0x125c   :  { %v2116_v52 = vmul.f32 %v2550_v47, %v2114_v21  ;;  %vm2121_vm11 = vweird.f32 %v2550_v47 }
0x125d   :  { %vm2122_vm1 = vmor %vm2120_vm15, %vm2121_vm11 }
0x125e   :  { %v2117_v53 = vsub.f32 1.0, %v2116_v52 }
0x1260   :  { %v2118_v6 = vmul.f32 %v2550_v47, %v2117_v53 }
0x1262   :  { %v2119_v51 = vadd.f32 %v2550_v47, %v2118_v6 }
0x1264   :  { %v2123_v35 = vsel %vm2122_vm1, %v2550_v47, %v2119_v51 }
0x1265   :  { %v2128_v63 = vsel %vm2125_vm12, %v2127_v36, %v2123_v35 }
0x1266   :  { %v2129_v2 = vmul.f32 %v2128_v63, %v2104_v61 }
0x1268   :  { %v2336_v59 = vclamps-f32 %v2129_v2, 1.0 }
0x126a   :  { %v2132_v5 = vadd.f32 1.0, %v2336_v59 }
0x126c   :  { %v2133_v8 = vmul.f32 %v2132_v5, %v2090_v62 }
0x126e   :  { %v2134_v13 = vadd.f32 %v2133_v8, %v2058_v43  ;;  %v2209_v43 = vld [vmem:[#allocation5 + $0x30] sm:$0xff] }
0x126f   :  { %2229 = vmatpush.msrb.mxu3 %v2209_v43 }
0x1270   :  { %2337 = vmatmul.msk.f32.vlgmr.msrb.gmra.mxu2 %vm139_vm6, %v2134_v13 }
0x1271   :  { %2230 = vmatpush.msrb.mxu3 %v2208_v17 }
0x12f3   :  { %v2161_v24 = vpop.f32.mrf.mxu2 }
0x12f4   :  { %v2162_v9 = vadd.f32 %v2441_v4, %v2161_v24 }
0x12f6   :  { %v2165_v7 = vmul.f32 0.70710677, %v2162_v9  ;;  %v2164_v44 = vmul.f32 0.5, %v2162_v9 }
0x12f8   :  { %v2166_v11 = vmul.f32 %v2165_v7, %v2165_v7 }
0x12fa   :  { %v2167_v3 = vmin.f32 %v2166_v11, 16.0 }
0x12fc   :  { %v2168_v14 = vmul.f32 2.1237322e-06, %v2167_v3  ;;  %v2179_v31 = vmul.f32 3.8918573e-05, %v2167_v3 }
0x12fe   :  { %v2169_v16 = vadd.f32 0.00028619796, %v2168_v14  ;;  %v2180_v12 = vadd.f32 0.001143296, %v2179_v31 }
0x1300   :  { %v2170_v20 = vmul.f32 %v2169_v16, %v2167_v3  ;;  %v2181_v57 = vmul.f32 %v2180_v12, %v2167_v3 }
0x1302   :  { %v2182_v22 = vadd.f32 0.014752088, %v2181_v57  ;;  %v2171_v1 = vadd.f32 0.0036580483, %v2170_v20 }
0x1304   :  { %v2183_v38 = vmul.f32 %v2182_v22, %v2167_v3  ;;  %v2172_v41 = vmul.f32 %v2171_v1, %v2167_v3 }
0x1306   :  { %v2184_v19 = vadd.f32 0.112945676, %v2183_v38  ;;  %v2173_v45 = vadd.f32 0.05243302, %v2172_v41 }
0x1308   :  { %v2185_v37 = vmul.f32 %v2184_v19, %v2167_v3  ;;  %v2174_v10 = vmul.f32 %v2173_v45, %v2167_v3 }
0x130a   :  { %v2186_v25 = vadd.f32 0.4994258, %v2185_v37  ;;  %v2175_v49 = vadd.f32 0.18741608, %v2174_v10 }
0x130c   :  { %v2187_v46 = vmul.f32 %v2186_v25, %v2167_v3  ;;  %v2176_v28 = vmul.f32 %v2175_v49, %v2167_v3 }
0x130e   :  { %v2188_v26 = vadd.f32 1.0, %v2187_v46  ;;  %v2177_v58 = vadd.f32 1.1283791, %v2176_v28 }
0x1310   :  { %2551 = vrcp.f32 %v2188_v26  ;;  %v2200_v30 = vand.u32 2147483648, %v2188_v26  ;;  %v2198_v34 = vand.u32 2147483647, %v2188_v26  ;;  %vm2194_vm13 = vweird.f32 %v2188_v26 }
0x1311   :  { %v2178_v54 = vmul.f32 %v2177_v58, %v2165_v7 }
0x1312   :  { %v2201_v23 = vor.u32 1.1754944e-38, %v2200_v30  ;;  %vm2199_vm0 = vcmp.eq.f32.partialorder %v2198_v34, 8.507059e+37 }
0x1316   :  { %v2552_v27 = vpop.eup %2551 }
0x1317   :  { %v2190_v18 = vmul.f32 %v2552_v27, %v2188_v26  ;;  %vm2195_vm6 = vweird.f32 %v2552_v27 }
0x1318   :  { %vm2196_vm14 = vmor %vm2194_vm13, %vm2195_vm6 }
0x1319   :  { %v2191_v29 = vsub.f32 1.0, %v2190_v18 }
0x131b   :  { %v2192_v32 = vmul.f32 %v2552_v27, %v2191_v29 }
0x131d   :  { %v2193_v33 = vadd.f32 %v2552_v27, %v2192_v32 }
0x131f   :  { %v2197_v39 = vsel %vm2196_vm14, %v2552_v27, %v2193_v33 }
0x1320   :  { %v2202_v15 = vsel %vm2199_vm0, %v2201_v23, %v2197_v39 }
0x1321   :  { %v2203_v0 = vmul.f32 %v2202_v15, %v2178_v54 }
0x1323   :  { %v2338_v42 = vclamps-f32 %v2203_v0, 1.0 }
0x1325   :  { %v2206_v21 = vadd.f32 1.0, %v2338_v42 }
0x1327   :  { %v2207_v48 = vmul.f32 %v2206_v21, %v2164_v44 }
0x1329   :  { %2339 = vmatmul.msk.f32.vlgmr.msrb.gmra.mxu3 %vm425_vm5, %v2207_v48 }
0x13ac   :  { %v2232_v47 = vpop.f32.mrf.mxu3 }
0x13ad   :  { %v2233_v50 = vadd.f32 %v2442_v40, %v2232_v47 }
0x13af   :  { %2235 = vst [vmem:[#allocation7] sm:$0x3] %v2233_v50 }
0x13b0   :  { %2246 = dma.vmem_to_hbm [thread:$0]  %s2242_s13, 32, %s2244_s16, [#allocation4]  }
0x13b1   :  { %2629 = dma.done.wait [#allocation4], 32  }
0x13b2   :  { %2630 = vsyncadd [#allocation4], 4294967264 }
0x13b3   :  { %2251 = vsyncpa [#allocation3], 1 }
0x13b4   :  { %2252 = vsyncpa [#allocation6], 1 }
0x13b5   :  { %2253 = vsyncpa [#allocation4], 1 }

</bundles_post_ra>
